<compile_context>
chip_gen: v6e
topology: v6e:2x2x1
jax: 0.10.0
libtpu: 0.0.40
codegen_flags: <defaults>
</compile_context>

<pallas_src>
import functools

import jax
import jax.numpy as jnp
from jax.experimental import pallas as pl
from jax.experimental.pallas import tpu as pltpu

IN_DIM = 28 * 28     # 784
IN_PAD = 896         # 7 * 128  (lane-aligned K for the first matmul)
HIDDEN = 512
OUT_DIM = 10
OUT_PAD = 128        # lane-dense output width
TILE_B = 256         # batch tile: >=256 rows for v6e/v7x MXU occupancy,
                     # small enough for v7x's 64 MiB VMEM (bf16 tile ~0.45 MB)


def mlp_kernel(x_ref, w1_ref, b1_ref, w2_ref, b2_ref, w3_ref, b3_ref, o_ref):
    # x_ref: (TILE_B, IN_PAD) bf16; weights bf16 (in, out); biases f32 (1, out)
    x = x_ref[...]

    h1 = jnp.dot(x, w1_ref[...], preferred_element_type=jnp.float32) + b1_ref[...]
    h1 = jnp.maximum(h1, 0.0).astype(jnp.bfloat16)          # ReLU on f32 acc, cast for MXU

    h2 = jnp.dot(h1, w2_ref[...], preferred_element_type=jnp.float32) + b2_ref[...]
    h2 = jnp.maximum(h2, 0.0).astype(jnp.bfloat16)

    logits = jnp.dot(h2, w3_ref[...], preferred_element_type=jnp.float32) + b3_ref[...]
    o_ref[...] = logits.astype(o_ref.dtype)                  # (TILE_B, OUT_PAD) f32


def init_params(key):
    """Deterministic init matching nn.Linear's U(-1/sqrt(fan_in), 1/sqrt(fan_in)).

    Weights stored (in, out) so the kernel computes y = x @ W + b.
    Returned in f32 (the reference uses these; the kernel gets padded bf16 copies).
    """
    def linear(key, fan_in, fan_out):
        kw, kb = jax.random.split(key)
        bound = 1.0 / jnp.sqrt(fan_in)
        w = jax.random.uniform(kw, (fan_in, fan_out), jnp.float32, -bound, bound)
        b = jax.random.uniform(kb, (1, fan_out), jnp.float32, -bound, bound)
        return w, b

    k1, k2, k3 = jax.random.split(key, 3)
    w1, b1 = linear(k1, IN_DIM, HIDDEN)
    w2, b2 = linear(k2, HIDDEN, HIDDEN)
    w3, b3 = linear(k3, HIDDEN, OUT_DIM)
    return w1, b1, w2, b2, w3, b3


def prepare_kernel_params(params):
    """Zero-pad (K->896, out->128) and cast weights to bf16; biases stay f32."""
    w1, b1, w2, b2, w3, b3 = params
    w1p = jnp.pad(w1, ((0, IN_PAD - IN_DIM), (0, 0))).astype(jnp.bfloat16)
    w3p = jnp.pad(w3, ((0, 0), (0, OUT_PAD - OUT_DIM))).astype(jnp.bfloat16)
    b3p = jnp.pad(b3, ((0, 0), (0, OUT_PAD - OUT_DIM)))          # f32, zero-padded
    return (w1p, b1, w2.astype(jnp.bfloat16), b2, w3p, b3p)


@jax.jit
def neural_network_forward(x, kparams):
    """x: (B, 28, 28) float32 -> logits (B, 10) float32."""
    w1, b1, w2, b2, w3, b3 = kparams
    B = x.shape[0]
    x_flat = x.reshape(B, IN_DIM)                                # nn.Flatten

    # Pad batch to a multiple of TILE_B and features to IN_PAD; cast to bf16
    # in the wrapper so the streamed x DMA is half-width too.
    B_pad = pl.cdiv(B, TILE_B) * TILE_B
    x_p = jnp.pad(x_flat, ((0, B_pad - B), (0, IN_PAD - IN_DIM))).astype(jnp.bfloat16)

    grid = (B_pad // TILE_B,)

    # Streamed activation tiles.
    x_spec = pl.BlockSpec((TILE_B, IN_PAD), lambda i: (i, 0))
    out_spec = pl.BlockSpec((TILE_B, OUT_PAD), lambda i: (i, 0))
    # Weights/biases: constant index_map -> resident in VMEM across the grid.
    resident = lambda shape: pl.BlockSpec(shape, lambda i: (0, 0))

    flops = 2 * B_pad * (IN_PAD * HIDDEN + HIDDEN * HIDDEN + HIDDEN * OUT_PAD)
    bytes_accessed = (
        B_pad * IN_PAD * 2                                   # x (bf16)
        + (IN_PAD * HIDDEN + HIDDEN * HIDDEN + HIDDEN * OUT_PAD) * 2   # weights (bf16)
        + (HIDDEN + HIDDEN + OUT_PAD) * 4                    # biases (f32)
        + B_pad * OUT_PAD * 4                                # output (f32)
    )

    out = pl.pallas_call(
        mlp_kernel,
        out_shape=jax.ShapeDtypeStruct((B_pad, OUT_PAD), jnp.float32),
        grid=grid,
        in_specs=[
            x_spec,
            resident((IN_PAD, HIDDEN)), resident((1, HIDDEN)),
            resident((HIDDEN, HIDDEN)), resident((1, HIDDEN)),
            resident((HIDDEN, OUT_PAD)), resident((1, OUT_PAD)),
        ],
        out_specs=out_spec,
        compiler_params=pltpu.CompilerParams(
            dimension_semantics=("parallel",)),
        cost_estimate=pl.CostEstimate(
            flops=flops, transcendentals=0, bytes_accessed=bytes_accessed),
    )(x_p, w1, b1, w2, b2, w3, b3)

    return out[:B, :OUT_DIM]


def reference_forward(x, params):
    """Pure-JAX reference mirroring the kernel's numerics (bf16 inputs, f32 acc)."""
    w1, b1, w2, b2, w3, b3 = params
    up = lambda a: a.astype(jnp.bfloat16).astype(jnp.float32)
    xf = up(x.reshape(x.shape[0], -1))
    h1 = jnp.maximum(xf @ up(w1) + b1, 0.0)
    h2 = jnp.maximum(up(h1) @ up(w2) + b2, 0.0)
    return up(h2) @ up(w3) + b3


if __name__ == "__main__":
    key = jax.random.PRNGKey(0)
    kx, kp = jax.random.split(key)

    # Module is built for 28x28 inputs; small batch of 2 (padded internally).
    x = jax.random.uniform(kx, (2, 28, 28), jnp.float32)
    params = init_params(kp)
    kparams = prepare_kernel_params(params)

    logits = neural_network_forward(x, kparams)
    jax.block_until_ready(logits)

    ref = reference_forward(x, params)
    assert logits.shape == (2, OUT_DIM)
    assert jnp.allclose(logits, ref, atol=1e-2, rtol=1e-2), (
        f"max abs err {jnp.max(jnp.abs(logits - ref))}")

    print("KERNEL_OK")
</pallas_src>

<mosaic_0001>
module attributes {stable_mosaic.version = 11 : i64} {
  func.func @mlp_kernel(%arg0: i32, %arg1: memref<256x896xbf16, #tpu.memory_space<vmem>>, %arg2: memref<896x512xbf16, #tpu.memory_space<vmem>>, %arg3: memref<1x512xf32, #tpu.memory_space<vmem>>, %arg4: memref<512x512xbf16, #tpu.memory_space<vmem>>, %arg5: memref<1x512xf32, #tpu.memory_space<vmem>>, %arg6: memref<512x128xbf16, #tpu.memory_space<vmem>>, %arg7: memref<1x128xf32, #tpu.memory_space<vmem>>, %arg8: memref<256x128xf32, #tpu.memory_space<vmem>>) attributes {dimension_semantics = [#tpu.dimension_semantics<parallel>], iteration_bounds = array<i64: 1>, scalar_prefetch = 0 : i64, scratch_operands = 0 : i64, tpu.core_type = #tpu.core_type<tc>, window_params = [{transform_indices = @transform_0, window_bounds = array<i64: 256, 896>}, {pipeline_mode = #tpu.pipeline_mode<synchronous>, transform_indices = @transform_1, window_bounds = array<i64: 896, 512>}, {pipeline_mode = #tpu.pipeline_mode<synchronous>, transform_indices = @transform_2, window_bounds = array<i64: 1, 512>}, {pipeline_mode = #tpu.pipeline_mode<synchronous>, transform_indices = @transform_3, window_bounds = array<i64: 512, 512>}, {pipeline_mode = #tpu.pipeline_mode<synchronous>, transform_indices = @transform_4, window_bounds = array<i64: 1, 512>}, {pipeline_mode = #tpu.pipeline_mode<synchronous>, transform_indices = @transform_5, window_bounds = array<i64: 512, 128>}, {pipeline_mode = #tpu.pipeline_mode<synchronous>, transform_indices = @transform_6, window_bounds = array<i64: 1, 128>}, {transform_indices = @transform_7, window_bounds = array<i64: 256, 128>}]} {
    %c0 = arith.constant 0 : index
    %c0_0 = arith.constant 0 : index
    %0 = vector.load %arg1[%c0, %c0_0] : memref<256x896xbf16, #tpu.memory_space<vmem>>, vector<256x896xbf16>
    %c0_1 = arith.constant 0 : index
    %c0_2 = arith.constant 0 : index
    %1 = vector.load %arg2[%c0_1, %c0_2] : memref<896x512xbf16, #tpu.memory_space<vmem>>, vector<896x512xbf16>
    %cst = arith.constant dense<0.000000e+00> : vector<256x512xf32>
    %2 = tpu.matmul %0, %1, %cst {dimension_numbers = #tpu.dot_dimension_numbers<[1], [0], [0], [1], [0, 0, 1, 1], [], []>} : vector<256x896xbf16>, vector<896x512xbf16>, vector<256x512xf32> -> vector<256x512xf32>
    %c0_3 = arith.constant 0 : index
    %c0_4 = arith.constant 0 : index
    %3 = vector.load %arg3[%c0_3, %c0_4] : memref<1x512xf32, #tpu.memory_space<vmem>>, vector<1x512xf32>
    %4 = vector.broadcast %3 : vector<1x512xf32> to vector<256x512xf32>
    %5 = arith.addf %2, %4 : vector<256x512xf32>
    %cst_5 = arith.constant 0.000000e+00 : f32
    %6 = vector.broadcast %cst_5 : f32 to vector<256x512xf32>
    %7 = arith.maximumf %5, %6 : vector<256x512xf32>
    %8 = arith.truncf %7 : vector<256x512xf32> to vector<256x512xbf16>
    %c0_6 = arith.constant 0 : index
    %c0_7 = arith.constant 0 : index
    %9 = vector.load %arg4[%c0_6, %c0_7] : memref<512x512xbf16, #tpu.memory_space<vmem>>, vector<512x512xbf16>
    %cst_8 = arith.constant dense<0.000000e+00> : vector<256x512xf32>
    %10 = tpu.matmul %8, %9, %cst_8 {dimension_numbers = #tpu.dot_dimension_numbers<[1], [0], [0], [1], [0, 0, 1, 1], [], []>} : vector<256x512xbf16>, vector<512x512xbf16>, vector<256x512xf32> -> vector<256x512xf32>
    %c0_9 = arith.constant 0 : index
    %c0_10 = arith.constant 0 : index
    %11 = vector.load %arg5[%c0_9, %c0_10] : memref<1x512xf32, #tpu.memory_space<vmem>>, vector<1x512xf32>
    %12 = vector.broadcast %11 : vector<1x512xf32> to vector<256x512xf32>
    %13 = arith.addf %10, %12 : vector<256x512xf32>
    %cst_11 = arith.constant 0.000000e+00 : f32
    %14 = vector.broadcast %cst_11 : f32 to vector<256x512xf32>
    %15 = arith.maximumf %13, %14 : vector<256x512xf32>
    %16 = arith.truncf %15 : vector<256x512xf32> to vector<256x512xbf16>
    %c0_12 = arith.constant 0 : index
    %c0_13 = arith.constant 0 : index
    %17 = vector.load %arg6[%c0_12, %c0_13] : memref<512x128xbf16, #tpu.memory_space<vmem>>, vector<512x128xbf16>
    %cst_14 = arith.constant dense<0.000000e+00> : vector<256x128xf32>
    %18 = tpu.matmul %16, %17, %cst_14 {dimension_numbers = #tpu.dot_dimension_numbers<[1], [0], [0], [1], [0, 0, 1, 1], [], []>} : vector<256x512xbf16>, vector<512x128xbf16>, vector<256x128xf32> -> vector<256x128xf32>
    %c0_15 = arith.constant 0 : index
    %c0_16 = arith.constant 0 : index
    %19 = vector.load %arg7[%c0_15, %c0_16] : memref<1x128xf32, #tpu.memory_space<vmem>>, vector<1x128xf32>
    %20 = vector.broadcast %19 : vector<1x128xf32> to vector<256x128xf32>
    %21 = arith.addf %18, %20 : vector<256x128xf32>
    %c0_17 = arith.constant 0 : index
    %c0_18 = arith.constant 0 : index
    %22 = vector.load %arg8[%c0_17, %c0_18] : memref<256x128xf32, #tpu.memory_space<vmem>>, vector<256x128xf32>
    tpu.vector_store %arg8[%c0_17, %c0_18], %21 {strides = array<i32>} : memref<256x128xf32, #tpu.memory_space<vmem>>, vector<256x128xf32>,
    return
  }
  func.func @transform_0(%arg0: i32) -> (i32, i32) {
    %c0_i32 = arith.constant 0 : i32
    %c0_i32_0 = arith.constant 0 : i32
    return %arg0, %c0_i32 : i32, i32
  }
  func.func @transform_1(%arg0: i32) -> (i32, i32) {
    %c0_i32 = arith.constant 0 : i32
    %c0_i32_0 = arith.constant 0 : i32
    %c0_i32_1 = arith.constant 0 : i32
    return %c0_i32, %c0_i32_0 : i32, i32
  }
  func.func @transform_2(%arg0: i32) -> (i32, i32) {
    %c0_i32 = arith.constant 0 : i32
    %c0_i32_0 = arith.constant 0 : i32
    %c0_i32_1 = arith.constant 0 : i32
    return %c0_i32, %c0_i32_0 : i32, i32
  }
  func.func @transform_3(%arg0: i32) -> (i32, i32) {
    %c0_i32 = arith.constant 0 : i32
    %c0_i32_0 = arith.constant 0 : i32
    %c0_i32_1 = arith.constant 0 : i32
    return %c0_i32, %c0_i32_0 : i32, i32
  }
  func.func @transform_4(%arg0: i32) -> (i32, i32) {
    %c0_i32 = arith.constant 0 : i32
    %c0_i32_0 = arith.constant 0 : i32
    %c0_i32_1 = arith.constant 0 : i32
    return %c0_i32, %c0_i32_0 : i32, i32
  }
  func.func @transform_5(%arg0: i32) -> (i32, i32) {
    %c0_i32 = arith.constant 0 : i32
    %c0_i32_0 = arith.constant 0 : i32
    %c0_i32_1 = arith.constant 0 : i32
    return %c0_i32, %c0_i32_0 : i32, i32
  }
  func.func @transform_6(%arg0: i32) -> (i32, i32) {
    %c0_i32 = arith.constant 0 : i32
    %c0_i32_0 = arith.constant 0 : i32
    %c0_i32_1 = arith.constant 0 : i32
    return %c0_i32, %c0_i32_0 : i32, i32
  }
  func.func @transform_7(%arg0: i32) -> (i32, i32) {
    %c0_i32 = arith.constant 0 : i32
    %c0_i32_0 = arith.constant 0 : i32
    return %arg0, %c0_i32 : i32, i32
  }
}

</mosaic_0001>

<bundles_post_ra>
// kernel: neural_network_forward.1
= control target key start
LH: loop header
LB: loop body
LE: loop exit
PB: predicated region body
PF: predicated region fallthrough
CT: control target
= control target key end

     0   :  { %12 = vsyncpa [#allocation3], 0  ;;  %s10633_s0 = inlined_call_operand.vmem [shape: bf16[256,896], index: 0, kind: input, shape index: {}]   ;;  %s10634_s1 = inlined_call_operand.hbm [shape: bf16[896,512], index: 1, kind: input, shape index: {}]   ;;  %s10635_s2 = inlined_call_operand.vmem [shape: f32[1,512], index: 2, kind: input, shape index: {}]   ;;  %s10636_s3 = inlined_call_operand.vmem [shape: bf16[512,512], index: 3, kind: input, shape index: {}]   ;;  %s10637_s4 = inlined_call_operand.vmem [shape: f32[1,512], index: 4, kind: input, shape index: {}]   ;;  %s10638_s5 = inlined_call_operand.hbm [shape: bf16[512,128], index: 5, kind: input, shape index: {}]   ;;  %s10639_s6 = inlined_call_operand.vmem [shape: f32[1,128], index: 6, kind: input, shape index: {}]   ;;  %s10640_s7 = inlined_call_operand.vmem [shape: f32[256,128], index: 7, kind: output, shape index: {}]  }
   0x1   :  { %13 = vsyncpa [#allocation5], 0  ;;  %s7843_s24 = smov [#allocation2]  }
   0x2   :  { %s21_s25 = sshll.u32 %s7843_s24, 4  ;;  %s22_s25 = int_to_ptr.vmem [resolvable:$true] %s21_s25 }
   0x3   :  { %s7807_s26 = scalar_lea.vmem %s22_s25, 28672  ;;  %p7812_p1 = scmp.lt.s32.totalorder %s22_s25, %s22_s25 }
   0x4   :  { %p7808_p0 = scmp.ne.s32.totalorder %s22_s25, %s7807_s26  ;;  %p7813_p2 = scmp.lt.s32.totalorder %s7807_s26, %s7807_s26 }
   0x6   :  { %p7814_p3 = por %p7813_p2, %p7812_p1 }
   0x8   :  { %p7815_p4 = pnand %p7814_p3, %p7808_p0 }
   0xa   :  { %7818 = shalt.err (!%p7815_p4)
}
   0xb   :  { %s7844_s27 = smov 256   ;;  %s7845_s28 = smov 16  }
   0xc   :  { %27 = dma.hbm_to_vmem [thread:$0]  %s10634_s1, 28672, %s22_s25, [#allocation3], %s7844_s27, %s7844_s27, %s7845_s28  }
   0xd   :  { %s7846_s8 = smov [#allocation4]  }
   0xe   :  { %s39_s9 = sshll.u32 %s7846_s8, 4  ;;  %s40_s9 = int_to_ptr.vmem [resolvable:$true] %s39_s9 }
   0xf   :  { %s7827_s10 = scalar_lea.vmem %s40_s9, 4096  ;;  %p7832_p6 = scmp.lt.s32.totalorder %s40_s9, %s40_s9 }
  0x10   :  { %p7828_p5 = scmp.ne.s32.totalorder %s40_s9, %s7827_s10  ;;  %p7833_p7 = scmp.lt.s32.totalorder %s7827_s10, %s7827_s10 }
  0x12   :  { %p7834_p8 = por %p7833_p7, %p7832_p6 }
  0x14   :  { %p7835_p9 = pnand %p7834_p8, %p7828_p5 }
  0x16   :  { %7838 = shalt.err (!%p7835_p9)
}
  0x17   :  { %s7847_s11 = smov 64   ;;  %s7848_s12 = smov 4  }
  0x18   :  { %45 = dma.hbm_to_vmem [thread:$0]  %s10638_s5, 4096, %s40_s9, [#allocation5], %s7847_s11, %s7847_s11, %s7848_s12  }
  0x19   :  { %7839 = dma.done.wait [#allocation3], 28672  }
  0x1a   :  { %7840 = vsyncadd [#allocation3], 4294938624 }
  0x1b   :  { %7841 = dma.done.wait [#allocation5], 4096  }
  0x1c   :  { %7842 = vsyncadd [#allocation5], 4294963200  ;;  %v6966_v0 = vld [vmem:[#allocation2 + $0xe4] ss:$16 sps:$4 sm:$0xff]   ;;  %v6970_v2 = vld [vmem:[#allocation2 + $0xe0] ss:$16 sps:$4 sm:$0xff]  }
  0x1d   :  { %v6968_v1 = vld [vmem:[#allocation2 + $0x2e4] ss:$16 sps:$4 sm:$0xff]   ;;  %2125 = vmatprep.subr.bf16.mxu0 %v6966_v0  ;;  %v6971_v3 = vld [vmem:[#allocation2 + $0x2e0] ss:$16 sps:$4 sm:$0xff]   ;;  %v7067_v51 = vld [vmem:[%s10633_s0 + $0xc] ss:$28 sps:$4 sm:$0xff]  }
  0x1e   :  { %2318 = vmatprep.subr.bf16.mxu1 %v6968_v1  ;;  %v6972_v4 = vld [vmem:[#allocation2 + $0xc4] ss:$16 sps:$4 sm:$0xff]   ;;  %2126 = vmatpush1.bf16.msra.mxu0 %v6970_v2  ;;  %v6976_v6 = vld [vmem:[#allocation2 + $0xc0] ss:$16 sps:$4 sm:$0xff]  }
  0x1f   :  { %2319 = vmatpush1.bf16.msra.mxu1 %v6971_v3  ;;  %v6974_v5 = vld [vmem:[#allocation2 + $0x2c4] ss:$16 sps:$4 sm:$0xff]   ;;  %2127 = vmatprep.subr.bf16.mxu0 %v6972_v4  ;;  %v6977_v7 = vld [vmem:[#allocation2 + $0x2c0] ss:$16 sps:$4 sm:$0xff]  }
  0x20   :  { %2320 = vmatprep.subr.bf16.mxu1 %v6974_v5  ;;  %v6978_v8 = vld [vmem:[#allocation2 + $0xa4] ss:$16 sps:$4 sm:$0xff]   ;;  %v6982_v10 = vld [vmem:[#allocation2 + $0xa0] ss:$16 sps:$4 sm:$0xff]   ;;  %2350 = vmatprep.mubr.bf16.mxu1 %v7067_v51 }
  0x21   :  { %v6980_v9 = vld [vmem:[#allocation2 + $0x2a4] ss:$16 sps:$4 sm:$0xff]   ;;  %v6983_v11 = vld [vmem:[#allocation2 + $0x2a0] ss:$16 sps:$4 sm:$0xff]  }
  0x22   :  { %2128 = vmatpush1.bf16.msra.mxu0 %v6976_v6  ;;  %v6984_v12 = vld [vmem:[#allocation2 + $0x84] ss:$16 sps:$4 sm:$0xff]   ;;  %v6988_v14 = vld [vmem:[#allocation2 + $0x80] ss:$16 sps:$4 sm:$0xff]  }
  0x23   :  { %2321 = vmatpush1.bf16.msra.mxu1 %v6977_v7  ;;  %2129 = vmatprep.subr.bf16.mxu0 %v6978_v8  ;;  %v6986_v13 = vld [vmem:[#allocation2 + $0x284] ss:$16 sps:$4 sm:$0xff]   ;;  %v6989_v15 = vld [vmem:[#allocation2 + $0x280] ss:$16 sps:$4 sm:$0xff]   ;;  %v7074_v8 = vld [vmem:[%s10633_s0 + $0x3c] ss:$28 sps:$4 sm:$0xff]  }
  0x24   :  { %2322 = vmatprep.subr.bf16.mxu1 %v6980_v9  ;;  %v6990_v16 = vld [vmem:[#allocation2 + $0x64] ss:$16 sps:$4 sm:$0xff]   ;;  %v6994_v18 = vld [vmem:[#allocation2 + $0x60] ss:$16 sps:$4 sm:$0xff]  }
  0x25   :  { %v6992_v17 = vld [vmem:[#allocation2 + $0x264] ss:$16 sps:$4 sm:$0xff]   ;;  %v6995_v19 = vld [vmem:[#allocation2 + $0x260] ss:$16 sps:$4 sm:$0xff]  }
  0x26   :  { %2130 = vmatpush1.bf16.msra.mxu0 %v6982_v10  ;;  %v6996_v20 = vld [vmem:[#allocation2 + $0x44] ss:$16 sps:$4 sm:$0xff]   ;;  %v7000_v22 = vld [vmem:[#allocation2 + $0x40] ss:$16 sps:$4 sm:$0xff]  }
  0x27   :  { %2323 = vmatpush1.bf16.msra.mxu1 %v6983_v11  ;;  %2131 = vmatprep.subr.bf16.mxu0 %v6984_v12  ;;  %v6998_v21 = vld [vmem:[#allocation2 + $0x244] ss:$16 sps:$4 sm:$0xff]   ;;  %v7001_v23 = vld [vmem:[#allocation2 + $0x240] ss:$16 sps:$4 sm:$0xff]  }
  0x28   :  { %2324 = vmatprep.subr.bf16.mxu1 %v6986_v13  ;;  %v7002_v24 = vld [vmem:[#allocation2 + $0x24] ss:$16 sps:$4 sm:$0xff]   ;;  %v7006_v26 = vld [vmem:[#allocation2 + $0x20] ss:$16 sps:$4 sm:$0xff]  }
  0x29   :  { %v7004_v25 = vld [vmem:[#allocation2 + $0x224] ss:$16 sps:$4 sm:$0xff]   ;;  %v7007_v27 = vld [vmem:[#allocation2 + $0x220] ss:$16 sps:$4 sm:$0xff]  }
  0x2a   :  { %2132 = vmatpush1.bf16.msra.mxu0 %v6988_v14  ;;  %v7008_v28 = vld [vmem:[#allocation2 + $0x4] ss:$16 sps:$4 sm:$0xff]   ;;  %v7012_v30 = vld [vmem:[#allocation2] ss:$16 sps:$4 sm:$0xff]  }
  0x2b   :  { %2325 = vmatpush1.bf16.msra.mxu1 %v6989_v15  ;;  %2133 = vmatprep.subr.bf16.mxu0 %v6990_v16  ;;  %v7010_v29 = vld [vmem:[#allocation2 + $0x204] ss:$16 sps:$4 sm:$0xff]   ;;  %v7013_v31 = vld [vmem:[#allocation2 + $0x200] ss:$16 sps:$4 sm:$0xff]  }
  0x2c   :  { %2326 = vmatprep.subr.bf16.mxu1 %v6992_v17  ;;  %v7014_v32 = vld [vmem:[#allocation2 + $0x1e4] ss:$16 sps:$4 sm:$0xff]   ;;  %v7018_v34 = vld [vmem:[#allocation2 + $0x1e0] ss:$16 sps:$4 sm:$0xff]  }
  0x2d   :  { %v7016_v33 = vld [vmem:[#allocation2 + $0x3e4] ss:$16 sps:$4 sm:$0xff]   ;;  %v7019_v35 = vld [vmem:[#allocation2 + $0x3e0] ss:$16 sps:$4 sm:$0xff]  }
  0x2e   :  { %2134 = vmatpush1.bf16.msra.mxu0 %v6994_v18  ;;  %v7020_v36 = vld [vmem:[#allocation2 + $0x1c4] ss:$16 sps:$4 sm:$0xff]   ;;  %v7024_v38 = vld [vmem:[#allocation2 + $0x1c0] ss:$16 sps:$4 sm:$0xff]  }
  0x2f   :  { %2327 = vmatpush1.bf16.msra.mxu1 %v6995_v19  ;;  %2135 = vmatprep.subr.bf16.mxu0 %v6996_v20  ;;  %v7022_v37 = vld [vmem:[#allocation2 + $0x3c4] ss:$16 sps:$4 sm:$0xff]   ;;  %v7025_v39 = vld [vmem:[#allocation2 + $0x3c0] ss:$16 sps:$4 sm:$0xff]   ;;  %v7085_v19 = vld [vmem:[%s10633_s0 + $0x7c] ss:$28 sps:$4 sm:$0xff]  }
  0x30   :  { %2328 = vmatprep.subr.bf16.mxu1 %v6998_v21  ;;  %v7026_v40 = vld [vmem:[#allocation2 + $0x1a4] ss:$16 sps:$4 sm:$0xff]   ;;  %v7030_v42 = vld [vmem:[#allocation2 + $0x1a0] ss:$16 sps:$4 sm:$0xff]  }
  0x31   :  { %v7028_v41 = vld [vmem:[#allocation2 + $0x3a4] ss:$16 sps:$4 sm:$0xff]   ;;  %v7031_v43 = vld [vmem:[#allocation2 + $0x3a0] ss:$16 sps:$4 sm:$0xff]  }
  0x32   :  { %2136 = vmatpush1.bf16.msra.mxu0 %v7000_v22  ;;  %v7032_v44 = vld [vmem:[#allocation2 + $0x184] ss:$16 sps:$4 sm:$0xff]   ;;  %v7036_v46 = vld [vmem:[#allocation2 + $0x180] ss:$16 sps:$4 sm:$0xff]  }
  0x33   :  { %2329 = vmatpush1.bf16.msra.mxu1 %v7001_v23  ;;  %2137 = vmatprep.subr.bf16.mxu0 %v7002_v24  ;;  %v7034_v45 = vld [vmem:[#allocation2 + $0x384] ss:$16 sps:$4 sm:$0xff]   ;;  %v7037_v47 = vld [vmem:[#allocation2 + $0x380] ss:$16 sps:$4 sm:$0xff]  }
  0x34   :  { %2330 = vmatprep.subr.bf16.mxu1 %v7004_v25  ;;  %v7038_v48 = vld [vmem:[#allocation2 + $0x164] ss:$16 sps:$4 sm:$0xff]   ;;  %v7042_v52 = vld [vmem:[#allocation2 + $0x160] ss:$16 sps:$4 sm:$0xff]  }
  0x35   :  { %v7064_v49 = vld [vmem:[%s10633_s0 + $0x4] ss:$28 sps:$4 sm:$0xff]   ;;  %v7078_v16 = vld [vmem:[%s10633_s0 + $0x38] ss:$28 sps:$4 sm:$0xff]  }
  0x36   :  { %2138 = vmatpush1.bf16.msra.mxu0 %v7006_v26  ;;  %v7040_v50 = vld [vmem:[#allocation2 + $0x364] ss:$16 sps:$4 sm:$0xff]   ;;  %2157 = vmatprep.mubr.bf16.mxu0 %v7064_v49  ;;  %v7043_v53 = vld [vmem:[#allocation2 + $0x360] ss:$16 sps:$4 sm:$0xff]   ;;  %v7116_v49 = vld [vmem:[%s10633_s0 + $0x11c] ss:$28 sps:$4 sm:$0xff]  }
  0x37   :  { %2331 = vmatpush1.bf16.msra.mxu1 %v7007_v27  ;;  %2139 = vmatprep.subr.bf16.mxu0 %v7008_v28  ;;  %v7044_v54 = vld [vmem:[#allocation2 + $0x144] ss:$16 sps:$4 sm:$0xff]   ;;  %v7048_v56 = vld [vmem:[#allocation2 + $0x140] ss:$16 sps:$4 sm:$0xff]  }
  0x38   :  { %2332 = vmatprep.subr.bf16.mxu1 %v7010_v29  ;;  %v7046_v55 = vld [vmem:[#allocation2 + $0x344] ss:$16 sps:$4 sm:$0xff]   ;;  %v7049_v57 = vld [vmem:[#allocation2 + $0x340] ss:$16 sps:$4 sm:$0xff]   ;;  %v7095_v29 = vld [vmem:[%s10633_s0 + $0xac] ss:$28 sps:$4 sm:$0xff]  }
  0x39   :  { %v7050_v58 = vld [vmem:[#allocation2 + $0x124] ss:$16 sps:$4 sm:$0xff]   ;;  %v7054_v60 = vld [vmem:[#allocation2 + $0x120] ss:$16 sps:$4 sm:$0xff]  }
  0x3a   :  { %2140 = vmatpush1.bf16.msra.mxu0 %v7012_v30  ;;  %v7052_v59 = vld [vmem:[#allocation2 + $0x324] ss:$16 sps:$4 sm:$0xff]   ;;  %v7055_v61 = vld [vmem:[#allocation2 + $0x320] ss:$16 sps:$4 sm:$0xff]  }
  0x3b   :  { %2333 = vmatpush1.bf16.msra.mxu1 %v7013_v31  ;;  %2141 = vmatprep.subr.bf16.mxu0 %v7014_v32  ;;  %v7056_v62 = vld [vmem:[#allocation2 + $0x104] ss:$16 sps:$4 sm:$0xff]   ;;  %v7060_v0 = vld [vmem:[#allocation2 + $0x100] ss:$16 sps:$4 sm:$0xff]  }
  0x3c   :  { %2334 = vmatprep.subr.bf16.mxu1 %v7016_v33  ;;  %v7058_v63 = vld [vmem:[#allocation2 + $0x304] ss:$16 sps:$4 sm:$0xff]   ;;  %v7061_v1 = vld [vmem:[#allocation2 + $0x300] ss:$16 sps:$4 sm:$0xff]  }
  0x3d   :  { %v7070_v2 = vld [vmem:[#allocation2 + $0x4e4] ss:$16 sps:$4 sm:$0xff]   ;;  %v7062_v4 = vld [vmem:[%s10633_s0] ss:$28 sps:$4 sm:$0xff]   ;;  %v7087_v26 = vld [vmem:[%s10633_s0 + $0x70] ss:$28 sps:$4 sm:$0xff]  }
  0x3e   :  { %2142 = vmatpush2.bf16.msra.mxu0 %v7018_v34  ;;  %v7073_v3 = vld [vmem:[#allocation2 + $0x6e4] ss:$16 sps:$4 sm:$0xff]   ;;  %v7068_v6 = vld [vmem:[#allocation2 + $0x4e0] ss:$16 sps:$4 sm:$0xff]  }
  0x3f   :  { %2335 = vmatpush2.bf16.msra.mxu1 %v7019_v35  ;;  %2143 = vmatprep.subr.bf16.mxu0 %v7020_v36  ;;  %v7065_v5 = vld [vmem:[%s10633_s0 + $0x8] ss:$28 sps:$4 sm:$0xff]   ;;  %v7071_v7 = vld [vmem:[#allocation2 + $0x6e0] ss:$16 sps:$4 sm:$0xff]   ;;  %v7088_v28 = vld [vmem:[%s10633_s0 + $0x78] ss:$28 sps:$4 sm:$0xff]  }
  0x40   :  { %2336 = vmatprep.subr.bf16.mxu1 %v7022_v37  ;;  %v7076_v9 = vld [vmem:[%s10633_s0 + $0x44] ss:$28 sps:$4 sm:$0xff]   ;;  %v7083_v18 = vld [vmem:[%s10633_s0 + $0x74] ss:$28 sps:$4 sm:$0xff]  }
  0x41   :  { %v7082_v10 = vld [vmem:[#allocation2 + $0x4c4] ss:$16 sps:$4 sm:$0xff]   ;;  %v7080_v12 = vld [vmem:[#allocation2 + $0x4c0] ss:$16 sps:$4 sm:$0xff]  }
  0x42   :  { %2144 = vmatpush2.bf16.msra.mxu0 %v7024_v38  ;;  %v7094_v11 = vld [vmem:[#allocation2 + $0x6c4] ss:$16 sps:$4 sm:$0xff]   ;;  %v7092_v14 = vld [vmem:[#allocation2 + $0x6c0] ss:$16 sps:$4 sm:$0xff]  }
  0x43   :  { %2337 = vmatpush2.bf16.msra.mxu1 %v7025_v39  ;;  %2145 = vmatprep.subr.bf16.mxu0 %v7026_v40  ;;  %v7091_v13 = vld [vmem:[#allocation2 + $0x4a4] ss:$16 sps:$4 sm:$0xff]   ;;  %v7079_v17 = vld [vmem:[%s10633_s0 + $0x40] ss:$28 sps:$4 sm:$0xff]   ;;  %v7100_v38 = vld [vmem:[%s10633_s0 + $0xb0] ss:$28 sps:$4 sm:$0xff]  }
  0x44   :  { %2338 = vmatprep.subr.bf16.mxu1 %v7028_v41  ;;  %v7115_v15 = vld [vmem:[#allocation2 + $0x6a4] ss:$16 sps:$4 sm:$0xff]   ;;  %v7089_v20 = vld [vmem:[#allocation2 + $0x4a0] ss:$16 sps:$4 sm:$0xff]   ;;  %v7106_v40 = vld [vmem:[%s10633_s0 + $0xec] ss:$28 sps:$4 sm:$0xff]  }
  0x45   :  { %v7113_v21 = vld [vmem:[#allocation2 + $0x6a0] ss:$16 sps:$4 sm:$0xff]   ;;  %v7103_v22 = vld [vmem:[#allocation2 + $0x484] ss:$16 sps:$4 sm:$0xff]  }
  0x46   :  { %2146 = vmatpush2.bf16.msra.mxu0 %v7030_v42  ;;  %v7136_v23 = vld [vmem:[#allocation2 + $0x684] ss:$16 sps:$4 sm:$0xff]   ;;  %v7101_v24 = vld [vmem:[#allocation2 + $0x480] ss:$16 sps:$4 sm:$0xff]  }
  0x47   :  { %2339 = vmatpush2.bf16.msra.mxu1 %v7031_v43  ;;  %2147 = vmatprep.subr.bf16.mxu0 %v7032_v44  ;;  %v7134_v25 = vld [vmem:[#allocation2 + $0x680] ss:$16 sps:$4 sm:$0xff]   ;;  %v7112_v27 = vld [vmem:[#allocation2 + $0x464] ss:$16 sps:$4 sm:$0xff]  }
  0x48   :  { %2340 = vmatprep.subr.bf16.mxu1 %v7034_v45  ;;  %v7097_v30 = vld [vmem:[%s10633_s0 + $0xb4] ss:$28 sps:$4 sm:$0xff]   ;;  %v7099_v37 = vld [vmem:[%s10633_s0 + $0xa8] ss:$28 sps:$4 sm:$0xff]   ;;  %v7108_v44 = vld [vmem:[%s10633_s0 + $0xe0] ss:$28 sps:$4 sm:$0xff]  }
  0x49   :  { %v7110_v31 = vld [vmem:[#allocation2 + $0x460] ss:$16 sps:$4 sm:$0xff]   ;;  %v7124_v32 = vld [vmem:[#allocation2 + $0x444] ss:$16 sps:$4 sm:$0xff]  }
  0x4a   :  { %2148 = vmatpush2.bf16.msra.mxu0 %v7036_v46  ;;  %v7122_v33 = vld [vmem:[#allocation2 + $0x440] ss:$16 sps:$4 sm:$0xff]   ;;  %v7157_v35 = vld [vmem:[#allocation2 + $0x664] ss:$16 sps:$4 sm:$0xff]  }
  0x4b   :  { %2341 = vmatpush2.bf16.msra.mxu1 %v7037_v47  ;;  %2149 = vmatprep.subr.bf16.mxu0 %v7038_v48  ;;  %v7155_v34 = vld [vmem:[#allocation2 + $0x660] ss:$16 sps:$4 sm:$0xff]   ;;  %v7133_v36 = vld [vmem:[#allocation2 + $0x424] ss:$16 sps:$4 sm:$0xff]  }
  0x4c   :  { %2342 = vmatprep.subr.bf16.mxu1 %v7040_v50  ;;  %v7104_v39 = vld [vmem:[%s10633_s0 + $0xe4] ss:$28 sps:$4 sm:$0xff]  }
  0x4d   :  { %v7131_v41 = vld [vmem:[#allocation2 + $0x420] ss:$16 sps:$4 sm:$0xff]   ;;  %v7145_v42 = vld [vmem:[#allocation2 + $0x404] ss:$16 sps:$4 sm:$0xff]  }
  0x4e   :  { %2150 = vmatpush2.bf16.msra.mxu0 %v7042_v52  ;;  %v7143_v43 = vld [vmem:[#allocation2 + $0x400] ss:$16 sps:$4 sm:$0xff]   ;;  %v7154_v45 = vld [vmem:[#allocation2 + $0x5e4] ss:$16 sps:$4 sm:$0xff]  }
  0x4f   :  { %2343 = vmatpush2.bf16.msra.mxu1 %v7043_v53  ;;  %2151 = vmatprep.subr.bf16.mxu0 %v7044_v54  ;;  %v7176_v46 = vld [vmem:[#allocation2 + $0x640] ss:$16 sps:$4 sm:$0xff]   ;;  %v7178_v47 = vld [vmem:[#allocation2 + $0x644] ss:$16 sps:$4 sm:$0xff]  }
  0x50   :  { %2344 = vmatprep.subr.bf16.mxu1 %v7046_v55  ;;  %v7109_v48 = vld [vmem:[%s10633_s0 + $0xe8] ss:$28 sps:$4 sm:$0xff]   ;;  %v7152_v51 = vld [vmem:[#allocation2 + $0x5e0] ss:$16 sps:$4 sm:$0xff]   ;;  %v7120_v53 = vld [vmem:[%s10633_s0 + $0x118] ss:$28 sps:$4 sm:$0xff]  }
  0x51   :  { %v7118_v50 = vld [vmem:[%s10633_s0 + $0x124] ss:$28 sps:$4 sm:$0xff]  }
  0x52   :  { %2152 = vmatpush2.bf16.msra.mxu0 %v7048_v56  ;;  %v7166_v52 = vld [vmem:[#allocation2 + $0x5c4] ss:$16 sps:$4 sm:$0xff]   ;;  %v7121_v54 = vld [vmem:[%s10633_s0 + $0x120] ss:$28 sps:$4 sm:$0xff]  }
  0x53   :  { %2345 = vmatpush2.bf16.msra.mxu1 %v7049_v57  ;;  %2153 = vmatprep.subr.bf16.mxu0 %v7050_v58  ;;  %v7164_v55 = vld [vmem:[#allocation2 + $0x5c0] ss:$16 sps:$4 sm:$0xff]   ;;  %v7175_v57 = vld [vmem:[#allocation2 + $0x5a4] ss:$16 sps:$4 sm:$0xff]  }
  0x54   :  { %2346 = vmatprep.subr.bf16.mxu1 %v7052_v59  ;;  %v7125_v56 = vld [vmem:[%s10633_s0 + $0x154] ss:$28 sps:$4 sm:$0xff]  }
  0x55   :  { %v7197_v58 = vld [vmem:[#allocation2 + $0x620] ss:$16 sps:$4 sm:$0xff]   ;;  %v7199_v59 = vld [vmem:[#allocation2 + $0x624] ss:$16 sps:$4 sm:$0xff]  }
  0x56   :  { %2154 = vmatpush2.bf16.msra.mxu0 %v7054_v60  ;;  %v7127_v60 = vld [vmem:[%s10633_s0 + $0x15c] ss:$28 sps:$4 sm:$0xff]  }
  0x57   :  { %2347 = vmatpush2.bf16.msra.mxu1 %v7055_v61  ;;  %2155 = vmatprep.subr.bf16.mxu0 %v7056_v62  ;;  %v7173_v61 = vld [vmem:[#allocation2 + $0x5a0] ss:$16 sps:$4 sm:$0xff]   ;;  %v7187_v62 = vld [vmem:[#allocation2 + $0x584] ss:$16 sps:$4 sm:$0xff]  }
  0x58   :  { %2348 = vmatprep.subr.bf16.mxu1 %v7058_v63  ;;  %v7129_v63 = vld [vmem:[%s10633_s0 + $0x150] ss:$28 sps:$4 sm:$0xff]  }
  0x5a   :  { %2156 = vmatpush2.bf16.msra.mxu0 %v7060_v0  ;;  %v7130_v0 = vld [vmem:[%s10633_s0 + $0x158] ss:$28 sps:$4 sm:$0xff]  }
  0x5b   :  { %2349 = vmatpush2.bf16.msra.mxu1 %v7061_v1  ;;  %2511 = vmatprep.subr.bf16.mxu0 %v7070_v2  ;;  %v7185_v1 = vld [vmem:[#allocation2 + $0x580] ss:$16 sps:$4 sm:$0xff]   ;;  %v7137_v2 = vld [vmem:[%s10633_s0 + $0x18c] ss:$28 sps:$4 sm:$0xff]  }
  0x5c   :  { %2704 = vmatprep.subr.bf16.mxu1 %v7073_v3  ;;  %v7196_v3 = vld [vmem:[#allocation2 + $0x564] ss:$16 sps:$4 sm:$0xff]  }
  0x5d   :  { %2158 = vmatmul.mubr.bf16.vlgmr.msra.gmra.mxu0 %v7062_v4  ;;  %v7139_v4 = vld [vmem:[%s10633_s0 + $0x194] ss:$28 sps:$4 sm:$0xff]  }
  0x5e   :  { %2351 = vmatmul.mubr.bf16.vlgmr.msra.gmra.mxu1 %v7065_v5  ;;  %2512 = vmatpush1.bf16.msra.mxu0 %v7068_v6  ;;  %v7194_v5 = vld [vmem:[#allocation2 + $0x560] ss:$16 sps:$4 sm:$0xff]   ;;  %v7208_v6 = vld [vmem:[#allocation2 + $0x544] ss:$16 sps:$4 sm:$0xff]  }
  0x5f   :  { %2705 = vmatpush1.bf16.msra.mxu1 %v7071_v7  ;;  %2167 = vmatprep.mubr.bf16.mxu0 %v7074_v8  ;;  %v7220_v7 = vld [vmem:[#allocation2 + $0x604] ss:$16 sps:$4 sm:$0xff]   ;;  %v7218_v8 = vld [vmem:[#allocation2 + $0x600] ss:$16 sps:$4 sm:$0xff]  }
  0x60   :  { %2360 = vmatprep.mubr.bf16.mxu1 %v7076_v9  ;;  %2513 = vmatprep.subr.bf16.mxu0 %v7082_v10  ;;  %v7141_v9 = vld [vmem:[%s10633_s0 + $0x188] ss:$28 sps:$4 sm:$0xff]   ;;  %v7206_v10 = vld [vmem:[#allocation2 + $0x540] ss:$16 sps:$4 sm:$0xff]  }
  0x61   :  { %2706 = vmatprep.subr.bf16.mxu1 %v7094_v11  ;;  %v7142_v11 = vld [vmem:[%s10633_s0 + $0x190] ss:$28 sps:$4 sm:$0xff]  }
  0x62   :  { %2514 = vmatpush1.bf16.msra.mxu0 %v7080_v12  ;;  %v7217_v12 = vld [vmem:[#allocation2 + $0x524] ss:$16 sps:$4 sm:$0xff]  }
  0x63   :  { %2707 = vmatpush1.bf16.msra.mxu1 %v7092_v14  ;;  %2515 = vmatprep.subr.bf16.mxu0 %v7091_v13  ;;  %v7146_v13 = vld [vmem:[%s10633_s0 + $0x1c4] ss:$28 sps:$4 sm:$0xff]   ;;  %v7148_v14 = vld [vmem:[%s10633_s0 + $0x1cc] ss:$28 sps:$4 sm:$0xff]  }
  0x64   :  { %2708 = vmatprep.subr.bf16.mxu1 %v7115_v15  ;;  %v7215_v15 = vld [vmem:[#allocation2 + $0x520] ss:$16 sps:$4 sm:$0xff]  }
  0x65   :  { %2168 = vmatmul.mubr.bf16.gmra.mxu0 %v7078_v16  ;;  %v7229_v16 = vld [vmem:[#allocation2 + $0x504] ss:$16 sps:$4 sm:$0xff]  }
  0x66   :  { %2361 = vmatmul.mubr.bf16.gmra.mxu1 %v7079_v17  ;;  %2177 = vmatprep.mubr.bf16.mxu0 %v7083_v18  ;;  %v7239_v17 = vld [vmem:[#allocation2 + $0x2ec] ss:$16 sps:$4 sm:$0xff]  }
  0x67   :  { %2370 = vmatprep.mubr.bf16.mxu1 %v7085_v19  ;;  %2516 = vmatpush1.bf16.msra.mxu0 %v7089_v20  ;;  %v7150_v18 = vld [vmem:[%s10633_s0 + $0x1c0] ss:$28 sps:$4 sm:$0xff]  }
  0x68   :  { %2709 = vmatpush1.bf16.msra.mxu1 %v7113_v21  ;;  %2517 = vmatprep.subr.bf16.mxu0 %v7103_v22  ;;  %v7227_v19 = vld [vmem:[#allocation2 + $0x500] ss:$16 sps:$4 sm:$0xff]   ;;  %v7236_v20 = vld [vmem:[#allocation2 + $0xec] ss:$16 sps:$4 sm:$0xff]   ;;  %v7151_v21 = vld [vmem:[%s10633_s0 + $0x1c8] ss:$28 sps:$4 sm:$0xff]  }
  0x69   :  { %2710 = vmatprep.subr.bf16.mxu1 %v7136_v23  ;;  %v7158_v22 = vld [vmem:[%s10633_s0 + $0x1fc] ss:$28 sps:$4 sm:$0xff]   ;;  %v7160_v23 = vld [vmem:[%s10633_s0 + $0x204] ss:$28 sps:$4 sm:$0xff]  }
  0x6b   :  { %2518 = vmatpush1.bf16.msra.mxu0 %v7101_v24  ;;  %v7162_v24 = vld [vmem:[%s10633_s0 + $0x1f8] ss:$28 sps:$4 sm:$0xff]  }
  0x6c   :  { %2711 = vmatpush1.bf16.msra.mxu1 %v7134_v25  ;;  %2519 = vmatprep.subr.bf16.mxu0 %v7112_v27  ;;  %v7163_v25 = vld [vmem:[%s10633_s0 + $0x200] ss:$28 sps:$4 sm:$0xff]  }
  0x6d   :  { %2178 = vmatmul.mubr.bf16.gmra.mxu0 %v7087_v26  ;;  %2712 = vmatprep.subr.bf16.mxu1 %v7157_v35  ;;  %v7167_v26 = vld [vmem:[%s10633_s0 + $0x234] ss:$28 sps:$4 sm:$0xff]   ;;  %v7169_v27 = vld [vmem:[%s10633_s0 + $0x23c] ss:$28 sps:$4 sm:$0xff]   ;;  %v7190_v35 = vld [vmem:[%s10633_s0 + $0x2ac] ss:$28 sps:$4 sm:$0xff]  }
  0x6e   :  { %2371 = vmatmul.mubr.bf16.gmra.mxu1 %v7088_v28  ;;  %2187 = vmatprep.mubr.bf16.mxu0 %v7095_v29  ;;  %v7171_v28 = vld [vmem:[%s10633_s0 + $0x230] ss:$28 sps:$4 sm:$0xff]   ;;  %v7172_v29 = vld [vmem:[%s10633_s0 + $0x238] ss:$28 sps:$4 sm:$0xff]  }
  0x6f   :  { %2380 = vmatprep.mubr.bf16.mxu1 %v7097_v30  ;;  %2520 = vmatpush1.bf16.msra.mxu0 %v7110_v31  ;;  %v7179_v30 = vld [vmem:[%s10633_s0 + $0x26c] ss:$28 sps:$4 sm:$0xff]   ;;  %v7181_v31 = vld [vmem:[%s10633_s0 + $0x274] ss:$28 sps:$4 sm:$0xff]  }
  0x70   :  { %2521 = vmatprep.subr.bf16.mxu0 %v7124_v32  ;;  %2713 = vmatpush1.bf16.msra.mxu1 %v7155_v34  ;;  %v7183_v32 = vld [vmem:[%s10633_s0 + $0x268] ss:$28 sps:$4 sm:$0xff]  }
  0x71   :  { %2714 = vmatprep.subr.bf16.mxu1 %v7178_v47  ;;  %v7188_v34 = vld [vmem:[%s10633_s0 + $0x2a4] ss:$28 sps:$4 sm:$0xff]   ;;  %v7223_v47 = vld [vmem:[%s10633_s0 + $0x354] ss:$28 sps:$4 sm:$0xff]  }
  0x73   :  { %2522 = vmatpush1.bf16.msra.mxu0 %v7122_v33  ;;  %v7184_v33 = vld [vmem:[%s10633_s0 + $0x270] ss:$28 sps:$4 sm:$0xff]  }
  0x74   :  { %2523 = vmatprep.subr.bf16.mxu0 %v7133_v36  ;;  %2715 = vmatpush1.bf16.msra.mxu1 %v7176_v46  ;;  %v7192_v36 = vld [vmem:[%s10633_s0 + $0x2a0] ss:$28 sps:$4 sm:$0xff]   ;;  %v7221_v46 = vld [vmem:[%s10633_s0 + $0x34c] ss:$28 sps:$4 sm:$0xff]  }
  0x75   :  { %2188 = vmatmul.mubr.bf16.gmra.mxu0 %v7099_v37  ;;  %2716 = vmatprep.subr.bf16.mxu1 %v7199_v59  ;;  %v7193_v37 = vld [vmem:[%s10633_s0 + $0x2a8] ss:$28 sps:$4 sm:$0xff]  }
  0x76   :  { %2381 = vmatmul.mubr.bf16.gmra.mxu1 %v7100_v38  ;;  %2197 = vmatprep.mubr.bf16.mxu0 %v7104_v39  ;;  %v7200_v38 = vld [vmem:[%s10633_s0 + $0x2dc] ss:$28 sps:$4 sm:$0xff]   ;;  %v7202_v39 = vld [vmem:[%s10633_s0 + $0x2e4] ss:$28 sps:$4 sm:$0xff]  }
  0x77   :  { %2390 = vmatprep.mubr.bf16.mxu1 %v7106_v40  ;;  %2524 = vmatpush1.bf16.msra.mxu0 %v7131_v41  ;;  %v7204_v40 = vld [vmem:[%s10633_s0 + $0x2d8] ss:$28 sps:$4 sm:$0xff]   ;;  %v7205_v41 = vld [vmem:[%s10633_s0 + $0x2e0] ss:$28 sps:$4 sm:$0xff]  }
  0x78   :  { %2525 = vmatprep.subr.bf16.mxu0 %v7145_v42  ;;  %2717 = vmatpush1.bf16.msra.mxu1 %v7197_v58  ;;  %v7209_v42 = vld [vmem:[%s10633_s0 + $0x314] ss:$28 sps:$4 sm:$0xff]   ;;  %v7249_v58 = vld [vmem:[#allocation2 + $0x2cc] ss:$16 sps:$4 sm:$0xff]   ;;  %v7244_v59 = vld [vmem:[#allocation2 + $0xc8] ss:$16 sps:$4 sm:$0xff]  }
  0x79   :  { %2718 = vmatprep.subr.bf16.mxu1 %v7220_v7  ;;  %v7267_v7 = vld [vmem:[#allocation2 + $0x288] ss:$16 sps:$4 sm:$0xff]  }
  0x7b   :  { %2526 = vmatpush1.bf16.msra.mxu0 %v7143_v43  ;;  %v7211_v43 = vld [vmem:[%s10633_s0 + $0x31c] ss:$28 sps:$4 sm:$0xff]  }
  0x7c   :  { %2527 = vmatprep.subr.bf16.mxu0 %v7154_v45  ;;  %2719 = vmatpush1.bf16.msra.mxu1 %v7218_v8  ;;  %v7214_v45 = vld [vmem:[%s10633_s0 + $0x318] ss:$28 sps:$4 sm:$0xff]   ;;  %v7252_v8 = vld [vmem:[%s10633_s0 + $0x80] ss:$28 sps:$4 sm:$0xff]  }
  0x7d   :  { %2198 = vmatmul.mubr.bf16.gmra.mxu0 %v7108_v44  ;;  %3090 = vmatprep.subr.bf16.mxu1 %v7239_v17  ;;  %v7213_v44 = vld [vmem:[%s10633_s0 + $0x310] ss:$28 sps:$4 sm:$0xff]   ;;  %v7284_v17 = vld [vmem:[#allocation2 + $0x48] ss:$16 sps:$4 sm:$0xff]  }
  0x7e   :  { %2391 = vmatmul.mubr.bf16.gmra.mxu1 %v7109_v48  ;;  %2207 = vmatprep.mubr.bf16.mxu0 %v7116_v49  ;;  %v7225_v48 = vld [vmem:[%s10633_s0 + $0x348] ss:$28 sps:$4 sm:$0xff]   ;;  %v7226_v49 = vld [vmem:[%s10633_s0 + $0x350] ss:$28 sps:$4 sm:$0xff]  }
  0x7f   :  { %2400 = vmatprep.mubr.bf16.mxu1 %v7118_v50  ;;  %2528 = vmatpush2.bf16.msra.mxu0 %v7152_v51  ;;  %v7232_v50 = vld [vmem:[%s10633_s0 + $0x14] ss:$28 sps:$4 sm:$0xff]   ;;  %v10643_v51 = vmov 0  }
  0x80   :  { %2529 = vmatprep.subr.bf16.mxu0 %v7166_v52  ;;  %v7230_v52 = vld [vmem:[%s10633_s0 + $0x10] ss:$28 sps:$4 sm:$0xff]  }
  0x83   :  { %2530 = vmatpush2.bf16.msra.mxu0 %v7164_v55  ;;  %v7237_v55 = vld [vmem:[#allocation2 + $0x2e8] ss:$16 sps:$4 sm:$0xff]  }
  0x84   :  { %2531 = vmatprep.subr.bf16.mxu0 %v7175_v57  ;;  %v7246_v57 = vld [vmem:[#allocation2 + $0xcc] ss:$16 sps:$4 sm:$0xff]  }
  0x85   :  { %2208 = vmatmul.mubr.bf16.gmra.mxu0 %v7120_v53  ;;  %v7233_v53 = vld [vmem:[%s10633_s0 + $0x18] ss:$28 sps:$4 sm:$0xff]  }
  0x86   :  { %2401 = vmatmul.mubr.bf16.gmra.mxu1 %v7121_v54  ;;  %2217 = vmatprep.mubr.bf16.mxu0 %v7125_v56  ;;  %v7234_v54 = vld [vmem:[#allocation2 + $0xe8] ss:$16 sps:$4 sm:$0xff]  }
  0x87   :  { %2410 = vmatprep.mubr.bf16.mxu1 %v7127_v60  ;;  %2532 = vmatpush2.bf16.msra.mxu0 %v7173_v61  ;;  %v7240_v56 = vld [vmem:[%s10633_s0 + $0x4c] ss:$28 sps:$4 sm:$0xff]  }
  0x88   :  { %2533 = vmatprep.subr.bf16.mxu0 %v7187_v62  ;;  %v7247_v60 = vld [vmem:[#allocation2 + $0x2c8] ss:$16 sps:$4 sm:$0xff]   ;;  %v7256_v62 = vld [vmem:[#allocation2 + $0xac] ss:$16 sps:$4 sm:$0xff]  }
  0x89   :  { %v7242_v61 = vld [vmem:[%s10633_s0 + $0x48] ss:$28 sps:$4 sm:$0xff]  }
  0x8b   :  { %2534 = vmatpush2.bf16.msra.mxu0 %v7185_v1  ;;  %v7250_v1 = vld [vmem:[%s10633_s0 + $0x84] ss:$28 sps:$4 sm:$0xff]  }
  0x8c   :  { %2535 = vmatprep.subr.bf16.mxu0 %v7196_v3  ;;  %v7257_v3 = vld [vmem:[#allocation2 + $0x2a8] ss:$16 sps:$4 sm:$0xff]  }
  0x8d   :  { %2218 = vmatmul.mubr.bf16.gmra.mxu0 %v7129_v63  ;;  %v7259_v63 = vld [vmem:[#allocation2 + $0x2ac] ss:$16 sps:$4 sm:$0xff]  }
  0x8e   :  { %2411 = vmatmul.mubr.bf16.gmra.mxu1 %v7130_v0  ;;  %2227 = vmatprep.mubr.bf16.mxu0 %v7137_v2  ;;  %v7243_v0 = vld [vmem:[%s10633_s0 + $0x50] ss:$28 sps:$4 sm:$0xff]   ;;  %v7254_v2 = vld [vmem:[#allocation2 + $0xa8] ss:$16 sps:$4 sm:$0xff]  }
  0x8f   :  { %2420 = vmatprep.mubr.bf16.mxu1 %v7139_v4  ;;  %2536 = vmatpush2.bf16.msra.mxu0 %v7194_v5  ;;  %v7266_v4 = vld [vmem:[#allocation2 + $0x8c] ss:$16 sps:$4 sm:$0xff]  }
  0x90   :  { %2537 = vmatprep.subr.bf16.mxu0 %v7208_v6  ;;  %v7269_v5 = vld [vmem:[#allocation2 + $0x28c] ss:$16 sps:$4 sm:$0xff]   ;;  %v7264_v6 = vld [vmem:[#allocation2 + $0x88] ss:$16 sps:$4 sm:$0xff]  }
  0x93   :  { %2538 = vmatpush2.bf16.msra.mxu0 %v7206_v10  ;;  %v7260_v10 = vld [vmem:[%s10633_s0 + $0xbc] ss:$28 sps:$4 sm:$0xff]  }
  0x94   :  { %2539 = vmatprep.subr.bf16.mxu0 %v7217_v12  ;;  %v7279_v12 = vld [vmem:[#allocation2 + $0x26c] ss:$16 sps:$4 sm:$0xff]  }
  0x95   :  { %2228 = vmatmul.mubr.bf16.gmra.mxu0 %v7141_v9  ;;  %v7253_v9 = vld [vmem:[%s10633_s0 + $0x88] ss:$28 sps:$4 sm:$0xff]  }
  0x96   :  { %2421 = vmatmul.mubr.bf16.gmra.mxu1 %v7142_v11  ;;  %2237 = vmatprep.mubr.bf16.mxu0 %v7146_v13  ;;  %v7276_v11 = vld [vmem:[#allocation2 + $0x6c] ss:$16 sps:$4 sm:$0xff]   ;;  %v7274_v13 = vld [vmem:[#allocation2 + $0x68] ss:$16 sps:$4 sm:$0xff]  }
  0x97   :  { %2430 = vmatprep.mubr.bf16.mxu1 %v7148_v14  ;;  %2540 = vmatpush2.bf16.msra.mxu0 %v7215_v15  ;;  %v7277_v14 = vld [vmem:[#allocation2 + $0x268] ss:$16 sps:$4 sm:$0xff]   ;;  %v7286_v15 = vld [vmem:[#allocation2 + $0x4c] ss:$16 sps:$4 sm:$0xff]  }
  0x98   :  { %2541 = vmatprep.subr.bf16.mxu0 %v7229_v16  ;;  %v7289_v16 = vld [vmem:[#allocation2 + $0x24c] ss:$16 sps:$4 sm:$0xff]  }
  0x9b   :  { %2542 = vmatpush2.bf16.msra.mxu0 %v7227_v19  ;;  %v7262_v19 = vld [vmem:[%s10633_s0 + $0xb8] ss:$28 sps:$4 sm:$0xff]  }
  0x9c   :  { %2897 = vmatprep.subr.bf16.mxu0 %v7236_v20  ;;  %v7263_v20 = vld [vmem:[%s10633_s0 + $0xc0] ss:$28 sps:$4 sm:$0xff]  }
  0x9d   :  { %2238 = vmatmul.mubr.bf16.gmra.mxu0 %v7150_v18  ;;  %v7287_v18 = vld [vmem:[#allocation2 + $0x248] ss:$16 sps:$4 sm:$0xff]  }
  0x9e   :  { %2431 = vmatmul.mubr.bf16.gmra.mxu1 %v7151_v21  ;;  %2247 = vmatprep.mubr.bf16.mxu0 %v7158_v22  ;;  %v7270_v21 = vld [vmem:[%s10633_s0 + $0xf4] ss:$28 sps:$4 sm:$0xff]   ;;  %v7296_v22 = vld [vmem:[#allocation2 + $0x2c] ss:$16 sps:$4 sm:$0xff]  }
  0x9f   :  { %2440 = vmatprep.mubr.bf16.mxu1 %v7160_v23  ;;  %v7299_v23 = vld [vmem:[#allocation2 + $0x22c] ss:$16 sps:$4 sm:$0xff]  }
  0xa5   :  { %2248 = vmatmul.mubr.bf16.gmra.mxu0 %v7162_v24  ;;  %v7294_v24 = vld [vmem:[#allocation2 + $0x28] ss:$16 sps:$4 sm:$0xff]  }
  0xa6   :  { %2441 = vmatmul.mubr.bf16.gmra.mxu1 %v7163_v25  ;;  %2257 = vmatprep.mubr.bf16.mxu0 %v7167_v26  ;;  %v7297_v25 = vld [vmem:[#allocation2 + $0x228] ss:$16 sps:$4 sm:$0xff]   ;;  %v7306_v26 = vld [vmem:[#allocation2 + $0xc] ss:$16 sps:$4 sm:$0xff]  }
  0xa7   :  { %2450 = vmatprep.mubr.bf16.mxu1 %v7169_v27  ;;  %v7309_v27 = vld [vmem:[#allocation2 + $0x20c] ss:$16 sps:$4 sm:$0xff]  }
  0xad   :  { %2258 = vmatmul.mubr.bf16.gmra.mxu0 %v7171_v28  ;;  %v7304_v28 = vld [vmem:[#allocation2 + $0x8] ss:$16 sps:$4 sm:$0xff]  }
  0xae   :  { %2451 = vmatmul.mubr.bf16.gmra.mxu1 %v7172_v29  ;;  %2267 = vmatprep.mubr.bf16.mxu0 %v7179_v30  ;;  %v7307_v29 = vld [vmem:[#allocation2 + $0x208] ss:$16 sps:$4 sm:$0xff]   ;;  %v7272_v30 = vld [vmem:[%s10633_s0 + $0xf0] ss:$28 sps:$4 sm:$0xff]  }
  0xaf   :  { %2460 = vmatprep.mubr.bf16.mxu1 %v7181_v31  ;;  %v7273_v31 = vld [vmem:[%s10633_s0 + $0xf8] ss:$28 sps:$4 sm:$0xff]  }
  0xb5   :  { %2268 = vmatmul.mubr.bf16.gmra.mxu0 %v7183_v32  ;;  %v7280_v32 = vld [vmem:[%s10633_s0 + $0x12c] ss:$28 sps:$4 sm:$0xff]  }
  0xb6   :  { %2461 = vmatmul.mubr.bf16.gmra.mxu1 %v7184_v33  ;;  %2277 = vmatprep.mubr.bf16.mxu0 %v7188_v34  ;;  %v7316_v33 = vld [vmem:[#allocation2 + $0x1ec] ss:$16 sps:$4 sm:$0xff]  }
  0xb7   :  { %2470 = vmatprep.mubr.bf16.mxu1 %v7190_v35  ;;  %v7319_v34 = vld [vmem:[#allocation2 + $0x3ec] ss:$16 sps:$4 sm:$0xff]   ;;  %v7314_v35 = vld [vmem:[#allocation2 + $0x1e8] ss:$16 sps:$4 sm:$0xff]  }
  0xbd   :  { %2278 = vmatmul.mubr.bf16.gmra.mxu0 %v7192_v36  ;;  %v7317_v36 = vld [vmem:[#allocation2 + $0x3e8] ss:$16 sps:$4 sm:$0xff]  }
  0xbe   :  { %2471 = vmatmul.mubr.bf16.gmra.mxu1 %v7193_v37  ;;  %2287 = vmatprep.mubr.bf16.mxu0 %v7200_v38  ;;  %v7326_v37 = vld [vmem:[#allocation2 + $0x1cc] ss:$16 sps:$4 sm:$0xff]  }
  0xbf   :  { %2480 = vmatprep.mubr.bf16.mxu1 %v7202_v39  ;;  %v7329_v38 = vld [vmem:[#allocation2 + $0x3cc] ss:$16 sps:$4 sm:$0xff]   ;;  %v7324_v39 = vld [vmem:[#allocation2 + $0x1c8] ss:$16 sps:$4 sm:$0xff]  }
  0xc5   :  { %2288 = vmatmul.mubr.bf16.gmra.mxu0 %v7204_v40  ;;  %v7327_v40 = vld [vmem:[#allocation2 + $0x3c8] ss:$16 sps:$4 sm:$0xff]  }
  0xc6   :  { %2481 = vmatmul.mubr.bf16.gmra.mxu1 %v7205_v41  ;;  %2297 = vmatprep.mubr.bf16.mxu0 %v7209_v42  ;;  %v7282_v41 = vld [vmem:[%s10633_s0 + $0x128] ss:$28 sps:$4 sm:$0xff]   ;;  %v7283_v42 = vld [vmem:[%s10633_s0 + $0x130] ss:$28 sps:$4 sm:$0xff]  }
  0xc7   :  { %2490 = vmatprep.mubr.bf16.mxu1 %v7211_v43  ;;  %v7290_v43 = vld [vmem:[%s10633_s0 + $0x164] ss:$28 sps:$4 sm:$0xff]  }
  0xcd   :  { %2298 = vmatmul.mubr.bf16.gmra.mxu0 %v7213_v44  ;;  %v7336_v44 = vld [vmem:[#allocation2 + $0x1ac] ss:$16 sps:$4 sm:$0xff]  }
  0xce   :  { %2491 = vmatmul.mubr.bf16.gmra.mxu1 %v7214_v45  ;;  %2307 = vmatprep.mubr.bf16.mxu0 %v7221_v46  ;;  %v7339_v45 = vld [vmem:[#allocation2 + $0x3ac] ss:$16 sps:$4 sm:$0xff]   ;;  %v7334_v46 = vld [vmem:[#allocation2 + $0x1a8] ss:$16 sps:$4 sm:$0xff]  }
  0xcf   :  { %2500 = vmatprep.mubr.bf16.mxu1 %v7223_v47  ;;  %v7337_v47 = vld [vmem:[#allocation2 + $0x3a8] ss:$16 sps:$4 sm:$0xff]  }
  0xd5   :  { %2308 = vmatmul.mubr.bf16.gmra.mxu0 %v7225_v48  ;;  %v7346_v48 = vld [vmem:[#allocation2 + $0x18c] ss:$16 sps:$4 sm:$0xff]  }
  0xd6   :  { %2501 = vmatmul.mubr.bf16.gmra.mxu1 %v7226_v49  ;;  %2543 = vmatprep.mubr.bf16.mxu0 %v7232_v50  ;;  %v7349_v49 = vld [vmem:[#allocation2 + $0x38c] ss:$16 sps:$4 sm:$0xff]   ;;  %v7344_v50 = vld [vmem:[#allocation2 + $0x188] ss:$16 sps:$4 sm:$0xff]  }
  0xd7   :  { %2736 = vmatprep.mubr.bf16.mxu1 %v10643_v51 }
  0xdd   :  { %2544 = vmatmul.mubr.bf16.vlgmr.msra.gmra.mxu0 %v7230_v52  ;;  %v7347_v52 = vld [vmem:[#allocation2 + $0x388] ss:$16 sps:$4 sm:$0xff]  }
  0xde   :  { %2737 = vmatmul.mubr.bf16.vlgmr.msra.gmra.mxu1 %v7233_v53  ;;  %2898 = vmatpush1.bf16.msra.mxu0 %v7234_v54  ;;  %v7292_v53 = vld [vmem:[%s10633_s0 + $0x160] ss:$28 sps:$4 sm:$0xff]   ;;  %v7293_v54 = vld [vmem:[%s10633_s0 + $0x168] ss:$28 sps:$4 sm:$0xff]  }
  0xdf   :  { %3091 = vmatpush1.bf16.msra.mxu1 %v7237_v55  ;;  %2553 = vmatprep.mubr.bf16.mxu0 %v7240_v56  ;;  %v7300_v55 = vld [vmem:[%s10633_s0 + $0x19c] ss:$28 sps:$4 sm:$0xff]  }
  0xe0   :  { %2746 = vmatprep.mubr.bf16.mxu1 %v10643_v51  ;;  %2899 = vmatprep.subr.bf16.mxu0 %v7246_v57  ;;  %v7356_v56 = vld [vmem:[#allocation2 + $0x16c] ss:$16 sps:$4 sm:$0xff]  }
  0xe1   :  { %3092 = vmatprep.subr.bf16.mxu1 %v7249_v58  ;;  %v7359_v57 = vld [vmem:[#allocation2 + $0x36c] ss:$16 sps:$4 sm:$0xff]   ;;  %v7354_v58 = vld [vmem:[#allocation2 + $0x168] ss:$16 sps:$4 sm:$0xff]  }
  0xe2   :  { %2900 = vmatpush1.bf16.msra.mxu0 %v7244_v59  ;;  %v7357_v59 = vld [vmem:[#allocation2 + $0x368] ss:$16 sps:$4 sm:$0xff]  }
  0xe3   :  { %3093 = vmatpush1.bf16.msra.mxu1 %v7247_v60  ;;  %2901 = vmatprep.subr.bf16.mxu0 %v7256_v62  ;;  %v7366_v60 = vld [vmem:[#allocation2 + $0x14c] ss:$16 sps:$4 sm:$0xff]   ;;  %v7364_v62 = vld [vmem:[#allocation2 + $0x148] ss:$16 sps:$4 sm:$0xff]  }
  0xe4   :  { %3094 = vmatprep.subr.bf16.mxu1 %v7259_v63  ;;  %v7367_v63 = vld [vmem:[#allocation2 + $0x348] ss:$16 sps:$4 sm:$0xff]  }
  0xe5   :  { %2554 = vmatmul.mubr.bf16.gmra.mxu0 %v7242_v61  ;;  %v7369_v61 = vld [vmem:[#allocation2 + $0x34c] ss:$16 sps:$4 sm:$0xff]  }
  0xe6   :  { %2747 = vmatmul.mubr.bf16.gmra.mxu1 %v7243_v0  ;;  %2563 = vmatprep.mubr.bf16.mxu0 %v7250_v1  ;;  %v409_v0 = vlaneseq  ;;  %v7302_v1 = vld [vmem:[%s10633_s0 + $0x198] ss:$28 sps:$4 sm:$0xff]  }
  0xe7   :  { %2756 = vmatprep.mubr.bf16.mxu1 %v10643_v51  ;;  %2902 = vmatpush1.bf16.msra.mxu0 %v7254_v2  ;;  %v7303_v2 = vld [vmem:[%s10633_s0 + $0x1a0] ss:$28 sps:$4 sm:$0xff]  }
  0xe8   :  { %3095 = vmatpush1.bf16.msra.mxu1 %v7257_v3  ;;  %2903 = vmatprep.subr.bf16.mxu0 %v7266_v4  ;;  %v7310_v3 = vld [vmem:[%s10633_s0 + $0x1d4] ss:$28 sps:$4 sm:$0xff]   ;;  %v7376_v4 = vld [vmem:[#allocation2 + $0x12c] ss:$16 sps:$4 sm:$0xff]  }
  0xe9   :  { %3096 = vmatprep.subr.bf16.mxu1 %v7269_v5  ;;  %v7379_v5 = vld [vmem:[#allocation2 + $0x32c] ss:$16 sps:$4 sm:$0xff]  }
  0xeb   :  { %2904 = vmatpush1.bf16.msra.mxu0 %v7264_v6  ;;  %v7374_v6 = vld [vmem:[#allocation2 + $0x128] ss:$16 sps:$4 sm:$0xff]  }
  0xec   :  { %3097 = vmatpush1.bf16.msra.mxu1 %v7267_v7  ;;  %2905 = vmatprep.subr.bf16.mxu0 %v7276_v11  ;;  %v7377_v7 = vld [vmem:[#allocation2 + $0x328] ss:$16 sps:$4 sm:$0xff]   ;;  %v407_v11 = vld [vmem:[%s10635_s2] sm:$0xf] }
  0xed   :  { %3098 = vmatprep.subr.bf16.mxu1 %v7279_v12  ;;  %2564 = vmatmul.mubr.bf16.gmra.mxu0 %v7252_v8  ;;  %v8171_v8 = vshrl.u32 %v409_v0, 7  ;;  %v7384_v12 = vld [vmem:[#allocation2 + $0x108] ss:$16 sps:$4 sm:$0xff]  }
  0xee   :  { %2757 = vmatmul.mubr.bf16.gmra.mxu1 %v7253_v9  ;;  %2573 = vmatprep.mubr.bf16.mxu0 %v7260_v10  ;;  %v7386_v9 = vld [vmem:[#allocation2 + $0x10c] ss:$16 sps:$4 sm:$0xff]  }
  0xef   :  { %2766 = vmatprep.mubr.bf16.mxu1 %v10643_v51  ;;  %2906 = vmatpush1.bf16.msra.mxu0 %v7274_v13  ;;  %10681 = vst [vmem:[#allocation8_spill] sm:$0xff] %v8171_v8  ;;  %v7389_v10 = vld [vmem:[#allocation2 + $0x30c] ss:$16 sps:$4 sm:$0xff]   ;;  %v7387_v13 = vld [vmem:[#allocation2 + $0x308] ss:$16 sps:$4 sm:$0xff]  }
  0xf0   :  { %3099 = vmatpush1.bf16.msra.mxu1 %v7277_v14  ;;  %2907 = vmatprep.subr.bf16.mxu0 %v7286_v15  ;;  %v10641_v14 = vsub.s32 0, %v8171_v8  ;;  %v7312_v15 = vld [vmem:[%s10633_s0 + $0x1d0] ss:$28 sps:$4 sm:$0xff]  }
  0xf1   :  { %3100 = vmatprep.subr.bf16.mxu1 %v7289_v16  ;;  %v7313_v16 = vld [vmem:[%s10633_s0 + $0x1d8] ss:$28 sps:$4 sm:$0xff]  }
  0xf3   :  { %2908 = vmatpush1.bf16.msra.mxu0 %v7284_v17  ;;  %v10642_v17 = vsub.s32 1, %v8171_v8 }
  0xf4   :  { %3101 = vmatpush1.bf16.msra.mxu1 %v7287_v18  ;;  %2909 = vmatprep.subr.bf16.mxu0 %v7296_v22  ;;  %v7320_v18 = vld [vmem:[%s10633_s0 + $0x20c] ss:$28 sps:$4 sm:$0xff]  }
  0xf5   :  { %3102 = vmatprep.subr.bf16.mxu1 %v7299_v23  ;;  %2574 = vmatmul.mubr.bf16.gmra.mxu0 %v7262_v19  ;;  %v7392_v19 = vld [vmem:[#allocation2 + $0x4ec] ss:$16 sps:$4 sm:$0xff]   ;;  %v8194_v22 = vrot.slane %v407_v11, %v10642_v17 }
  0xf6   :  { %2767 = vmatmul.mubr.bf16.gmra.mxu1 %v7263_v20  ;;  %2583 = vmatprep.mubr.bf16.mxu0 %v7270_v21  ;;  %v7395_v20 = vld [vmem:[#allocation2 + $0x6ec] ss:$16 sps:$4 sm:$0xff]   ;;  %v8190_v21 = vrot.slane %v407_v11, %v10641_v14 }
  0xf7   :  { %2776 = vmatprep.mubr.bf16.mxu1 %v10643_v51  ;;  %2910 = vmatpush1.bf16.msra.mxu0 %v7294_v24 }
  0xf8   :  { %3103 = vmatpush1.bf16.msra.mxu1 %v7297_v25  ;;  %2911 = vmatprep.subr.bf16.mxu0 %v7306_v26 }
  0xf9   :  { %3104 = vmatprep.subr.bf16.mxu1 %v7309_v27 }
  0xfb   :  { %2912 = vmatpush1.bf16.msra.mxu0 %v7304_v28  ;;  %v7322_v28 = vld [vmem:[%s10633_s0 + $0x208] ss:$28 sps:$4 sm:$0xff]  }
  0xfc   :  { %3105 = vmatpush1.bf16.msra.mxu1 %v7307_v29  ;;  %2913 = vmatprep.subr.bf16.mxu0 %v7316_v33  ;;  %v7323_v29 = vld [vmem:[%s10633_s0 + $0x210] ss:$28 sps:$4 sm:$0xff]  }
  0xfd   :  { %3106 = vmatprep.subr.bf16.mxu1 %v7319_v34  ;;  %2584 = vmatmul.mubr.bf16.gmra.mxu0 %v7272_v30 }
  0xfe   :  { %2777 = vmatmul.mubr.bf16.gmra.mxu1 %v7273_v31  ;;  %2593 = vmatprep.mubr.bf16.mxu0 %v7280_v32 }
  0xff   :  { %2786 = vmatprep.mubr.bf16.mxu1 %v10643_v51  ;;  %2914 = vmatpush2.bf16.msra.mxu0 %v7314_v35 }
 0x100   :  { %3107 = vmatpush2.bf16.msra.mxu1 %v7317_v36  ;;  %2915 = vmatprep.subr.bf16.mxu0 %v7326_v37  ;;  %v7330_v36 = vld [vmem:[%s10633_s0 + $0x244] ss:$28 sps:$4 sm:$0xff]  }
 0x101   :  { %3108 = vmatprep.subr.bf16.mxu1 %v7329_v38 }
 0x103   :  { %2916 = vmatpush2.bf16.msra.mxu0 %v7324_v39 }
 0x104   :  { %3109 = vmatpush2.bf16.msra.mxu1 %v7327_v40  ;;  %2917 = vmatprep.subr.bf16.mxu0 %v7336_v44 }
 0x105   :  { %3110 = vmatprep.subr.bf16.mxu1 %v7339_v45  ;;  %2594 = vmatmul.mubr.bf16.gmra.mxu0 %v7282_v41 }
 0x106   :  { %2787 = vmatmul.mubr.bf16.gmra.mxu1 %v7283_v42  ;;  %2603 = vmatprep.mubr.bf16.mxu0 %v7290_v43 }
 0x107   :  { %2796 = vmatprep.mubr.bf16.mxu1 %v10643_v51  ;;  %2918 = vmatpush2.bf16.msra.mxu0 %v7334_v46 }
 0x108   :  { %3111 = vmatpush2.bf16.msra.mxu1 %v7337_v47  ;;  %2919 = vmatprep.subr.bf16.mxu0 %v7346_v48  ;;  %v7332_v47 = vld [vmem:[%s10633_s0 + $0x240] ss:$28 sps:$4 sm:$0xff]   ;;  %v7333_v48 = vld [vmem:[%s10633_s0 + $0x248] ss:$28 sps:$4 sm:$0xff]  }
 0x109   :  { %3112 = vmatprep.subr.bf16.mxu1 %v7349_v49 }
 0x10b   :  { %2920 = vmatpush2.bf16.msra.mxu0 %v7344_v50 }
 0x10c   :  { %3113 = vmatpush2.bf16.msra.mxu1 %v7347_v52  ;;  %2921 = vmatprep.subr.bf16.mxu0 %v7356_v56  ;;  %v7340_v56 = vld [vmem:[%s10633_s0 + $0x27c] ss:$28 sps:$4 sm:$0xff]  }
 0x10d   :  { %3114 = vmatprep.subr.bf16.mxu1 %v7359_v57  ;;  %2604 = vmatmul.mubr.bf16.gmra.mxu0 %v7292_v53 }
 0x10e   :  { %2797 = vmatmul.mubr.bf16.gmra.mxu1 %v7293_v54  ;;  %2613 = vmatprep.mubr.bf16.mxu0 %v7300_v55 }
 0x10f   :  { %2806 = vmatprep.mubr.bf16.mxu1 %v10643_v51  ;;  %2922 = vmatpush2.bf16.msra.mxu0 %v7354_v58 }
 0x110   :  { %3115 = vmatpush2.bf16.msra.mxu1 %v7357_v59  ;;  %2923 = vmatprep.subr.bf16.mxu0 %v7366_v60 }
 0x111   :  { %3116 = vmatprep.subr.bf16.mxu1 %v7369_v61 }
 0x113   :  { %2924 = vmatpush2.bf16.msra.mxu0 %v7364_v62 }
 0x114   :  { %3117 = vmatpush2.bf16.msra.mxu1 %v7367_v63  ;;  %2925 = vmatprep.subr.bf16.mxu0 %v7376_v4  ;;  %v7343_v4 = vld [vmem:[%s10633_s0 + $0x280] ss:$28 sps:$4 sm:$0xff]  }
 0x115   :  { %3118 = vmatprep.subr.bf16.mxu1 %v7379_v5  ;;  %2614 = vmatmul.mubr.bf16.gmra.mxu0 %v7302_v1 }
 0x116   :  { %2807 = vmatmul.mubr.bf16.gmra.mxu1 %v7303_v2  ;;  %2623 = vmatprep.mubr.bf16.mxu0 %v7310_v3  ;;  %v7342_v3 = vld [vmem:[%s10633_s0 + $0x278] ss:$28 sps:$4 sm:$0xff]  }
 0x117   :  { %2816 = vmatprep.mubr.bf16.mxu1 %v10643_v51  ;;  %2926 = vmatpush2.bf16.msra.mxu0 %v7374_v6 }
 0x118   :  { %3119 = vmatpush2.bf16.msra.mxu1 %v7377_v7  ;;  %2927 = vmatprep.subr.bf16.mxu0 %v7386_v9 }
 0x119   :  { %3120 = vmatprep.subr.bf16.mxu1 %v7389_v10 }
 0x11b   :  { %2928 = vmatpush2.bf16.msra.mxu0 %v7384_v12  ;;  %v7352_v12 = vld [vmem:[%s10633_s0 + $0x2b4] ss:$28 sps:$4 sm:$0xff]  }
 0x11c   :  { %3121 = vmatpush2.bf16.msra.mxu1 %v7387_v13  ;;  %3283 = vmatprep.subr.bf16.mxu0 %v7392_v19 }
 0x11d   :  { %3476 = vmatprep.subr.bf16.mxu1 %v7395_v20  ;;  %v2159_v23 = vpop.f32.mrf.mxu0  ;;  %2624 = vmatmul.mubr.bf16.gmra.mxu0 %v7312_v15 }
 0x11e   :  { %v2352_v24 = vpop.f32.mrf.mxu1  ;;  %2817 = vmatmul.mubr.bf16.gmra.mxu1 %v7313_v16  ;;  %v2160_v25 = vadd.f32 %v2159_v23, %v8190_v21  ;;  %2633 = vmatprep.mubr.bf16.mxu0 %v7320_v18 }
 0x11f   :  { %2826 = vmatprep.mubr.bf16.mxu1 %v10643_v51  ;;  %v2161_v26 = vpop.f32.mrf.mxu0 }
 0x120   :  { %v2354_v27 = vpop.f32.mrf.mxu1  ;;  %v8204_v30 = vadd.f32 %v2352_v24, %v2160_v25  ;;  %v2162_v31 = vadd.f32 %v2161_v26, %v8194_v22 }
 0x121   :  { %v2163_v32 = vpop.f32.mrf.mxu0 }
 0x122   :  { %v2356_v33 = vpop.f32.mrf.mxu1  ;;  %v8207_v34 = vadd.f32 %v2354_v27, %v2162_v31  ;;  %v2164_v35 = vadd.f32 %v2163_v32, %v8190_v21  ;;  %v7350_v27 = vld [vmem:[%s10633_s0 + $0x2b0] ss:$28 sps:$4 sm:$0xff]  }
 0x123   :  { %v2165_v37 = vpop.f32.mrf.mxu0 }
 0x124   :  { %v2358_v38 = vpop.f32.mrf.mxu1  ;;  %v8213_v39 = vadd.f32 %v2356_v33, %v2164_v35  ;;  %v2166_v40 = vadd.f32 %v2165_v37, %v8194_v22  ;;  %v7362_v37 = vld [vmem:[%s10633_s0 + $0x2ec] ss:$28 sps:$4 sm:$0xff]  }
 0x125   :  { %v2169_v41 = vpop.f32.mrf.mxu0  ;;  %2634 = vmatmul.mubr.bf16.gmra.mxu0 %v7322_v28  ;;  %v7353_v28 = vld [vmem:[%s10633_s0 + $0x2b8] ss:$28 sps:$4 sm:$0xff]  }
 0x126   :  { %v2362_v42 = vpop.f32.mrf.mxu1  ;;  %2827 = vmatmul.mubr.bf16.gmra.mxu1 %v7323_v29  ;;  %v8216_v43 = vadd.f32 %v2358_v38, %v2166_v40  ;;  %v2170_v44 = vadd.f32 %v2169_v41, %v8190_v21  ;;  %2643 = vmatprep.mubr.bf16.mxu0 %v7330_v36 }
 0x127   :  { %2836 = vmatprep.mubr.bf16.mxu1 %v10643_v51  ;;  %v2171_v45 = vpop.f32.mrf.mxu0 }
 0x128   :  { %v2364_v46 = vpop.f32.mrf.mxu1  ;;  %v8226_v49 = vadd.f32 %v2362_v42, %v2170_v44  ;;  %v2172_v50 = vadd.f32 %v2171_v45, %v8194_v22 }
 0x129   :  { %v2173_v52 = vpop.f32.mrf.mxu0 }
 0x12a   :  { %v2366_v53 = vpop.f32.mrf.mxu1  ;;  %v8229_v54 = vadd.f32 %v2364_v46, %v2172_v50  ;;  %v2174_v55 = vadd.f32 %v2173_v52, %v8190_v21 }
 0x12b   :  { %v2175_v57 = vpop.f32.mrf.mxu0 }
 0x12c   :  { %v2368_v58 = vpop.f32.mrf.mxu1  ;;  %v8235_v59 = vadd.f32 %v2366_v53, %v2174_v55  ;;  %v2176_v60 = vadd.f32 %v2175_v57, %v8194_v22  ;;  %v7360_v57 = vld [vmem:[%s10633_s0 + $0x2e8] ss:$28 sps:$4 sm:$0xff]  }
 0x12d   :  { %v2179_v61 = vpop.f32.mrf.mxu0  ;;  %2644 = vmatmul.mubr.bf16.gmra.mxu0 %v7332_v47 }
 0x12e   :  { %v2372_v62 = vpop.f32.mrf.mxu1  ;;  %2837 = vmatmul.mubr.bf16.gmra.mxu1 %v7333_v48  ;;  %v8238_v63 = vadd.f32 %v2368_v58, %v2176_v60  ;;  %v2180_v0 = vadd.f32 %v2179_v61, %v8190_v21  ;;  %2653 = vmatprep.mubr.bf16.mxu0 %v7340_v56  ;;  %v7363_v58 = vld [vmem:[%s10633_s0 + $0x2f0] ss:$28 sps:$4 sm:$0xff]  }
 0x12f   :  { %2846 = vmatprep.mubr.bf16.mxu1 %v10643_v51  ;;  %v2181_v1 = vpop.f32.mrf.mxu0 }
 0x130   :  { %v2374_v2 = vpop.f32.mrf.mxu1  ;;  %v8248_v5 = vadd.f32 %v2372_v62, %v2180_v0  ;;  %v2182_v6 = vadd.f32 %v2181_v1, %v8194_v22  ;;  %v7372_v62 = vld [vmem:[%s10633_s0 + $0x324] ss:$28 sps:$4 sm:$0xff]  }
 0x131   :  { %v2183_v7 = vpop.f32.mrf.mxu0 }
 0x132   :  { %v2376_v9 = vpop.f32.mrf.mxu1  ;;  %v8251_v10 = vadd.f32 %v2374_v2, %v2182_v6  ;;  %v2184_v11 = vadd.f32 %v2183_v7, %v8190_v21 }
 0x133   :  { %v2185_v13 = vpop.f32.mrf.mxu0 }
 0x134   :  { %v2378_v15 = vpop.f32.mrf.mxu1  ;;  %v8257_v16 = vadd.f32 %v2376_v9, %v2184_v11  ;;  %v2186_v18 = vadd.f32 %v2185_v13, %v8194_v22 }
 0x135   :  { %v2189_v19 = vpop.f32.mrf.mxu0  ;;  %2654 = vmatmul.mubr.bf16.gmra.mxu0 %v7342_v3 }
 0x136   :  { %v2382_v20 = vpop.f32.mrf.mxu1  ;;  %2847 = vmatmul.mubr.bf16.gmra.mxu1 %v7343_v4  ;;  %v8260_v23 = vadd.f32 %v2378_v15, %v2186_v18  ;;  %v2190_v24 = vadd.f32 %v2189_v19, %v8190_v21  ;;  %2663 = vmatprep.mubr.bf16.mxu0 %v7352_v12 }
 0x137   :  { %2856 = vmatprep.mubr.bf16.mxu1 %v10643_v51  ;;  %v2191_v25 = vpop.f32.mrf.mxu0 }
 0x138   :  { %v2384_v26 = vpop.f32.mrf.mxu1  ;;  %v8270_v29 = vadd.f32 %v2382_v20, %v2190_v24  ;;  %v2192_v31 = vadd.f32 %v2191_v25, %v8194_v22  ;;  %v7370_v20 = vld [vmem:[%s10633_s0 + $0x320] ss:$28 sps:$4 sm:$0xff]   ;;  %v7373_v24 = vld [vmem:[%s10633_s0 + $0x328] ss:$28 sps:$4 sm:$0xff]  }
 0x139   :  { %v2193_v32 = vpop.f32.mrf.mxu0 }
 0x13a   :  { %v2386_v33 = vpop.f32.mrf.mxu1  ;;  %v8273_v35 = vadd.f32 %v2384_v26, %v2192_v31  ;;  %v2194_v36 = vadd.f32 %v2193_v32, %v8190_v21 }
 0x13b   :  { %v2195_v38 = vpop.f32.mrf.mxu0 }
 0x13c   :  { %v2388_v40 = vpop.f32.mrf.mxu1  ;;  %v8279_v41 = vadd.f32 %v2386_v33, %v2194_v36  ;;  %v2196_v42 = vadd.f32 %v2195_v38, %v8194_v22 }
 0x13d   :  { %v2199_v44 = vpop.f32.mrf.mxu0  ;;  %2664 = vmatmul.mubr.bf16.gmra.mxu0 %v7350_v27  ;;  %v7382_v27 = vld [vmem:[%s10633_s0 + $0x35c] ss:$28 sps:$4 sm:$0xff]  }
 0x13e   :  { %v2392_v45 = vpop.f32.mrf.mxu1  ;;  %2857 = vmatmul.mubr.bf16.gmra.mxu1 %v7353_v28  ;;  %v8282_v46 = vadd.f32 %v2388_v40, %v2196_v42  ;;  %v2200_v47 = vadd.f32 %v2199_v44, %v8190_v21  ;;  %2673 = vmatprep.mubr.bf16.mxu0 %v7362_v37 }
 0x13f   :  { %2866 = vmatprep.mubr.bf16.mxu1 %v10643_v51  ;;  %v2201_v48 = vpop.f32.mrf.mxu0 }
 0x140   :  { %v2394_v50 = vpop.f32.mrf.mxu1  ;;  %v8286_v52 = vadd.f32 %v2392_v45, %v2200_v47  ;;  %v2202_v53 = vadd.f32 %v2201_v48, %v8194_v22 }
 0x141   :  { %v2203_v55 = vpop.f32.mrf.mxu0 }
 0x142   :  { %v2396_v56 = vpop.f32.mrf.mxu1  ;;  %v8295_v60 = vadd.f32 %v2394_v50, %v2202_v53  ;;  %v2204_v61 = vadd.f32 %v2203_v55, %v8190_v21  ;;  %v7380_v53 = vld [vmem:[%s10633_s0 + $0x358] ss:$28 sps:$4 sm:$0xff]   ;;  %v7383_v55 = vld [vmem:[%s10633_s0 + $0x360] ss:$28 sps:$4 sm:$0xff]  }
 0x143   :  { %v2205_v0 = vpop.f32.mrf.mxu0 }
 0x144   :  { %v2398_v1 = vpop.f32.mrf.mxu1  ;;  %v8301_v2 = vadd.f32 %v2396_v56, %v2204_v61  ;;  %v2206_v3 = vadd.f32 %v2205_v0, %v8194_v22 }
 0x145   :  { %v2209_v4 = vpop.f32.mrf.mxu0  ;;  %2674 = vmatmul.mubr.bf16.gmra.mxu0 %v7360_v57 }
 0x146   :  { %v2402_v6 = vpop.f32.mrf.mxu1  ;;  %2867 = vmatmul.mubr.bf16.gmra.mxu1 %v7363_v58  ;;  %v8304_v7 = vadd.f32 %v2398_v1, %v2206_v3  ;;  %v2210_v9 = vadd.f32 %v2209_v4, %v8190_v21  ;;  %2683 = vmatprep.mubr.bf16.mxu0 %v7372_v62 }
 0x147   :  { %2876 = vmatprep.mubr.bf16.mxu1 %v10643_v51  ;;  %v2211_v11 = vpop.f32.mrf.mxu0 }
 0x148   :  { %v2404_v12 = vpop.f32.mrf.mxu1  ;;  %v8308_v13 = vadd.f32 %v2402_v6, %v2210_v9  ;;  %v2212_v15 = vadd.f32 %v2211_v11, %v8194_v22  ;;  %v7686_v9 = vld [vmem:[%s10633_s0 + $0x4] ss:$28 sps:$4 sm:$0xff]   ;;  %v7687_v11 = vld [vmem:[%s10633_s0 + $0xc] ss:$28 sps:$4 sm:$0xff]  }
 0x149   :  { %v2213_v18 = vpop.f32.mrf.mxu0 }
 0x14a   :  { %v2406_v19 = vpop.f32.mrf.mxu1  ;;  %v8317_v25 = vadd.f32 %v2404_v12, %v2212_v15  ;;  %v2214_v26 = vadd.f32 %v2213_v18, %v8190_v21 }
 0x14b   :  { %v2215_v28 = vpop.f32.mrf.mxu0 }
 0x14c   :  { %v2408_v31 = vpop.f32.mrf.mxu1  ;;  %v8323_v32 = vadd.f32 %v2406_v19, %v2214_v26  ;;  %v2216_v33 = vadd.f32 %v2215_v28, %v8194_v22  ;;  %v7390_v28 = vld [vmem:[#allocation2 + $0x4e8] ss:$16 sps:$4 sm:$0xff]  }
 0x14d   :  { %v2219_v36 = vpop.f32.mrf.mxu0  ;;  %2684 = vmatmul.mubr.bf16.gmra.mxu0 %v7370_v20 }
 0x14e   :  { %v2412_v37 = vpop.f32.mrf.mxu1  ;;  %2877 = vmatmul.mubr.bf16.gmra.mxu1 %v7373_v24  ;;  %v8326_v38 = vadd.f32 %v2408_v31, %v2216_v33  ;;  %v2220_v40 = vadd.f32 %v2219_v36, %v8190_v21  ;;  %2693 = vmatprep.mubr.bf16.mxu0 %v7382_v27  ;;  %v7393_v31 = vld [vmem:[#allocation2 + $0x6e8] ss:$16 sps:$4 sm:$0xff]  }
 0x14f   :  { %2886 = vmatprep.mubr.bf16.mxu1 %v10643_v51  ;;  %v2221_v42 = vpop.f32.mrf.mxu0 }
 0x150   :  { %v2414_v44 = vpop.f32.mrf.mxu1  ;;  %v8330_v45 = vadd.f32 %v2412_v37, %v2220_v40  ;;  %v2222_v47 = vadd.f32 %v2221_v42, %v8194_v22  ;;  %v7398_v42 = vld [vmem:[#allocation2 + $0x4cc] ss:$16 sps:$4 sm:$0xff]  }
 0x151   :  { %v2223_v48 = vpop.f32.mrf.mxu0 }
 0x152   :  { %v2416_v50 = vpop.f32.mrf.mxu1  ;;  %v8339_v56 = vadd.f32 %v2414_v44, %v2222_v47  ;;  %v2224_v57 = vadd.f32 %v2223_v48, %v8190_v21  ;;  %v7404_v44 = vld [vmem:[#allocation2 + $0x6cc] ss:$16 sps:$4 sm:$0xff]  }
 0x153   :  { %v2225_v58 = vpop.f32.mrf.mxu0 }
 0x154   :  { %v2418_v61 = vpop.f32.mrf.mxu1  ;;  %v8342_v62 = vadd.f32 %v2416_v50, %v2224_v57  ;;  %v2226_v0 = vadd.f32 %v2225_v58, %v8194_v22  ;;  %v7688_v50 = vld [vmem:[%s10633_s0] ss:$28 sps:$4 sm:$0xff]   ;;  %v7396_v58 = vld [vmem:[#allocation2 + $0x4c8] ss:$16 sps:$4 sm:$0xff]  }
 0x155   :  { %v2229_v1 = vpop.f32.mrf.mxu0  ;;  %2694 = vmatmul.mubr.bf16.gmra.mxu0 %v7380_v53  ;;  %v7689_v53 = vld [vmem:[%s10633_s0 + $0x8] ss:$28 sps:$4 sm:$0xff]  }
 0x156   :  { %v2422_v3 = vpop.f32.mrf.mxu1  ;;  %2887 = vmatmul.mubr.bf16.gmra.mxu1 %v7383_v55  ;;  %v8345_v4 = vadd.f32 %v2418_v61, %v2226_v0  ;;  %v2230_v6 = vadd.f32 %v2229_v1, %v8190_v21  ;;  %2929 = vmatprep.mubr.bf16.mxu0 %v7686_v9  ;;  %v7402_v61 = vld [vmem:[#allocation2 + $0x6c8] ss:$16 sps:$4 sm:$0xff]   ;;  %v7401_v9 = vld [vmem:[#allocation2 + $0x4ac] ss:$16 sps:$4 sm:$0xff]  }
 0x157   :  { %3122 = vmatprep.mubr.bf16.mxu1 %v7687_v11  ;;  %v2231_v12 = vpop.f32.mrf.mxu0  ;;  %v7413_v11 = vld [vmem:[#allocation2 + $0x6ac] ss:$16 sps:$4 sm:$0xff]  }
 0x158   :  { %v2424_v15 = vpop.f32.mrf.mxu1  ;;  %v8354_v18 = vadd.f32 %v2422_v3, %v2230_v6  ;;  %v2232_v19 = vadd.f32 %v2231_v12, %v8194_v22  ;;  %v7690_v3 = vld [vmem:[%s10633_s0 + $0x3c] ss:$28 sps:$4 sm:$0xff]   ;;  %v7691_v6 = vld [vmem:[%s10633_s0 + $0x44] ss:$28 sps:$4 sm:$0xff]  }
 0x159   :  { %v2233_v20 = vpop.f32.mrf.mxu0 }
 0x15a   :  { %v2426_v24 = vpop.f32.mrf.mxu1  ;;  %v8357_v26 = vadd.f32 %v2424_v15, %v2232_v19  ;;  %v2234_v27 = vadd.f32 %v2233_v20, %v8190_v21 }
 0x15b   :  { %v2235_v33 = vpop.f32.mrf.mxu0 }
 0x15c   :  { %v2428_v36 = vpop.f32.mrf.mxu1  ;;  %v8360_v37 = vadd.f32 %v2426_v24, %v2234_v27  ;;  %v2236_v40 = vadd.f32 %v2235_v33, %v8194_v22  ;;  %v7399_v33 = vld [vmem:[#allocation2 + $0x4a8] ss:$16 sps:$4 sm:$0xff]  }
 0x15d   :  { %v2239_v47 = vpop.f32.mrf.mxu0  ;;  %2930 = vmatmul.mubr.bf16.vlgmr.msra.gmra.mxu0 %v7688_v50 }
 0x15e   :  { %v2432_v48 = vpop.f32.mrf.mxu1  ;;  %3123 = vmatmul.mubr.bf16.vlgmr.msra.gmra.mxu1 %v7689_v53  ;;  %v8369_v55 = vadd.f32 %v2428_v36, %v2236_v40  ;;  %v2240_v57 = vadd.f32 %v2239_v47, %v8190_v21  ;;  %3284 = vmatpush1.bf16.msra.mxu0 %v7390_v28  ;;  %v7411_v36 = vld [vmem:[#allocation2 + $0x6a8] ss:$16 sps:$4 sm:$0xff]  }
 0x15f   :  { %3477 = vmatpush1.bf16.msra.mxu1 %v7393_v31  ;;  %v2241_v0 = vpop.f32.mrf.mxu0  ;;  %2939 = vmatprep.mubr.bf16.mxu0 %v7690_v3  ;;  %v7692_v53 = vld [vmem:[%s10633_s0 + $0x38] ss:$28 sps:$4 sm:$0xff]  }
 0x160   :  { %v2434_v1 = vpop.f32.mrf.mxu1  ;;  %3132 = vmatprep.mubr.bf16.mxu1 %v7691_v6  ;;  %v8378_v12 = vadd.f32 %v2432_v48, %v2240_v57  ;;  %v2242_v15 = vadd.f32 %v2241_v0, %v8194_v22  ;;  %3285 = vmatprep.subr.bf16.mxu0 %v7398_v42  ;;  %v7407_v42 = vld [vmem:[#allocation2 + $0x48c] ss:$16 sps:$4 sm:$0xff]   ;;  %v7694_v0 = vld [vmem:[%s10633_s0 + $0x74] ss:$28 sps:$4 sm:$0xff]  }
 0x161   :  { %3478 = vmatprep.subr.bf16.mxu1 %v7404_v44  ;;  %v2243_v19 = vpop.f32.mrf.mxu0  ;;  %v7422_v44 = vld [vmem:[#allocation2 + $0x68c] ss:$16 sps:$4 sm:$0xff]  }
 0x162   :  { %v2436_v20 = vpop.f32.mrf.mxu1  ;;  %v8381_v24 = vadd.f32 %v2434_v1, %v2242_v15  ;;  %v2244_v27 = vadd.f32 %v2243_v19, %v8190_v21  ;;  %3286 = vmatpush1.bf16.msra.mxu0 %v7396_v58  ;;  %v7693_v57 = vld [vmem:[%s10633_s0 + $0x40] ss:$28 sps:$4 sm:$0xff]  }
 0x163   :  { %3479 = vmatpush1.bf16.msra.mxu1 %v7402_v61  ;;  %v2245_v28 = vpop.f32.mrf.mxu0  ;;  %3287 = vmatprep.subr.bf16.mxu0 %v7401_v9  ;;  %v7695_v1 = vld [vmem:[%s10633_s0 + $0x7c] ss:$28 sps:$4 sm:$0xff]  }
 0x164   :  { %v2438_v31 = vpop.f32.mrf.mxu1  ;;  %3480 = vmatprep.subr.bf16.mxu1 %v7413_v11  ;;  %v8384_v40 = vadd.f32 %v2436_v20, %v2244_v27  ;;  %v2246_v47 = vadd.f32 %v2245_v28, %v8194_v22  ;;  %v7405_v9 = vld [vmem:[#allocation2 + $0x488] ss:$16 sps:$4 sm:$0xff]   ;;  %v7410_v20 = vld [vmem:[#allocation2 + $0x46c] ss:$16 sps:$4 sm:$0xff]  }
 0x165   :  { %v2249_v48 = vpop.f32.mrf.mxu0  ;;  %2940 = vmatmul.mubr.bf16.gmra.mxu0 %v7692_v53  ;;  %v7420_v11 = vld [vmem:[#allocation2 + $0x688] ss:$16 sps:$4 sm:$0xff]   ;;  %v7431_v27 = vld [vmem:[#allocation2 + $0x66c] ss:$16 sps:$4 sm:$0xff]  }
 0x166   :  { %v2442_v50 = vpop.f32.mrf.mxu1  ;;  %3133 = vmatmul.mubr.bf16.gmra.mxu1 %v7693_v57  ;;  %v8393_v58 = vadd.f32 %v2438_v31, %v2246_v47  ;;  %v2250_v61 = vadd.f32 %v2249_v48, %v8190_v21  ;;  %2949 = vmatprep.mubr.bf16.mxu0 %v7694_v0 }
 0x167   :  { %3142 = vmatprep.mubr.bf16.mxu1 %v7695_v1  ;;  %v2251_v3 = vpop.f32.mrf.mxu0  ;;  %3288 = vmatpush1.bf16.msra.mxu0 %v7399_v33  ;;  %v7408_v33 = vld [vmem:[#allocation2 + $0x468] ss:$16 sps:$4 sm:$0xff]  }
 0x168   :  { %v2444_v6 = vpop.f32.mrf.mxu1  ;;  %3481 = vmatpush1.bf16.msra.mxu1 %v7411_v36  ;;  %v8402_v15 = vadd.f32 %v2442_v50, %v2250_v61  ;;  %v2252_v19 = vadd.f32 %v2251_v3, %v8194_v22  ;;  %3289 = vmatprep.subr.bf16.mxu0 %v7407_v42  ;;  %v7429_v36 = vld [vmem:[#allocation2 + $0x668] ss:$16 sps:$4 sm:$0xff]   ;;  %v7416_v42 = vld [vmem:[#allocation2 + $0x44c] ss:$16 sps:$4 sm:$0xff]  }
 0x169   :  { %3482 = vmatprep.subr.bf16.mxu1 %v7422_v44  ;;  %v2253_v28 = vpop.f32.mrf.mxu0  ;;  %v7440_v44 = vld [vmem:[#allocation2 + $0x64c] ss:$16 sps:$4 sm:$0xff]  }
 0x16a   :  { %v2446_v31 = vpop.f32.mrf.mxu1  ;;  %v8405_v47 = vadd.f32 %v2444_v6, %v2252_v19  ;;  %v2254_v48 = vadd.f32 %v2253_v28, %v8190_v21  ;;  %v7696_v3 = vld [vmem:[%s10633_s0 + $0x70] ss:$28 sps:$4 sm:$0xff]   ;;  %v7697_v6 = vld [vmem:[%s10633_s0 + $0x78] ss:$28 sps:$4 sm:$0xff]  }
 0x16b   :  { %v2255_v53 = vpop.f32.mrf.mxu0  ;;  %3290 = vmatpush1.bf16.msra.mxu0 %v7405_v9  ;;  %v7698_v19 = vld [vmem:[%s10633_s0 + $0xac] ss:$28 sps:$4 sm:$0xff]  }
 0x16c   :  { %v2448_v57 = vpop.f32.mrf.mxu1  ;;  %3483 = vmatpush1.bf16.msra.mxu1 %v7420_v11  ;;  %v8408_v50 = vadd.f32 %v2446_v31, %v2254_v48  ;;  %v2256_v61 = vadd.f32 %v2255_v53, %v8194_v22  ;;  %3291 = vmatprep.subr.bf16.mxu0 %v7410_v20  ;;  %v7699_v20 = vld [vmem:[%s10633_s0 + $0xb4] ss:$28 sps:$4 sm:$0xff]   ;;  %v7414_v31 = vld [vmem:[#allocation2 + $0x448] ss:$16 sps:$4 sm:$0xff]  }
 0x16d   :  { %3484 = vmatprep.subr.bf16.mxu1 %v7431_v27  ;;  %v2259_v0 = vpop.f32.mrf.mxu0  ;;  %2950 = vmatmul.mubr.bf16.gmra.mxu0 %v7696_v3  ;;  %v7438_v48 = vld [vmem:[#allocation2 + $0x648] ss:$16 sps:$4 sm:$0xff]  }
 0x16e   :  { %v2452_v1 = vpop.f32.mrf.mxu1  ;;  %3143 = vmatmul.mubr.bf16.gmra.mxu1 %v7697_v6  ;;  %v8417_v9 = vadd.f32 %v2448_v57, %v2256_v61  ;;  %v2260_v11 = vadd.f32 %v2259_v0, %v8190_v21  ;;  %2959 = vmatprep.mubr.bf16.mxu0 %v7698_v19  ;;  %v7419_v61 = vld [vmem:[#allocation2 + $0x42c] ss:$16 sps:$4 sm:$0xff]  }
 0x16f   :  { %3152 = vmatprep.mubr.bf16.mxu1 %v7699_v20  ;;  %v2261_v27 = vpop.f32.mrf.mxu0  ;;  %3292 = vmatpush1.bf16.msra.mxu0 %v7408_v33  ;;  %v7449_v0 = vld [vmem:[#allocation2 + $0x62c] ss:$16 sps:$4 sm:$0xff]   ;;  %v7417_v33 = vld [vmem:[#allocation2 + $0x428] ss:$16 sps:$4 sm:$0xff]  }
 0x170   :  { %v2454_v28 = vpop.f32.mrf.mxu1  ;;  %3485 = vmatpush1.bf16.msra.mxu1 %v7429_v36  ;;  %v8426_v53 = vadd.f32 %v2452_v1, %v2260_v11  ;;  %v2262_v57 = vadd.f32 %v2261_v27, %v8194_v22  ;;  %3293 = vmatprep.subr.bf16.mxu0 %v7416_v42  ;;  %v7447_v36 = vld [vmem:[#allocation2 + $0x628] ss:$16 sps:$4 sm:$0xff]   ;;  %v7425_v42 = vld [vmem:[#allocation2 + $0x40c] ss:$16 sps:$4 sm:$0xff]  }
 0x171   :  { %3486 = vmatprep.subr.bf16.mxu1 %v7440_v44  ;;  %v2263_v3 = vpop.f32.mrf.mxu0  ;;  %v7458_v44 = vld [vmem:[#allocation2 + $0x60c] ss:$16 sps:$4 sm:$0xff]  }
 0x172   :  { %v2456_v6 = vpop.f32.mrf.mxu1  ;;  %v8429_v19 = vadd.f32 %v2454_v28, %v2262_v57  ;;  %v2264_v20 = vadd.f32 %v2263_v3, %v8190_v21  ;;  %v7700_v28 = vld [vmem:[%s10633_s0 + $0xa8] ss:$28 sps:$4 sm:$0xff]  }
 0x173   :  { %v2265_v14 = vpop.f32.mrf.mxu0  ;;  %3294 = vmatpush1.bf16.msra.mxu0 %v7414_v31  ;;  %v7701_v31 = vld [vmem:[%s10633_s0 + $0xb0] ss:$28 sps:$4 sm:$0xff]   ;;  %v7702_v57 = vld [vmem:[%s10633_s0 + $0xe4] ss:$28 sps:$4 sm:$0xff]  }
 0x174   :  { %v2458_v17 = vpop.f32.mrf.mxu1  ;;  %3487 = vmatpush1.bf16.msra.mxu1 %v7438_v48  ;;  %v8432_v1 = vadd.f32 %v2456_v6, %v2264_v20  ;;  %v2266_v11 = vadd.f32 %v2265_v14, %v8194_v22  ;;  %3295 = vmatprep.subr.bf16.mxu0 %v7419_v61  ;;  %v7703_v61 = vld [vmem:[%s10633_s0 + $0xec] ss:$28 sps:$4 sm:$0xff]  }
 0x175   :  { %3488 = vmatprep.subr.bf16.mxu1 %v7449_v0  ;;  %v2269_v27 = vpop.f32.mrf.mxu0  ;;  %2960 = vmatmul.mubr.bf16.gmra.mxu0 %v7700_v28  ;;  %v7423_v6 = vld [vmem:[#allocation2 + $0x408] ss:$16 sps:$4 sm:$0xff]  }
 0x176   :  { %v2462_v51 = vpop.f32.mrf.mxu1  ;;  %3153 = vmatmul.mubr.bf16.gmra.mxu1 %v7701_v31  ;;  %v8441_v48 = vadd.f32 %v2458_v17, %v2266_v11  ;;  %v2270_v14 = vadd.f32 %v2269_v27, %v8190_v21  ;;  %2969 = vmatprep.mubr.bf16.mxu0 %v7702_v57  ;;  %v7456_v20 = vld [vmem:[#allocation2 + $0x608] ss:$16 sps:$4 sm:$0xff]   ;;  %v7428_v27 = vld [vmem:[#allocation2 + $0x5ec] ss:$16 sps:$4 sm:$0xff]  }
 0x177   :  { %3162 = vmatprep.mubr.bf16.mxu1 %v7703_v61  ;;  %v2271_v0 = vpop.f32.mrf.mxu0  ;;  %3296 = vmatpush1.bf16.msra.mxu0 %v7417_v33  ;;  %v7426_v33 = vld [vmem:[#allocation2 + $0x5e8] ss:$16 sps:$4 sm:$0xff]  }
 0x178   :  { %10682 = vst [vmem:[#allocation9_spill] sm:$0xff] %v8441_v48  ;;  %v2464_v3 = vpop.f32.mrf.mxu1  ;;  %3489 = vmatpush1.bf16.msra.mxu1 %v7447_v36  ;;  %v8450_v17 = vadd.f32 %v2462_v51, %v2270_v14  ;;  %v2272_v11 = vadd.f32 %v2271_v0, %v8194_v22  ;;  %3297 = vmatprep.subr.bf16.mxu0 %v7425_v42  ;;  %v7434_v14 = vld [vmem:[#allocation2 + $0x5cc] ss:$16 sps:$4 sm:$0xff]  }
 0x179   :  { %3490 = vmatprep.subr.bf16.mxu1 %v7458_v44  ;;  %v2273_v28 = vpop.f32.mrf.mxu0  ;;  %v7704_v44 = vld [vmem:[%s10633_s0 + $0xe0] ss:$28 sps:$4 sm:$0xff]  }
 0x17a   :  { %v2466_v31 = vpop.f32.mrf.mxu1  ;;  %v8453_v57 = vadd.f32 %v2464_v3, %v2272_v11  ;;  %v2274_v8 = vadd.f32 %v2273_v28, %v8190_v21  ;;  %v7705_v3 = vld [vmem:[%s10633_s0 + $0xe8] ss:$28 sps:$4 sm:$0xff]  }
 0x17b   :  { %v2275_v61 = vpop.f32.mrf.mxu0  ;;  %3298 = vmatpush1.bf16.msra.mxu0 %v7423_v6  ;;  %v7707_v11 = vld [vmem:[%s10633_s0 + $0x124] ss:$28 sps:$4 sm:$0xff]  }
 0x17c   :  { %10683 = vst [vmem:[#allocation10_spill] sm:$0xff] %v8453_v57  ;;  %v2468_v48 = vpop.f32.mrf.mxu1  ;;  %3491 = vmatpush1.bf16.msra.mxu1 %v7456_v20  ;;  %v8456_v36 = vadd.f32 %v2466_v31, %v2274_v8  ;;  %v2276_v51 = vadd.f32 %v2275_v61, %v8194_v22  ;;  %3299 = vmatprep.subr.bf16.mxu0 %v7428_v27  ;;  %v7706_v20 = vld [vmem:[%s10633_s0 + $0x11c] ss:$28 sps:$4 sm:$0xff]  }
 0x17d   :  { %v2279_v42 = vpop.f32.mrf.mxu0  ;;  %2970 = vmatmul.mubr.bf16.gmra.mxu0 %v7704_v44  ;;  %v7432_v31 = vld [vmem:[#allocation2 + $0x5c8] ss:$16 sps:$4 sm:$0xff]  }
 0x17e   :  { %10684 = vst [vmem:[#allocation11_spill] sm:$0xff] %v8456_v36  ;;  %v2472_v0 = vpop.f32.mrf.mxu1  ;;  %3163 = vmatmul.mubr.bf16.gmra.mxu1 %v7705_v3  ;;  %v8465_v6 = vadd.f32 %v2468_v48, %v2276_v51  ;;  %v2280_v8 = vadd.f32 %v2279_v42, %v8190_v21  ;;  %2979 = vmatprep.mubr.bf16.mxu0 %v7706_v20  ;;  %v7437_v51 = vld [vmem:[#allocation2 + $0x5ac] ss:$16 sps:$4 sm:$0xff]  }
 0x17f   :  { %3172 = vmatprep.mubr.bf16.mxu1 %v7707_v11  ;;  %v2281_v27 = vpop.f32.mrf.mxu0  ;;  %3300 = vmatpush2.bf16.msra.mxu0 %v7426_v33  ;;  %v7435_v11 = vld [vmem:[#allocation2 + $0x5a8] ss:$16 sps:$4 sm:$0xff]  }
 0x180   :  { %10685 = vst [vmem:[#allocation12_spill] sm:$0xff] %v8465_v6  ;;  %v2474_v28 = vpop.f32.mrf.mxu1  ;;  %v8474_v61 = vadd.f32 %v2472_v0, %v2280_v8  ;;  %v2282_v48 = vadd.f32 %v2281_v27, %v8194_v22  ;;  %3301 = vmatprep.subr.bf16.mxu0 %v7434_v14  ;;  %v7443_v0 = vld [vmem:[#allocation2 + $0x58c] ss:$16 sps:$4 sm:$0xff]   ;;  %v7708_v14 = vld [vmem:[%s10633_s0 + $0x118] ss:$28 sps:$4 sm:$0xff]  }
 0x181   :  { %v2283_v42 = vpop.f32.mrf.mxu0 }
 0x182   :  { %10686 = vst [vmem:[#allocation13_spill] sm:$0xff] %v8474_v61  ;;  %v2476_v44 = vpop.f32.mrf.mxu1  ;;  %v8477_v3 = vadd.f32 %v2474_v28, %v2282_v48  ;;  %v2284_v20 = vadd.f32 %v2283_v42, %v8190_v21  ;;  %v7709_v28 = vld [vmem:[%s10633_s0 + $0x120] ss:$28 sps:$4 sm:$0xff]  }
 0x183   :  { %v2285_v6 = vpop.f32.mrf.mxu0  ;;  %3302 = vmatpush2.bf16.msra.mxu0 %v7432_v31 }
 0x184   :  { %10687 = vst [vmem:[#allocation14_spill] sm:$0xff] %v8477_v3  ;;  %v2478_v36 = vpop.f32.mrf.mxu1  ;;  %v8480_v57 = vadd.f32 %v2476_v44, %v2284_v20  ;;  %v2286_v33 = vadd.f32 %v2285_v6, %v8194_v22  ;;  %3303 = vmatprep.subr.bf16.mxu0 %v7437_v51  ;;  %v7710_v6 = vld [vmem:[%s10633_s0 + $0x154] ss:$28 sps:$4 sm:$0xff]   ;;  %v7711_v51 = vld [vmem:[%s10633_s0 + $0x15c] ss:$28 sps:$4 sm:$0xff]  }
 0x185   :  { %v2289_v8 = vpop.f32.mrf.mxu0  ;;  %2980 = vmatmul.mubr.bf16.gmra.mxu0 %v7708_v14  ;;  %v7441_v20 = vld [vmem:[#allocation2 + $0x588] ss:$16 sps:$4 sm:$0xff]  }
 0x186   :  { %10688 = vst [vmem:[#allocation15_spill] sm:$0xff] %v8480_v57  ;;  %v2482_v27 = vpop.f32.mrf.mxu1  ;;  %3173 = vmatmul.mubr.bf16.gmra.mxu1 %v7709_v28  ;;  %v8489_v31 = vadd.f32 %v2478_v36, %v2286_v33  ;;  %v2290_v48 = vadd.f32 %v2289_v8, %v8190_v21  ;;  %2989 = vmatprep.mubr.bf16.mxu0 %v7710_v6  ;;  %v7446_v33 = vld [vmem:[#allocation2 + $0x56c] ss:$16 sps:$4 sm:$0xff]  }
 0x187   :  { %3182 = vmatprep.mubr.bf16.mxu1 %v7711_v51  ;;  %v2291_v42 = vpop.f32.mrf.mxu0  ;;  %3304 = vmatpush2.bf16.msra.mxu0 %v7435_v11  ;;  %v7444_v51 = vld [vmem:[#allocation2 + $0x568] ss:$16 sps:$4 sm:$0xff]  }
 0x188   :  { %10689 = vst [vmem:[#allocation16_spill] sm:$0xff] %v8489_v31  ;;  %v2484_v44 = vpop.f32.mrf.mxu1  ;;  %v8498_v14 = vadd.f32 %v2482_v27, %v2290_v48  ;;  %v2292_v36 = vadd.f32 %v2291_v42, %v8194_v22  ;;  %3305 = vmatprep.subr.bf16.mxu0 %v7443_v0  ;;  %v7452_v27 = vld [vmem:[#allocation2 + $0x54c] ss:$16 sps:$4 sm:$0xff]  }
 0x189   :  { %v2293_v8 = vpop.f32.mrf.mxu0  ;;  %v7712_v0 = vld [vmem:[%s10633_s0 + $0x150] ss:$28 sps:$4 sm:$0xff]  }
 0x18a   :  { %10690 = vst [vmem:[#allocation17_spill] sm:$0xff] %v8498_v14  ;;  %v2486_v28 = vpop.f32.mrf.mxu1  ;;  %v8501_v31 = vadd.f32 %v2484_v44, %v2292_v36  ;;  %v2294_v6 = vadd.f32 %v2293_v8, %v8190_v21  ;;  %v7713_v44 = vld [vmem:[%s10633_s0 + $0x158] ss:$28 sps:$4 sm:$0xff]  }
 0x18b   :  { %v2295_v57 = vpop.f32.mrf.mxu0  ;;  %3306 = vmatpush2.bf16.msra.mxu0 %v7441_v20 }
 0x18c   :  { %10691 = vst [vmem:[#allocation18_spill] sm:$0xff] %v8501_v31  ;;  %v2488_v3 = vpop.f32.mrf.mxu1  ;;  %v8504_v61 = vadd.f32 %v2486_v28, %v2294_v6  ;;  %v2296_v11 = vadd.f32 %v2295_v57, %v8194_v22  ;;  %3307 = vmatprep.subr.bf16.mxu0 %v7446_v33  ;;  %v7714_v57 = vld [vmem:[%s10633_s0 + $0x18c] ss:$28 sps:$4 sm:$0xff]   ;;  %v7715_v33 = vld [vmem:[%s10633_s0 + $0x194] ss:$28 sps:$4 sm:$0xff]  }
 0x18d   :  { %v2299_v48 = vpop.f32.mrf.mxu0  ;;  %2990 = vmatmul.mubr.bf16.gmra.mxu0 %v7712_v0  ;;  %v7450_v6 = vld [vmem:[#allocation2 + $0x548] ss:$16 sps:$4 sm:$0xff]  }
 0x18e   :  { %10692 = vst [vmem:[#allocation19_spill] sm:$0xff] %v8504_v61  ;;  %v2492_v42 = vpop.f32.mrf.mxu1  ;;  %3183 = vmatmul.mubr.bf16.gmra.mxu1 %v7713_v44  ;;  %v8513_v20 = vadd.f32 %v2488_v3, %v2296_v11  ;;  %v2300_v36 = vadd.f32 %v2299_v48, %v8190_v21  ;;  %2999 = vmatprep.mubr.bf16.mxu0 %v7714_v57  ;;  %v7455_v11 = vld [vmem:[#allocation2 + $0x52c] ss:$16 sps:$4 sm:$0xff]  }
 0x18f   :  { %3192 = vmatprep.mubr.bf16.mxu1 %v7715_v33  ;;  %v2301_v8 = vpop.f32.mrf.mxu0  ;;  %3308 = vmatpush2.bf16.msra.mxu0 %v7444_v51  ;;  %v7453_v33 = vld [vmem:[#allocation2 + $0x528] ss:$16 sps:$4 sm:$0xff]  }
 0x190   :  { %10693 = vst [vmem:[#allocation20_spill] sm:$0xff] %v8513_v20  ;;  %v2494_v28 = vpop.f32.mrf.mxu1  ;;  %v8522_v0 = vadd.f32 %v2492_v42, %v2300_v36  ;;  %v2302_v3 = vadd.f32 %v2301_v8, %v8194_v22  ;;  %3309 = vmatprep.subr.bf16.mxu0 %v7452_v27  ;;  %v7461_v42 = vld [vmem:[#allocation2 + $0x50c] ss:$16 sps:$4 sm:$0xff]   ;;  %v7716_v27 = vld [vmem:[%s10633_s0 + $0x188] ss:$28 sps:$4 sm:$0xff]  }
 0x191   :  { %v2303_v48 = vpop.f32.mrf.mxu0 }
 0x192   :  { %v2496_v44 = vpop.f32.mrf.mxu1  ;;  %v8525_v20 = vadd.f32 %v2494_v28, %v2302_v3  ;;  %v2304_v57 = vadd.f32 %v2303_v48, %v8190_v21  ;;  %v7717_v28 = vld [vmem:[%s10633_s0 + $0x190] ss:$28 sps:$4 sm:$0xff]  }
 0x193   :  { %v2305_v61 = vpop.f32.mrf.mxu0  ;;  %3310 = vmatpush2.bf16.msra.mxu0 %v7450_v6 }
 0x194   :  { %v2498_v31 = vpop.f32.mrf.mxu1  ;;  %v8528_v14 = vadd.f32 %v2496_v44, %v2304_v57  ;;  %v2306_v51 = vadd.f32 %v2305_v61, %v8194_v22  ;;  %3311 = vmatprep.subr.bf16.mxu0 %v7455_v11  ;;  %v7718_v61 = vld [vmem:[%s10633_s0 + $0x1c4] ss:$28 sps:$4 sm:$0xff]   ;;  %v7719_v11 = vld [vmem:[%s10633_s0 + $0x1cc] ss:$28 sps:$4 sm:$0xff]  }
 0x195   :  { %v2309_v36 = vpop.f32.mrf.mxu0  ;;  %3000 = vmatmul.mubr.bf16.gmra.mxu0 %v7716_v27  ;;  %v7459_v57 = vld [vmem:[#allocation2 + $0x508] ss:$16 sps:$4 sm:$0xff]  }
 0x196   :  { %10694 = vst [vmem:[#allocation21_spill] sm:$0xff] %v8528_v14  ;;  %v2502_v8 = vpop.f32.mrf.mxu1  ;;  %3193 = vmatmul.mubr.bf16.gmra.mxu1 %v7717_v28  ;;  %v8537_v6 = vadd.f32 %v2498_v31, %v2306_v51  ;;  %v2310_v3 = vadd.f32 %v2309_v36, %v8190_v21  ;;  %3009 = vmatprep.mubr.bf16.mxu0 %v7718_v61 }
 0x197   :  { %3202 = vmatprep.mubr.bf16.mxu1 %v7719_v11  ;;  %v2311_v48 = vpop.f32.mrf.mxu0  ;;  %3312 = vmatpush2.bf16.msra.mxu0 %v7453_v33  ;;  %v7464_v11 = vld [vmem:[%s10636_s3 + $0xe4] ss:$16 sps:$4 sm:$0xff]  }
 0x198   :  { %10695 = vst [vmem:[#allocation22_spill] sm:$0xff] %v8537_v6  ;;  %v2504_v44 = vpop.f32.mrf.mxu1  ;;  %v8546_v27 = vadd.f32 %v2502_v8, %v2310_v3  ;;  %v2312_v31 = vadd.f32 %v2311_v48, %v8194_v22  ;;  %3313 = vmatprep.subr.bf16.mxu0 %v7461_v42  ;;  %v7720_v42 = vld [vmem:[%s10633_s0 + $0x1c0] ss:$28 sps:$4 sm:$0xff]  }
 0x199   :  { %v2313_v51 = vpop.f32.mrf.mxu0 }
 0x19a   :  { %10696 = vst [vmem:[#allocation23_spill] sm:$0xff] %v8546_v27  ;;  %v2506_v36 = vpop.f32.mrf.mxu1  ;;  %v8549_v28 = vadd.f32 %v2504_v44, %v2312_v31  ;;  %v2314_v61 = vadd.f32 %v2313_v51, %v8190_v21  ;;  %v7721_v21 = vld [vmem:[%s10633_s0 + $0x1c8] ss:$28 sps:$4 sm:$0xff]  }
 0x19b   :  { %v2315_v6 = vpop.f32.mrf.mxu0  ;;  %3314 = vmatpush2.bf16.msra.mxu0 %v7459_v57 }
 0x19c   :  { %10697 = vst [vmem:[#allocation24_spill] sm:$0xff] %v8549_v28  ;;  %v2508_v14 = vpop.f32.mrf.mxu1  ;;  %v8555_v33 = vadd.f32 %v2506_v36, %v2314_v61  ;;  %v2316_v8 = vadd.f32 %v2315_v6, %v8194_v22  ;;  %v7722_v22 = vld [vmem:[%s10633_s0 + $0x1fc] ss:$28 sps:$4 sm:$0xff]   ;;  %v7723_v6 = vld [vmem:[%s10633_s0 + $0x204] ss:$28 sps:$4 sm:$0xff]   ;;  %4651 = vmatprep.subr.bf16.mxu0 %v7464_v11 }
 0x19d   :  { %v2545_v3 = vpop.f32.mrf.mxu0  ;;  %3010 = vmatmul.mubr.bf16.gmra.mxu0 %v7720_v42 }
 0x19e   :  { %10698 = vst [vmem:[#allocation25_spill] sm:$0xff] %v8555_v33  ;;  %v2738_v48 = vpop.f32.mrf.mxu1  ;;  %3203 = vmatmul.mubr.bf16.gmra.mxu1 %v7721_v21  ;;  %v8564_v44 = vadd.f32 %v2508_v14, %v2316_v8  ;;  %v2546_v57 = vadd.f32 %v2545_v3, %v8204_v30  ;;  %3019 = vmatprep.mubr.bf16.mxu0 %v7722_v22 }
 0x19f   :  { %3212 = vmatprep.mubr.bf16.mxu1 %v7723_v6  ;;  %v2547_v31 = vpop.f32.mrf.mxu0  ;;  %v7724_v6 = vld [vmem:[%s10633_s0 + $0x1f8] ss:$28 sps:$4 sm:$0xff]  }
 0x1a0   :  { %10699 = vst [vmem:[#allocation26_spill] sm:$0xff] %v8564_v44  ;;  %v2740_v51 = vpop.f32.mrf.mxu1  ;;  %v2739_v36 = vadd.f32 %v2738_v48, %v2546_v57  ;;  %v2548_v61 = vadd.f32 %v2547_v31, %v8207_v34  ;;  %v7725_v34 = vld [vmem:[%s10633_s0 + $0x200] ss:$28 sps:$4 sm:$0xff]  }
 0x1a1   :  { %v2549_v14 = vpop.f32.mrf.mxu0  ;;  %v7727_v31 = vld [vmem:[%s10633_s0 + $0x23c] ss:$28 sps:$4 sm:$0xff]  }
 0x1a2   :  { %v2742_v8 = vpop.f32.mrf.mxu1  ;;  %v2741_v42 = vadd.f32 %v2740_v51, %v2548_v61  ;;  %v2550_v30 = vadd.f32 %v2549_v14, %v8213_v39  ;;  %v3669_v11 = vmax.f32 %v2739_v36, 0.0 }
 0x1a3   :  { %v2551_v3 = vpop.f32.mrf.mxu0 }
 0x1a4   :  { %v2744_v21 = vpop.f32.mrf.mxu1  ;;  %v2743_v44 = vadd.f32 %v2742_v8, %v2550_v30  ;;  %v2552_v22 = vadd.f32 %v2551_v3, %v8216_v43  ;;  %v7726_v43 = vld [vmem:[%s10633_s0 + $0x234] ss:$28 sps:$4 sm:$0xff]   ;;  %v3670_v51 = vmax.f32 %v2741_v42, 0.0 }
 0x1a5   :  { %v2555_v33 = vpop.f32.mrf.mxu0  ;;  %3020 = vmatmul.mubr.bf16.gmra.mxu0 %v7724_v6 }
 0x1a6   :  { %v2748_v28 = vpop.f32.mrf.mxu1  ;;  %3213 = vmatmul.mubr.bf16.gmra.mxu1 %v7725_v34  ;;  %v3673_v48 = vmax.f32 %v2743_v44, 0.0  ;;  %v2745_v39 = vadd.f32 %v2744_v21, %v2552_v22  ;;  %v2556_v57 = vadd.f32 %v2555_v33, %v8226_v49  ;;  %3029 = vmatprep.mubr.bf16.mxu0 %v7726_v43 }
 0x1a7   :  { %3222 = vmatprep.mubr.bf16.mxu1 %v7727_v31  ;;  %v2557_v61 = vpop.f32.mrf.mxu0 }
 0x1a8   :  { %v2750_v14 = vpop.f32.mrf.mxu1  ;;  %v8589_v8 = vpack.c.bf16 %v3673_v48, %v3669_v11  ;;  %v3674_v36 = vmax.f32 %v2745_v39, 0.0  ;;  %v2749_v44 = vadd.f32 %v2748_v28, %v2556_v57  ;;  %v2558_v30 = vadd.f32 %v2557_v61, %v8229_v54  ;;  %v7728_v28 = vld [vmem:[%s10633_s0 + $0x230] ss:$28 sps:$4 sm:$0xff]   ;;  %v7729_v54 = vld [vmem:[%s10633_s0 + $0x238] ss:$28 sps:$4 sm:$0xff]  }
 0x1a9   :  { %v2559_v49 = vpop.f32.mrf.mxu0  ;;  %v7731_v57 = vld [vmem:[%s10633_s0 + $0x274] ss:$28 sps:$4 sm:$0xff]  }
 0x1aa   :  { %10700 = vst [vmem:[#allocation27_spill] sm:$0xff] %v8589_v8  ;;  %v2752_v33 = vpop.f32.mrf.mxu1  ;;  %v2751_v3 = vadd.f32 %v2750_v14, %v2558_v30  ;;  %v2560_v21 = vadd.f32 %v2559_v49, %v8235_v59  ;;  %v8593_v22 = vpack.c.bf16 %v3674_v36, %v3670_v51  ;;  %v3677_v59 = vmax.f32 %v2749_v44, 0.0 }
 0x1ab   :  { %v2561_v6 = vpop.f32.mrf.mxu0 }
 0x1ac   :  { %10701 = vst [vmem:[#allocation28_spill] sm:$0xff] %v8593_v22  ;;  %v2754_v34 = vpop.f32.mrf.mxu1  ;;  %v2753_v43 = vadd.f32 %v2752_v33, %v2560_v21  ;;  %v2562_v42 = vadd.f32 %v2561_v6, %v8238_v63  ;;  %v7730_v63 = vld [vmem:[%s10633_s0 + $0x26c] ss:$28 sps:$4 sm:$0xff]   ;;  %v3678_v51 = vmax.f32 %v2751_v3, 0.0 }
 0x1ad   :  { %v2565_v31 = vpop.f32.mrf.mxu0  ;;  %3030 = vmatmul.mubr.bf16.gmra.mxu0 %v7728_v28 }
 0x1ae   :  { %v2758_v27 = vpop.f32.mrf.mxu1  ;;  %3223 = vmatmul.mubr.bf16.gmra.mxu1 %v7729_v54  ;;  %v3681_v11 = vmax.f32 %v2753_v43, 0.0  ;;  %v2755_v48 = vadd.f32 %v2754_v34, %v2562_v42  ;;  %v2566_v39 = vadd.f32 %v2565_v31, %v8248_v5  ;;  %3039 = vmatprep.mubr.bf16.mxu0 %v7730_v63  ;;  %v7479_v5 = vld [vmem:[%s10636_s3 + $0x2e4] ss:$16 sps:$4 sm:$0xff]   ;;  %v7735_v63 = vld [vmem:[%s10633_s0 + $0x2ac] ss:$28 sps:$4 sm:$0xff]  }
 0x1af   :  { %3232 = vmatprep.mubr.bf16.mxu1 %v7731_v57  ;;  %v2567_v61 = vpop.f32.mrf.mxu0  ;;  %4844 = vmatprep.subr.bf16.mxu1 %v7479_v5 }
 0x1b0   :  { %v2760_v14 = vpop.f32.mrf.mxu1  ;;  %v8609_v36 = vpack.c.bf16 %v3681_v11, %v3677_v59  ;;  %v3682_v44 = vmax.f32 %v2755_v48, 0.0  ;;  %v2759_v30 = vadd.f32 %v2758_v27, %v2566_v39  ;;  %v2568_v49 = vadd.f32 %v2567_v61, %v8251_v10  ;;  %v7732_v10 = vld [vmem:[%s10633_s0 + $0x268] ss:$28 sps:$4 sm:$0xff]   ;;  %v7733_v59 = vld [vmem:[%s10633_s0 + $0x270] ss:$28 sps:$4 sm:$0xff]  }
 0x1b1   :  { %v2569_v33 = vpop.f32.mrf.mxu0 }
 0x1b2   :  { %10702 = vst [vmem:[#allocation29_spill] sm:$0xff] %v8609_v36  ;;  %v2762_v21 = vpop.f32.mrf.mxu1  ;;  %v2761_v6 = vadd.f32 %v2760_v14, %v2568_v49  ;;  %v2570_v34 = vadd.f32 %v2569_v33, %v8257_v16  ;;  %v8616_v43 = vpack.c.bf16 %v3682_v44, %v3678_v51  ;;  %v3685_v16 = vmax.f32 %v2759_v30, 0.0 }
 0x1b3   :  { %v2571_v3 = vpop.f32.mrf.mxu0 }
 0x1b4   :  { %10703 = vst [vmem:[#allocation30_spill] sm:$0xff] %v8616_v43  ;;  %v2764_v42 = vpop.f32.mrf.mxu1  ;;  %v2763_v31 = vadd.f32 %v2762_v21, %v2570_v34  ;;  %v2572_v28 = vadd.f32 %v2571_v3, %v8260_v23  ;;  %v7734_v23 = vld [vmem:[%s10633_s0 + $0x2a4] ss:$28 sps:$4 sm:$0xff]   ;;  %v3686_v57 = vmax.f32 %v2761_v6, 0.0 }
 0x1b5   :  { %v2575_v27 = vpop.f32.mrf.mxu0  ;;  %3040 = vmatmul.mubr.bf16.gmra.mxu0 %v7732_v10 }
 0x1b6   :  { %v2768_v54 = vpop.f32.mrf.mxu1  ;;  %3233 = vmatmul.mubr.bf16.gmra.mxu1 %v7733_v59  ;;  %v3689_v11 = vmax.f32 %v2763_v31, 0.0  ;;  %v2765_v48 = vadd.f32 %v2764_v42, %v2572_v28  ;;  %v2576_v39 = vadd.f32 %v2575_v27, %v8270_v29  ;;  %3049 = vmatprep.mubr.bf16.mxu0 %v7734_v23 }
 0x1b7   :  { %3242 = vmatprep.mubr.bf16.mxu1 %v7735_v63  ;;  %v2577_v51 = vpop.f32.mrf.mxu0 }
 0x1b8   :  { %v2770_v61 = vpop.f32.mrf.mxu1  ;;  %v8632_v14 = vpack.c.bf16 %v3689_v11, %v3685_v16  ;;  %v3690_v44 = vmax.f32 %v2765_v48, 0.0  ;;  %v2769_v30 = vadd.f32 %v2768_v54, %v2576_v39  ;;  %v2578_v49 = vadd.f32 %v2577_v51, %v8273_v35  ;;  %v7736_v54 = vld [vmem:[%s10633_s0 + $0x2a0] ss:$28 sps:$4 sm:$0xff]   ;;  %v7737_v35 = vld [vmem:[%s10633_s0 + $0x2a8] ss:$28 sps:$4 sm:$0xff]  }
 0x1b9   :  { %v2579_v29 = vpop.f32.mrf.mxu0  ;;  %v7739_v11 = vld [vmem:[%s10633_s0 + $0x2e4] ss:$28 sps:$4 sm:$0xff]  }
 0x1ba   :  { %10704 = vst [vmem:[#allocation31_spill] sm:$0xff] %v8632_v14  ;;  %v2772_v5 = vpop.f32.mrf.mxu1  ;;  %v2771_v33 = vadd.f32 %v2770_v61, %v2578_v49  ;;  %v2580_v21 = vadd.f32 %v2579_v29, %v8279_v41  ;;  %v8636_v34 = vpack.c.bf16 %v3690_v44, %v3686_v57  ;;  %v3693_v41 = vmax.f32 %v2769_v30, 0.0 }
 0x1bb   :  { %v2581_v3 = vpop.f32.mrf.mxu0 }
 0x1bc   :  { %10705 = vst [vmem:[#allocation32_spill] sm:$0xff] %v8636_v34  ;;  %v2774_v42 = vpop.f32.mrf.mxu1  ;;  %v2773_v31 = vadd.f32 %v2772_v5, %v2580_v21  ;;  %v2582_v6 = vadd.f32 %v2581_v3, %v8282_v46  ;;  %v7738_v46 = vld [vmem:[%s10633_s0 + $0x2dc] ss:$28 sps:$4 sm:$0xff]   ;;  %v3694_v48 = vmax.f32 %v2771_v33, 0.0 }
 0x1bd   :  { %v2585_v28 = vpop.f32.mrf.mxu0  ;;  %3050 = vmatmul.mubr.bf16.gmra.mxu0 %v7736_v54 }
 0x1be   :  { %v2778_v27 = vpop.f32.mrf.mxu1  ;;  %3243 = vmatmul.mubr.bf16.gmra.mxu1 %v7737_v35  ;;  %v3697_v10 = vmax.f32 %v2773_v31, 0.0  ;;  %v2775_v59 = vadd.f32 %v2774_v42, %v2582_v6  ;;  %v2586_v16 = vadd.f32 %v2585_v28, %v8286_v52  ;;  %3059 = vmatprep.mubr.bf16.mxu0 %v7738_v46  ;;  %v7740_v6 = vld [vmem:[%s10633_s0 + $0x2d8] ss:$28 sps:$4 sm:$0xff]  }
 0x1bf   :  { %3252 = vmatprep.mubr.bf16.mxu1 %v7739_v11  ;;  %v2587_v39 = vpop.f32.mrf.mxu0  ;;  %v7743_v35 = vld [vmem:[%s10633_s0 + $0x31c] ss:$28 sps:$4 sm:$0xff]  }
 0x1c0   :  { %v2780_v23 = vpop.f32.mrf.mxu1  ;;  %v8652_v63 = vpack.c.bf16 %v3697_v10, %v3693_v41  ;;  %v3698_v57 = vmax.f32 %v2775_v59, 0.0  ;;  %v2779_v51 = vadd.f32 %v2778_v27, %v2586_v16  ;;  %v2588_v61 = vadd.f32 %v2587_v39, %v8295_v60  ;;  %v7741_v60 = vld [vmem:[%s10633_s0 + $0x2e0] ss:$28 sps:$4 sm:$0xff]  }
 0x1c1   :  { %v2589_v52 = vpop.f32.mrf.mxu0 }
 0x1c2   :  { %10706 = vst [vmem:[#allocation33_spill] sm:$0xff] %v8652_v63  ;;  %v2782_v44 = vpop.f32.mrf.mxu1  ;;  %v2781_v30 = vadd.f32 %v2780_v23, %v2588_v61  ;;  %v2590_v49 = vadd.f32 %v2589_v52, %v8301_v2  ;;  %v8656_v29 = vpack.c.bf16 %v3698_v57, %v3694_v48  ;;  %v3701_v2 = vmax.f32 %v2779_v51, 0.0 }
 0x1c3   :  { %v2591_v5 = vpop.f32.mrf.mxu0 }
 0x1c4   :  { %10707 = vst [vmem:[#allocation34_spill] sm:$0xff] %v8656_v29  ;;  %v2784_v21 = vpop.f32.mrf.mxu1  ;;  %v2783_v3 = vadd.f32 %v2782_v44, %v2590_v49  ;;  %v2592_v33 = vadd.f32 %v2591_v5, %v8304_v7  ;;  %v7742_v7 = vld [vmem:[%s10633_s0 + $0x314] ss:$28 sps:$4 sm:$0xff]   ;;  %v3702_v41 = vmax.f32 %v2781_v30, 0.0 }
 0x1c5   :  { %v2595_v42 = vpop.f32.mrf.mxu0  ;;  %3060 = vmatmul.mubr.bf16.gmra.mxu0 %v7740_v6 }
 0x1c6   :  { %v2788_v31 = vpop.f32.mrf.mxu1  ;;  %3253 = vmatmul.mubr.bf16.gmra.mxu1 %v7741_v60  ;;  %v3705_v28 = vmax.f32 %v2783_v3, 0.0  ;;  %v2785_v27 = vadd.f32 %v2784_v21, %v2592_v33  ;;  %v2596_v54 = vadd.f32 %v2595_v42, %v8308_v13  ;;  %3069 = vmatprep.mubr.bf16.mxu0 %v7742_v7  ;;  %v7744_v21 = vld [vmem:[%s10633_s0 + $0x310] ss:$28 sps:$4 sm:$0xff]  }
 0x1c7   :  { %3262 = vmatprep.mubr.bf16.mxu1 %v7743_v35  ;;  %v2597_v10 = vpop.f32.mrf.mxu0 }
 0x1c8   :  { %v2790_v59 = vpop.f32.mrf.mxu1  ;;  %v8672_v16 = vpack.c.bf16 %v3705_v28, %v3701_v2  ;;  %v3706_v46 = vmax.f32 %v2785_v27, 0.0  ;;  %v2789_v11 = vadd.f32 %v2788_v31, %v2596_v54  ;;  %v2598_v48 = vadd.f32 %v2597_v10, %v8317_v25  ;;  %v7745_v25 = vld [vmem:[%s10633_s0 + $0x318] ss:$28 sps:$4 sm:$0xff]  }
 0x1c9   :  { %v2599_v13 = vpop.f32.mrf.mxu0  ;;  %v7747_v31 = vld [vmem:[%s10633_s0 + $0x354] ss:$28 sps:$4 sm:$0xff]  }
 0x1ca   :  { %10708 = vst [vmem:[#allocation35_spill] sm:$0xff] %v8672_v16  ;;  %v2792_v39 = vpop.f32.mrf.mxu1  ;;  %v2791_v23 = vadd.f32 %v2790_v59, %v2598_v48  ;;  %v2600_v57 = vadd.f32 %v2599_v13, %v8323_v32  ;;  %v8676_v51 = vpack.c.bf16 %v3706_v46, %v3702_v41  ;;  %v3709_v32 = vmax.f32 %v2789_v11, 0.0 }
 0x1cb   :  { %v2601_v61 = vpop.f32.mrf.mxu0 }
 0x1cc   :  { %10709 = vst [vmem:[#allocation36_spill] sm:$0xff] %v8676_v51  ;;  %v2794_v52 = vpop.f32.mrf.mxu1  ;;  %v2793_v44 = vadd.f32 %v2792_v39, %v2600_v57  ;;  %v2602_v30 = vadd.f32 %v2601_v61, %v8326_v38  ;;  %v7746_v38 = vld [vmem:[%s10633_s0 + $0x34c] ss:$28 sps:$4 sm:$0xff]   ;;  %v3710_v6 = vmax.f32 %v2791_v23, 0.0 }
 0x1cd   :  { %v2605_v49 = vpop.f32.mrf.mxu0  ;;  %3070 = vmatmul.mubr.bf16.gmra.mxu0 %v7744_v21  ;;  %v7748_v57 = vld [vmem:[%s10633_s0 + $0x348] ss:$28 sps:$4 sm:$0xff]  }
 0x1ce   :  { %v2798_v5 = vpop.f32.mrf.mxu1  ;;  %3263 = vmatmul.mubr.bf16.gmra.mxu1 %v7745_v25  ;;  %v3713_v3 = vmax.f32 %v2793_v44, 0.0  ;;  %v2795_v33 = vadd.f32 %v2794_v52, %v2602_v30  ;;  %v2606_v42 = vadd.f32 %v2605_v49, %v8330_v45  ;;  %3079 = vmatprep.mubr.bf16.mxu0 %v7746_v38  ;;  %v10712_v30 = vmov 0  }
 0x1cf   :  { %3272 = vmatprep.mubr.bf16.mxu1 %v7747_v31  ;;  %v2607_v60 = vpop.f32.mrf.mxu0 }
 0x1d0   :  { %v2800_v2 = vpop.f32.mrf.mxu1  ;;  %v8692_v28 = vpack.c.bf16 %v3713_v3, %v3709_v32  ;;  %v3714_v27 = vmax.f32 %v2795_v33, 0.0  ;;  %v2799_v54 = vadd.f32 %v2798_v5, %v2606_v42  ;;  %v2608_v7 = vadd.f32 %v2607_v60, %v8339_v56  ;;  %v7749_v56 = vld [vmem:[%s10633_s0 + $0x350] ss:$28 sps:$4 sm:$0xff]  }
 0x1d1   :  { %v2609_v45 = vpop.f32.mrf.mxu0 }
 0x1d2   :  { %10710 = vst [vmem:[#allocation37_spill] sm:$0xff] %v8692_v28  ;;  %v2802_v35 = vpop.f32.mrf.mxu1  ;;  %v2801_v41 = vadd.f32 %v2800_v2, %v2608_v7  ;;  %v2610_v10 = vadd.f32 %v2609_v45, %v8342_v62  ;;  %v8696_v59 = vpack.c.bf16 %v3714_v27, %v3710_v6  ;;  %v3717_v62 = vmax.f32 %v2799_v54, 0.0  ;;  %v7462_v27 = vld [vmem:[%s10636_s3 + $0xe0] ss:$16 sps:$4 sm:$0xff]   ;;  %v7467_v45 = vld [vmem:[%s10636_s3 + $0xc4] ss:$16 sps:$4 sm:$0xff]  }
 0x1d3   :  { %v2611_v46 = vpop.f32.mrf.mxu0  ;;  %v7477_v54 = vld [vmem:[%s10636_s3 + $0x2e0] ss:$16 sps:$4 sm:$0xff]  }
 0x1d4   :  { %10711 = vst [vmem:[#allocation38_spill] sm:$0xff] %v8696_v59  ;;  %v2804_v11 = vpop.f32.mrf.mxu1  ;;  %v2803_v48 = vadd.f32 %v2802_v35, %v2610_v10  ;;  %v2612_v13 = vadd.f32 %v2611_v46, %v8345_v4  ;;  %v7750_v4 = vld [vmem:[%s10633_s0 + $0x14] ss:$28 sps:$4 sm:$0xff]   ;;  %v3718_v49 = vmax.f32 %v2801_v41, 0.0 }
 0x1d5   :  { %v2615_v39 = vpop.f32.mrf.mxu0  ;;  %3080 = vmatmul.mubr.bf16.gmra.mxu0 %v7748_v57  ;;  %v7751_v10 = vld [vmem:[%s10633_s0 + $0x10] ss:$28 sps:$4 sm:$0xff]   ;;  %v7752_v46 = vld [vmem:[%s10633_s0 + $0x18] ss:$28 sps:$4 sm:$0xff]  }
 0x1d6   :  { %v2808_v23 = vpop.f32.mrf.mxu1  ;;  %3273 = vmatmul.mubr.bf16.gmra.mxu1 %v7749_v56  ;;  %v3721_v61 = vmax.f32 %v2803_v48, 0.0  ;;  %v2805_v52 = vadd.f32 %v2804_v11, %v2612_v13  ;;  %v2616_v44 = vadd.f32 %v2615_v39, %v8354_v18  ;;  %3315 = vmatprep.mubr.bf16.mxu0 %v7750_v4  ;;  %v7753_v39 = vld [vmem:[%s10633_s0 + $0x4c] ss:$28 sps:$4 sm:$0xff]  }
 0x1d7   :  { %3508 = vmatprep.mubr.bf16.mxu1 %v10712_v30  ;;  %v2617_v5 = vpop.f32.mrf.mxu0 }
 0x1d8   :  { %v2810_v21 = vpop.f32.mrf.mxu1  ;;  %v8710_v25 = vpack.c.bf16 %v3721_v61, %v3717_v62  ;;  %v3722_v32 = vmax.f32 %v2805_v52, 0.0  ;;  %v2809_v3 = vadd.f32 %v2808_v23, %v2616_v44  ;;  %v2618_v33 = vadd.f32 %v2617_v5, %v8357_v26  ;;  %v7465_v62 = vld [vmem:[%s10636_s3 + $0xc0] ss:$16 sps:$4 sm:$0xff]   ;;  %v7497_v5 = vld [vmem:[%s10636_s3 + $0x2a4] ss:$16 sps:$4 sm:$0xff]  }
 0x1d9   :  { %v2619_v42 = vpop.f32.mrf.mxu0 }
 0x1da   :  { %10713 = vst [vmem:[#allocation39_spill] sm:$0xff] %v8710_v25  ;;  %v2812_v38 = vpop.f32.mrf.mxu1  ;;  %v2811_v31 = vadd.f32 %v2810_v21, %v2618_v33  ;;  %v2620_v18 = vadd.f32 %v2619_v42, %v8360_v37  ;;  %v8714_v6 = vpack.c.bf16 %v3722_v32, %v3718_v49  ;;  %v7488_v37 = vld [vmem:[%s10636_s3 + $0x2c4] ss:$16 sps:$4 sm:$0xff]  }
 0x1db   :  { %v2621_v60 = vpop.f32.mrf.mxu0  ;;  %v7470_v49 = vld [vmem:[%s10636_s3 + $0xa4] ss:$16 sps:$4 sm:$0xff]  }
 0x1dc   :  { %10714 = vst [vmem:[#allocation40_spill] sm:$0xff] %v8714_v6  ;;  %v2814_v2 = vpop.f32.mrf.mxu1  ;;  %v2813_v7 = vadd.f32 %v2812_v38, %v2620_v18  ;;  %v2622_v26 = vadd.f32 %v2621_v60, %v8369_v55  ;;  %v3725_v55 = vmax.f32 %v2809_v3, 0.0  ;;  %v3726_v23 = vmax.f32 %v2811_v31, 0.0  ;;  %v7495_v18 = vld [vmem:[%s10636_s3 + $0x2a0] ss:$16 sps:$4 sm:$0xff]  }
 0x1dd   :  { %v2625_v35 = vpop.f32.mrf.mxu0  ;;  %3316 = vmatmul.mubr.bf16.vlgmr.msra.gmra.mxu0 %v7751_v10  ;;  %v7756_v10 = vld [vmem:[%s10633_s0 + $0x84] ss:$28 sps:$4 sm:$0xff]  }
 0x1de   :  { %v2818_v41 = vpop.f32.mrf.mxu1  ;;  %3509 = vmatmul.mubr.bf16.vlgmr.msra.gmra.mxu1 %v7752_v46  ;;  %v3729_v11 = vmax.f32 %v2813_v7, 0.0  ;;  %v2815_v48 = vadd.f32 %v2814_v2, %v2622_v26  ;;  %v2626_v13 = vadd.f32 %v2625_v35, %v8378_v12  ;;  %3325 = vmatprep.mubr.bf16.mxu0 %v7753_v39  ;;  %v7486_v12 = vld [vmem:[%s10636_s3 + $0x2c0] ss:$16 sps:$4 sm:$0xff]   ;;  %v7754_v26 = vld [vmem:[%s10633_s0 + $0x48] ss:$28 sps:$4 sm:$0xff]  }
 0x1df   :  { %3518 = vmatprep.mubr.bf16.mxu1 %v10712_v30  ;;  %v2627_v57 = vpop.f32.mrf.mxu0  ;;  %4652 = vmatpush1.bf16.msra.mxu0 %v7462_v27  ;;  %v7506_v27 = vld [vmem:[%s10636_s3 + $0x284] ss:$16 sps:$4 sm:$0xff]  }
 0x1e0   :  { %v2820_v56 = vpop.f32.mrf.mxu1  ;;  %4845 = vmatpush1.bf16.msra.mxu1 %v7477_v54  ;;  %v8746_v61 = vpack.c.bf16 %v3729_v11, %v3725_v55  ;;  %v3730_v52 = vmax.f32 %v2815_v48, 0.0  ;;  %v2819_v44 = vadd.f32 %v2818_v41, %v2626_v13  ;;  %v2628_v4 = vadd.f32 %v2627_v57, %v8381_v24  ;;  %4653 = vmatprep.subr.bf16.mxu0 %v7467_v45  ;;  %v7468_v24 = vld [vmem:[%s10636_s3 + $0xa0] ss:$16 sps:$4 sm:$0xff]  }
 0x1e1   :  { %4846 = vmatprep.subr.bf16.mxu1 %v7488_v37  ;;  %v2629_v21 = vpop.f32.mrf.mxu0  ;;  %v7471_v48 = vld [vmem:[%s10636_s3 + $0x80] ss:$16 sps:$4 sm:$0xff]  }
 0x1e2   :  { %10715 = vst [vmem:[#allocation41_spill] sm:$0xff] %v8746_v61  ;;  %v2822_v32 = vpop.f32.mrf.mxu1  ;;  %v2821_v3 = vadd.f32 %v2820_v56, %v2628_v4  ;;  %v2630_v33 = vadd.f32 %v2629_v21, %v8384_v40  ;;  %v8756_v42 = vpack.c.bf16 %v3730_v52, %v3726_v23  ;;  %v7473_v40 = vld [vmem:[%s10636_s3 + $0x84] ss:$16 sps:$4 sm:$0xff]   ;;  %v3733_v45 = vmax.f32 %v2819_v44, 0.0 }
 0x1e3   :  { %v2631_v38 = vpop.f32.mrf.mxu0  ;;  %4654 = vmatpush1.bf16.msra.mxu0 %v7465_v62  ;;  %v7476_v56 = vld [vmem:[%s10636_s3 + $0x64] ss:$16 sps:$4 sm:$0xff]  }
 0x1e4   :  { %10716 = vst [vmem:[#allocation42_spill] sm:$0xff] %v8756_v42  ;;  %v2824_v31 = vpop.f32.mrf.mxu1  ;;  %4847 = vmatpush1.bf16.msra.mxu1 %v7486_v12  ;;  %v2823_v60 = vadd.f32 %v2822_v32, %v2630_v33  ;;  %v2632_v2 = vadd.f32 %v2631_v38, %v8393_v58  ;;  %4655 = vmatprep.subr.bf16.mxu0 %v7470_v49  ;;  %v7755_v58 = vld [vmem:[%s10633_s0 + $0x50] ss:$28 sps:$4 sm:$0xff]   ;;  %v3734_v46 = vmax.f32 %v2821_v3, 0.0  ;;  %v7515_v62 = vld [vmem:[%s10636_s3 + $0x264] ss:$16 sps:$4 sm:$0xff]  }
 0x1e5   :  { %4848 = vmatprep.subr.bf16.mxu1 %v7497_v5  ;;  %v2635_v54 = vpop.f32.mrf.mxu0  ;;  %3326 = vmatmul.mubr.bf16.gmra.mxu0 %v7754_v26  ;;  %v7513_v32 = vld [vmem:[%s10636_s3 + $0x260] ss:$16 sps:$4 sm:$0xff]   ;;  %v7524_v38 = vld [vmem:[%s10636_s3 + $0x244] ss:$16 sps:$4 sm:$0xff]  }
 0x1e6   :  { %v2828_v7 = vpop.f32.mrf.mxu1  ;;  %3519 = vmatmul.mubr.bf16.gmra.mxu1 %v7755_v58  ;;  %v3737_v37 = vmax.f32 %v2823_v60, 0.0  ;;  %v2825_v35 = vadd.f32 %v2824_v31, %v2632_v2  ;;  %v2636_v41 = vadd.f32 %v2635_v54, %v8402_v15  ;;  %3335 = vmatprep.mubr.bf16.mxu0 %v7756_v10  ;;  %v7504_v15 = vld [vmem:[%s10636_s3 + $0x280] ss:$16 sps:$4 sm:$0xff]   ;;  %v7759_v54 = vld [vmem:[%s10633_s0 + $0xbc] ss:$28 sps:$4 sm:$0xff]  }
 0x1e7   :  { %3528 = vmatprep.mubr.bf16.mxu1 %v10712_v30  ;;  %v2637_v55 = vpop.f32.mrf.mxu0  ;;  %4656 = vmatpush1.bf16.msra.mxu0 %v7468_v24 }
 0x1e8   :  { %v2830_v11 = vpop.f32.mrf.mxu1  ;;  %4849 = vmatpush1.bf16.msra.mxu1 %v7495_v18  ;;  %v8788_v13 = vpack.c.bf16 %v3737_v37, %v3733_v45  ;;  %v3738_v39 = vmax.f32 %v2825_v35, 0.0  ;;  %v2829_v23 = vadd.f32 %v2828_v7, %v2636_v41  ;;  %v2638_v57 = vadd.f32 %v2637_v55, %v8405_v47  ;;  %4657 = vmatprep.subr.bf16.mxu0 %v7473_v40  ;;  %v7474_v47 = vld [vmem:[%s10636_s3 + $0x60] ss:$16 sps:$4 sm:$0xff]   ;;  %v7530_v55 = vld [vmem:[%s10636_s3 + $0x224] ss:$16 sps:$4 sm:$0xff]  }
 0x1e9   :  { %4850 = vmatprep.subr.bf16.mxu1 %v7506_v27  ;;  %v2639_v12 = vpop.f32.mrf.mxu0  ;;  %v7757_v18 = vld [vmem:[%s10633_s0 + $0x80] ss:$28 sps:$4 sm:$0xff]  }
 0x1ea   :  { %10717 = vst [vmem:[#allocation43_spill] sm:$0xff] %v8788_v13  ;;  %v2832_v52 = vpop.f32.mrf.mxu1  ;;  %v2831_v44 = vadd.f32 %v2830_v11, %v2638_v57  ;;  %v2640_v4 = vadd.f32 %v2639_v12, %v8408_v50  ;;  %v8798_v49 = vpack.c.bf16 %v3738_v39, %v3734_v46  ;;  %v7482_v50 = vld [vmem:[%s10636_s3 + $0x44] ss:$16 sps:$4 sm:$0xff]   ;;  %v3741_v60 = vmax.f32 %v2829_v23, 0.0  ;;  %v7480_v45 = vld [vmem:[%s10636_s3 + $0x40] ss:$16 sps:$4 sm:$0xff]  }
 0x1eb   :  { %v2641_v5 = vpop.f32.mrf.mxu0  ;;  %4658 = vmatpush1.bf16.msra.mxu0 %v7471_v48  ;;  %v7485_v46 = vld [vmem:[%s10636_s3 + $0x24] ss:$16 sps:$4 sm:$0xff]  }
 0x1ec   :  { %10718 = vst [vmem:[#allocation44_spill] sm:$0xff] %v8798_v49  ;;  %v2834_v21 = vpop.f32.mrf.mxu1  ;;  %4851 = vmatpush1.bf16.msra.mxu1 %v7504_v15  ;;  %v2833_v3 = vadd.f32 %v2832_v52, %v2640_v4  ;;  %v2642_v33 = vadd.f32 %v2641_v5, %v8417_v9  ;;  %4659 = vmatprep.subr.bf16.mxu0 %v7476_v56  ;;  %v7758_v9 = vld [vmem:[%s10633_s0 + $0x88] ss:$28 sps:$4 sm:$0xff]   ;;  %v3742_v7 = vmax.f32 %v2831_v44, 0.0 }
 0x1ed   :  { %4852 = vmatprep.subr.bf16.mxu1 %v7515_v62  ;;  %v2645_v31 = vpop.f32.mrf.mxu0  ;;  %3336 = vmatmul.mubr.bf16.gmra.mxu0 %v7757_v18  ;;  %v7528_v62 = vld [vmem:[%s10636_s3 + $0x220] ss:$16 sps:$4 sm:$0xff]   ;;  %v10720_v52 = vld [vmem:[#allocation9_spill] sm:$0xff]  ;;  %v7533_v4 = vld [vmem:[%s10636_s3 + $0x204] ss:$16 sps:$4 sm:$0xff]  }
 0x1ee   :  { %v2838_v24 = vpop.f32.mrf.mxu1  ;;  %3529 = vmatmul.mubr.bf16.gmra.mxu1 %v7758_v9  ;;  %v3745_v2 = vmax.f32 %v2833_v3, 0.0  ;;  %v2835_v40 = vadd.f32 %v2834_v21, %v2642_v33  ;;  %v2646_v27 = vadd.f32 %v2645_v31, %v8426_v53  ;;  %3345 = vmatprep.mubr.bf16.mxu0 %v7759_v54  ;;  %v7522_v53 = vld [vmem:[%s10636_s3 + $0x240] ss:$16 sps:$4 sm:$0xff]  }
 0x1ef   :  { %3538 = vmatprep.mubr.bf16.mxu1 %v10712_v30  ;;  %v2647_v26 = vpop.f32.mrf.mxu0  ;;  %4660 = vmatpush1.bf16.msra.mxu0 %v7474_v47  ;;  %v7760_v47 = vld [vmem:[%s10633_s0 + $0xb8] ss:$28 sps:$4 sm:$0xff]  }
 0x1f0   :  { %v2840_v58 = vpop.f32.mrf.mxu1  ;;  %4853 = vmatpush1.bf16.msra.mxu1 %v7513_v32  ;;  %v8830_v37 = vpack.c.bf16 %v3745_v2, %v3741_v60  ;;  %v3746_v35 = vmax.f32 %v2835_v40, 0.0  ;;  %v2839_v41 = vadd.f32 %v2838_v24, %v2646_v27  ;;  %v2648_v10 = vadd.f32 %v2647_v26, %v8429_v19  ;;  %4661 = vmatprep.subr.bf16.mxu0 %v7482_v50  ;;  %v7483_v19 = vld [vmem:[%s10636_s3 + $0x20] ss:$16 sps:$4 sm:$0xff]   ;;  %v7494_v26 = vld [vmem:[%s10636_s3 + $0x1e4] ss:$16 sps:$4 sm:$0xff]  }
 0x1f1   :  { %4854 = vmatprep.subr.bf16.mxu1 %v7524_v38  ;;  %v2649_v11 = vpop.f32.mrf.mxu0  ;;  %v7761_v32 = vld [vmem:[%s10633_s0 + $0xc0] ss:$28 sps:$4 sm:$0xff]   ;;  %v7762_v31 = vld [vmem:[%s10633_s0 + $0xf4] ss:$28 sps:$4 sm:$0xff]  }
 0x1f2   :  { %v2842_v48 = vpop.f32.mrf.mxu1  ;;  %v2841_v15 = vadd.f32 %v2840_v58, %v2648_v10  ;;  %v2650_v39 = vadd.f32 %v2649_v11, %v8432_v1  ;;  %v8840_v23 = vpack.c.bf16 %v3746_v35, %v3742_v7  ;;  %v7491_v1 = vld [vmem:[%s10636_s3 + $0x4] ss:$16 sps:$4 sm:$0xff]   ;;  %v3749_v3 = vmax.f32 %v2839_v41, 0.0  ;;  %v7489_v60 = vld [vmem:[%s10636_s3] ss:$16 sps:$4 sm:$0xff]   ;;  %v10722_v41 = vld [vmem:[#allocation11_spill] sm:$0xff] }
 0x1f3   :  { %v2651_v57 = vpop.f32.mrf.mxu0  ;;  %4662 = vmatpush1.bf16.msra.mxu0 %v7480_v45  ;;  %v10721_v54 = vld [vmem:[#allocation10_spill] sm:$0xff] }
 0x1f4   :  { %10719 = vst [vmem:[#allocation45_spill] sm:$0xff] %v8840_v23  ;;  %v2844_v56 = vpop.f32.mrf.mxu1  ;;  %4855 = vmatpush1.bf16.msra.mxu1 %v7522_v53  ;;  %v2843_v12 = vadd.f32 %v2842_v48, %v2650_v39  ;;  %v2652_v44 = vadd.f32 %v2651_v57, %v10720_v52  ;;  %4663 = vmatprep.subr.bf16.mxu0 %v7485_v46  ;;  %v3750_v24 = vmax.f32 %v2841_v15, 0.0  ;;  %v7536_v58 = vld [vmem:[%s10636_s3 + $0x3e4] ss:$16 sps:$4 sm:$0xff]   ;;  %v7492_v48 = vld [vmem:[%s10636_s3 + $0x1e0] ss:$16 sps:$4 sm:$0xff]  }
 0x1f5   :  { %4856 = vmatprep.subr.bf16.mxu1 %v7530_v55  ;;  %v2655_v5 = vpop.f32.mrf.mxu0  ;;  %3346 = vmatmul.mubr.bf16.gmra.mxu0 %v7760_v47  ;;  %v7534_v15 = vld [vmem:[%s10636_s3 + $0x3e0] ss:$16 sps:$4 sm:$0xff]   ;;  %v10724_v47 = vld [vmem:[#allocation13_spill] sm:$0xff] }
 0x1f6   :  { %v2848_v21 = vpop.f32.mrf.mxu1  ;;  %3539 = vmatmul.mubr.bf16.gmra.mxu1 %v7761_v32  ;;  %v3753_v33 = vmax.f32 %v2843_v12, 0.0  ;;  %v2845_v50 = vadd.f32 %v2844_v56, %v2652_v44  ;;  %v2656_v38 = vadd.f32 %v2655_v5, %v8450_v17  ;;  %3355 = vmatprep.mubr.bf16.mxu0 %v7762_v31  ;;  %v7531_v17 = vld [vmem:[%s10636_s3 + $0x200] ss:$16 sps:$4 sm:$0xff]  }
 0x1f7   :  { %3548 = vmatprep.mubr.bf16.mxu1 %v10712_v30  ;;  %v2657_v18 = vpop.f32.mrf.mxu0  ;;  %4664 = vmatpush1.bf16.msra.mxu0 %v7483_v19  ;;  %v10723_v57 = vld [vmem:[#allocation12_spill] sm:$0xff]  ;;  %v7763_v44 = vld [vmem:[%s10633_s0 + $0xf0] ss:$28 sps:$4 sm:$0xff]  }
 0x1f8   :  { %v2850_v9 = vpop.f32.mrf.mxu1  ;;  %4857 = vmatpush1.bf16.msra.mxu1 %v7528_v62  ;;  %v8872_v2 = vpack.c.bf16 %v3753_v33, %v3749_v3  ;;  %v3754_v40 = vmax.f32 %v2845_v50, 0.0  ;;  %v2849_v27 = vadd.f32 %v2848_v21, %v2656_v38  ;;  %v2658_v7 = vadd.f32 %v2657_v18, %v10721_v54  ;;  %4665 = vmatprep.subr.bf16.mxu0 %v7491_v1  ;;  %v7500_v19 = vld [vmem:[%s10636_s3 + $0x1c4] ss:$16 sps:$4 sm:$0xff]   ;;  %v7765_v3 = vld [vmem:[%s10633_s0 + $0x12c] ss:$28 sps:$4 sm:$0xff]  }
 0x1f9   :  { %4858 = vmatprep.subr.bf16.mxu1 %v7533_v4  ;;  %v2659_v45 = vpop.f32.mrf.mxu0  ;;  %v7539_v62 = vld [vmem:[%s10636_s3 + $0x3c4] ss:$16 sps:$4 sm:$0xff]   ;;  %v7498_v31 = vld [vmem:[%s10636_s3 + $0x1c0] ss:$16 sps:$4 sm:$0xff]  }
 0x1fa   :  { %v2852_v53 = vpop.f32.mrf.mxu1  ;;  %v2851_v35 = vadd.f32 %v2850_v9, %v2658_v7  ;;  %v2660_v10 = vadd.f32 %v2659_v45, %v10722_v41  ;;  %v8882_v46 = vpack.c.bf16 %v3754_v40, %v3750_v24  ;;  %v7764_v1 = vld [vmem:[%s10633_s0 + $0xf8] ss:$28 sps:$4 sm:$0xff]   ;;  %v3757_v4 = vmax.f32 %v2849_v27, 0.0  ;;  %v7537_v24 = vld [vmem:[%s10636_s3 + $0x3c0] ss:$16 sps:$4 sm:$0xff]  }
 0x1fb   :  { %v2661_v55 = vpop.f32.mrf.mxu0  ;;  %4666 = vmatpush1.bf16.msra.mxu0 %v7489_v60  ;;  %v7503_v27 = vld [vmem:[%s10636_s3 + $0x1a4] ss:$16 sps:$4 sm:$0xff]   ;;  %v10726_v45 = vld [vmem:[#allocation15_spill] sm:$0xff] }
 0x1fc   :  { %v2854_v11 = vpop.f32.mrf.mxu1  ;;  %4859 = vmatpush1.bf16.msra.mxu1 %v7531_v17  ;;  %v2853_v39 = vadd.f32 %v2852_v53, %v2660_v10  ;;  %v2662_v56 = vadd.f32 %v2661_v55, %v10723_v57  ;;  %4667 = vmatprep.subr.bf16.mxu0 %v7494_v26  ;;  %v3758_v33 = vmax.f32 %v2851_v35, 0.0  ;;  %v10725_v17 = vld [vmem:[#allocation14_spill] sm:$0xff] }
 0x1fd   :  { %4860 = vmatprep.subr.bf16.mxu1 %v7536_v58  ;;  %v2665_v12 = vpop.f32.mrf.mxu0  ;;  %3356 = vmatmul.mubr.bf16.gmra.mxu0 %v7763_v44  ;;  %v7542_v54 = vld [vmem:[%s10636_s3 + $0x3a4] ss:$16 sps:$4 sm:$0xff]   ;;  %v7501_v55 = vld [vmem:[%s10636_s3 + $0x1a0] ss:$16 sps:$4 sm:$0xff]  }
 0x1fe   :  { %v2858_v52 = vpop.f32.mrf.mxu1  ;;  %3549 = vmatmul.mubr.bf16.gmra.mxu1 %v7764_v1  ;;  %v3761_v5 = vmax.f32 %v2853_v39, 0.0  ;;  %v2855_v21 = vadd.f32 %v2854_v11, %v2662_v56  ;;  %v2666_v32 = vadd.f32 %v2665_v12, %v10724_v47  ;;  %3365 = vmatprep.mubr.bf16.mxu0 %v7765_v3  ;;  %v7540_v11 = vld [vmem:[%s10636_s3 + $0x3a0] ss:$16 sps:$4 sm:$0xff]   ;;  %v7509_v57 = vld [vmem:[%s10636_s3 + $0x184] ss:$16 sps:$4 sm:$0xff]  }
 0x1ff   :  { %3558 = vmatprep.mubr.bf16.mxu1 %v10712_v30  ;;  %v2667_v50 = vpop.f32.mrf.mxu0  ;;  %4668 = vmatpush2.bf16.msra.mxu0 %v7492_v48  ;;  %v7767_v12 = vld [vmem:[%s10633_s0 + $0x130] ss:$28 sps:$4 sm:$0xff]  }
 0x200   :  { %v2860_v38 = vpop.f32.mrf.mxu1  ;;  %4861 = vmatpush2.bf16.msra.mxu1 %v7534_v15  ;;  %v8914_v18 = vpack.c.bf16 %v3761_v5, %v3757_v4  ;;  %v3762_v9 = vmax.f32 %v2855_v21, 0.0  ;;  %v2859_v60 = vadd.f32 %v2858_v52, %v2666_v32  ;;  %v2668_v40 = vadd.f32 %v2667_v50, %v10725_v17  ;;  %4669 = vmatprep.subr.bf16.mxu0 %v7500_v19  ;;  %v10727_v15 = vld [vmem:[#allocation16_spill] sm:$0xff]  ;;  %v10728_v4 = vld [vmem:[#allocation17_spill] sm:$0xff] }
 0x201   :  { %4862 = vmatprep.subr.bf16.mxu1 %v7539_v62  ;;  %v2669_v7 = vpop.f32.mrf.mxu0  ;;  %v7766_v62 = vld [vmem:[%s10633_s0 + $0x128] ss:$28 sps:$4 sm:$0xff]   ;;  %v7543_v17 = vld [vmem:[%s10636_s3 + $0x380] ss:$16 sps:$4 sm:$0xff]  }
 0x202   :  { %v2862_v26 = vpop.f32.mrf.mxu1  ;;  %v2861_v58 = vadd.f32 %v2860_v38, %v2668_v40  ;;  %v2670_v53 = vadd.f32 %v2669_v7, %v10726_v45  ;;  %v8924_v35 = vpack.c.bf16 %v3762_v9, %v3758_v33  ;;  %v3765_v52 = vmax.f32 %v2859_v60, 0.0  ;;  %v7768_v21 = vld [vmem:[%s10633_s0 + $0x164] ss:$28 sps:$4 sm:$0xff]   ;;  %v10729_v9 = vld [vmem:[#allocation18_spill] sm:$0xff] }
 0x203   :  { %v2671_v41 = vpop.f32.mrf.mxu0  ;;  %4670 = vmatpush2.bf16.msra.mxu0 %v7498_v31  ;;  %v7507_v33 = vld [vmem:[%s10636_s3 + $0x180] ss:$16 sps:$4 sm:$0xff]   ;;  %v7512_v50 = vld [vmem:[%s10636_s3 + $0x164] ss:$16 sps:$4 sm:$0xff]  }
 0x204   :  { %v2864_v10 = vpop.f32.mrf.mxu1  ;;  %4863 = vmatpush2.bf16.msra.mxu1 %v7537_v24  ;;  %v2863_v48 = vadd.f32 %v2862_v26, %v2670_v53  ;;  %v2672_v39 = vadd.f32 %v2671_v41, %v10727_v15  ;;  %4671 = vmatprep.subr.bf16.mxu0 %v7503_v27  ;;  %v3766_v47 = vmax.f32 %v2861_v58, 0.0  ;;  %v7545_v40 = vld [vmem:[%s10636_s3 + $0x384] ss:$16 sps:$4 sm:$0xff]   ;;  %v10730_v26 = vld [vmem:[#allocation19_spill] sm:$0xff] }
 0x205   :  { %4864 = vmatprep.subr.bf16.mxu1 %v7542_v54  ;;  %v2675_v56 = vpop.f32.mrf.mxu0  ;;  %3366 = vmatmul.mubr.bf16.gmra.mxu0 %v7766_v62  ;;  %v7518_v15 = vld [vmem:[%s10636_s3 + $0x144] ss:$16 sps:$4 sm:$0xff]  }
 0x206   :  { %v2868_v19 = vpop.f32.mrf.mxu1  ;;  %3559 = vmatmul.mubr.bf16.gmra.mxu1 %v7767_v12  ;;  %v3769_v44 = vmax.f32 %v2863_v48, 0.0  ;;  %v2865_v1 = vadd.f32 %v2864_v10, %v2672_v39  ;;  %v2676_v5 = vadd.f32 %v2675_v56, %v10728_v4  ;;  %3375 = vmatprep.mubr.bf16.mxu0 %v7768_v21  ;;  %v7510_v10 = vld [vmem:[%s10636_s3 + $0x160] ss:$16 sps:$4 sm:$0xff]  }
 0x207   :  { %3568 = vmatprep.mubr.bf16.mxu1 %v10712_v30  ;;  %v2677_v32 = vpop.f32.mrf.mxu0  ;;  %4672 = vmatpush2.bf16.msra.mxu0 %v7501_v55  ;;  %v7769_v56 = vld [vmem:[%s10633_s0 + $0x160] ss:$28 sps:$4 sm:$0xff]  }
 0x208   :  { %v2870_v3 = vpop.f32.mrf.mxu1  ;;  %4865 = vmatpush2.bf16.msra.mxu1 %v7540_v11  ;;  %v8953_v38 = vpack.c.bf16 %v3769_v44, %v3765_v52  ;;  %v3770_v31 = vmax.f32 %v2865_v1, 0.0  ;;  %v2869_v24 = vadd.f32 %v2868_v19, %v2676_v5  ;;  %v2678_v60 = vadd.f32 %v2677_v32, %v10729_v9  ;;  %4673 = vmatprep.subr.bf16.mxu0 %v7509_v57  ;;  %v10731_v11 = vld [vmem:[#allocation20_spill] sm:$0xff]  ;;  %v7771_v1 = vld [vmem:[%s10633_s0 + $0x19c] ss:$28 sps:$4 sm:$0xff]  }
 0x209   :  { %v2679_v27 = vpop.f32.mrf.mxu0  ;;  %4866 = vmatprep.subr.bf16.mxu1 %v7545_v40  ;;  %v7770_v19 = vld [vmem:[%s10633_s0 + $0x168] ss:$28 sps:$4 sm:$0xff]  }
 0x20a   :  { %v2872_v54 = vpop.f32.mrf.mxu1  ;;  %v2871_v7 = vadd.f32 %v2870_v3, %v2678_v60  ;;  %v2680_v58 = vadd.f32 %v2679_v27, %v10730_v26  ;;  %v8963_v45 = vpack.c.bf16 %v3770_v31, %v3766_v47  ;;  %v3773_v62 = vmax.f32 %v2869_v24, 0.0  ;;  %v7516_v47 = vld [vmem:[%s10636_s3 + $0x140] ss:$16 sps:$4 sm:$0xff]   ;;  %v7521_v32 = vld [vmem:[%s10636_s3 + $0x124] ss:$16 sps:$4 sm:$0xff]   ;;  %v10733_v40 = vld [vmem:[#allocation21_spill] sm:$0xff] }
 0x20b   :  { %v2681_v53 = vpop.f32.mrf.mxu0  ;;  %4674 = vmatpush2.bf16.msra.mxu0 %v7507_v33  ;;  %v7546_v31 = vld [vmem:[%s10636_s3 + $0x360] ss:$16 sps:$4 sm:$0xff]   ;;  %v7548_v24 = vld [vmem:[%s10636_s3 + $0x364] ss:$16 sps:$4 sm:$0xff]  }
 0x20c   :  { %v2874_v41 = vpop.f32.mrf.mxu1  ;;  %4867 = vmatpush2.bf16.msra.mxu1 %v7543_v17  ;;  %v2873_v55 = vadd.f32 %v2872_v54, %v2680_v58  ;;  %v2682_v48 = vadd.f32 %v2681_v53, %v10731_v11  ;;  %4675 = vmatprep.subr.bf16.mxu0 %v7512_v50  ;;  %v3774_v4 = vmax.f32 %v2871_v7, 0.0  ;;  %v10734_v53 = vld [vmem:[#allocation22_spill] sm:$0xff] }
 0x20d   :  { %v2685_v39 = vpop.f32.mrf.mxu0  ;;  %3376 = vmatmul.mubr.bf16.gmra.mxu0 %v7769_v56  ;;  %4868 = vmatprep.subr.bf16.mxu1 %v7548_v24  ;;  %v7549_v24 = vld [vmem:[%s10636_s3 + $0x340] ss:$16 sps:$4 sm:$0xff]  }
 0x20e   :  { %v2878_v57 = vpop.f32.mrf.mxu1  ;;  %3569 = vmatmul.mubr.bf16.gmra.mxu1 %v7770_v19  ;;  %v3777_v12 = vmax.f32 %v2873_v55, 0.0  ;;  %v2875_v52 = vadd.f32 %v2874_v41, %v2682_v48  ;;  %v2686_v44 = vadd.f32 %v2685_v39, %v8522_v0  ;;  %3385 = vmatprep.mubr.bf16.mxu0 %v7771_v1  ;;  %v7772_v48 = vld [vmem:[%s10633_s0 + $0x198] ss:$28 sps:$4 sm:$0xff]   ;;  %v10735_v39 = vld [vmem:[#allocation8_spill] sm:$0xff] }
 0x20f   :  { %3578 = vmatprep.mubr.bf16.mxu1 %v10712_v30  ;;  %v2687_v5 = vpop.f32.mrf.mxu0  ;;  %4676 = vmatpush2.bf16.msra.mxu0 %v7510_v10  ;;  %v7527_v10 = vld [vmem:[%s10636_s3 + $0x104] ss:$16 sps:$4 sm:$0xff]  }
 0x210   :  { %v2880_v21 = vpop.f32.mrf.mxu1  ;;  %v8989_v0 = vpack.c.bf16 %v3777_v12, %v3773_v62  ;;  %v3778_v3 = vmax.f32 %v2875_v52, 0.0  ;;  %v2879_v33 = vadd.f32 %v2878_v57, %v2686_v44  ;;  %v2688_v50 = vadd.f32 %v2687_v5, %v8525_v20  ;;  %4677 = vmatprep.subr.bf16.mxu0 %v7518_v15  ;;  %v7519_v20 = vld [vmem:[%s10636_s3 + $0x120] ss:$16 sps:$4 sm:$0xff]   ;;  %4869 = vmatpush2.bf16.msra.mxu1 %v7546_v31  ;;  %v10736_v12 = vld [vmem:[#allocation23_spill] sm:$0xff] }
 0x211   :  { %v2689_v9 = vpop.f32.mrf.mxu0  ;;  %v7773_v15 = vld [vmem:[%s10633_s0 + $0x1a0] ss:$28 sps:$4 sm:$0xff]   ;;  %v10647_v57 = vsub.s32 2, %v10735_v39  ;;  %v7774_v44 = vld [vmem:[%s10633_s0 + $0x1d4] ss:$28 sps:$4 sm:$0xff]  }
 0x212   :  { %10732 = vst [vmem:[#allocation9_spill] sm:$0xff] %v8989_v0  ;;  %v2882_v60 = vpop.f32.mrf.mxu1  ;;  %v2881_v17 = vadd.f32 %v2880_v21, %v2688_v50  ;;  %v2690_v27 = vadd.f32 %v2689_v9, %v10733_v40  ;;  %v8999_v54 = vpack.c.bf16 %v3778_v3, %v3774_v4  ;;  %v3781_v56 = vmax.f32 %v2879_v33, 0.0  ;;  %v10738_v50 = vld [vmem:[#allocation24_spill] sm:$0xff] }
 0x213   :  { %v2691_v7 = vpop.f32.mrf.mxu0  ;;  %4678 = vmatpush2.bf16.msra.mxu0 %v7516_v47  ;;  %v10648_v21 = vsub.s32 3, %v10735_v39  ;;  %v7525_v47 = vld [vmem:[%s10636_s3 + $0x100] ss:$16 sps:$4 sm:$0xff]   ;;  %v7551_v9 = vld [vmem:[%s10636_s3 + $0x344] ss:$16 sps:$4 sm:$0xff]  }
 0x214   :  { %v2884_v26 = vpop.f32.mrf.mxu1  ;;  %v2883_v58 = vadd.f32 %v2882_v60, %v2690_v27  ;;  %v2692_v41 = vadd.f32 %v2691_v7, %v10734_v53  ;;  %4679 = vmatprep.subr.bf16.mxu0 %v7521_v32  ;;  %v3782_v1 = vmax.f32 %v2881_v17, 0.0  ;;  %v10739_v27 = vld [vmem:[#allocation25_spill] sm:$0xff]  ;;  %4870 = vmatprep.subr.bf16.mxu1 %v7551_v9 }
 0x215   :  { %v2695_v55 = vpop.f32.mrf.mxu0  ;;  %3386 = vmatmul.mubr.bf16.gmra.mxu0 %v7772_v48  ;;  %4871 = vmatpush2.bf16.msra.mxu1 %v7549_v24 }
 0x216   :  { %v2888_v11 = vpop.f32.mrf.mxu1  ;;  %3579 = vmatmul.mubr.bf16.gmra.mxu1 %v7773_v15  ;;  %v3785_v19 = vmax.f32 %v2883_v58, 0.0  ;;  %v2885_v62 = vadd.f32 %v2884_v26, %v2692_v41  ;;  %v2696_v52 = vadd.f32 %v2695_v55, %v10736_v12  ;;  %3395 = vmatprep.mubr.bf16.mxu0 %v7774_v44  ;;  %v7775_v26 = vld [vmem:[%s10635_s2] sm:$0xf]  ;;  %v7777_v12 = vld [vmem:[%s10633_s0 + $0x1d8] ss:$28 sps:$4 sm:$0xff]  }
 0x217   :  { %3588 = vmatprep.mubr.bf16.mxu1 %v10712_v30  ;;  %v2697_v4 = vpop.f32.mrf.mxu0  ;;  %4680 = vmatpush2.bf16.msra.mxu0 %v7519_v20  ;;  %v9039_v20 = vrot.slane %v7775_v26, %v10647_v57  ;;  %v9049_v15 = vrot.slane %v7775_v26, %v10648_v21 }
 0x218   :  { %v2890_v5 = vpop.f32.mrf.mxu1  ;;  %v9024_v32 = vpack.c.bf16 %v3785_v19, %v3781_v56  ;;  %v3786_v3 = vmax.f32 %v2885_v62, 0.0  ;;  %v2889_v33 = vadd.f32 %v2888_v11, %v2696_v52  ;;  %v2698_v31 = vadd.f32 %v2697_v4, %v10738_v50  ;;  %4681 = vmatprep.subr.bf16.mxu0 %v7527_v10  ;;  %v7557_v10 = vld [vmem:[%s10636_s3 + $0xec] ss:$16 sps:$4 sm:$0xff]   ;;  %v10741_v11 = vld [vmem:[#allocation26_spill] sm:$0xff] }
 0x219   :  { %v2699_v60 = vpop.f32.mrf.mxu0  ;;  %v7776_v62 = vld [vmem:[%s10633_s0 + $0x1d0] ss:$28 sps:$4 sm:$0xff]  }
 0x21a   :  { %10737 = vst [vmem:[#allocation10_spill] sm:$0xff] %v9024_v32  ;;  %v2892_v17 = vpop.f32.mrf.mxu1  ;;  %v2891_v40 = vadd.f32 %v2890_v5, %v2698_v31  ;;  %v2700_v7 = vadd.f32 %v2699_v60, %v10739_v27  ;;  %v9041_v58 = vpack.c.bf16 %v3786_v3, %v3782_v1  ;;  %v3789_v52 = vmax.f32 %v2889_v33, 0.0  ;;  %v7778_v5 = vld [vmem:[%s10633_s0 + $0x20c] ss:$28 sps:$4 sm:$0xff]  }
 0x21b   :  { %v2701_v53 = vpop.f32.mrf.mxu0  ;;  %4682 = vmatpush2.bf16.msra.mxu0 %v7525_v47 }
 0x21c   :  { %10740 = vst [vmem:[#allocation11_spill] sm:$0xff] %v9041_v58  ;;  %v2894_v41 = vpop.f32.mrf.mxu1  ;;  %v2893_v55 = vadd.f32 %v2892_v17, %v2700_v7  ;;  %v2702_v48 = vadd.f32 %v2701_v53, %v10741_v11  ;;  %v3790_v47 = vmax.f32 %v2891_v40, 0.0  ;;  %5037 = vmatprep.subr.bf16.mxu0 %v7557_v10  ;;  %v7554_v40 = vld [vmem:[%s10636_s3 + $0x324] ss:$16 sps:$4 sm:$0xff]   ;;  %v7552_v10 = vld [vmem:[%s10636_s3 + $0x320] ss:$16 sps:$4 sm:$0xff]  }
 0x21d   :  { %v2931_v56 = vpop.f32.mrf.mxu0  ;;  %3396 = vmatmul.mubr.bf16.gmra.mxu0 %v7776_v62  ;;  %4872 = vmatprep.subr.bf16.mxu1 %v7554_v40  ;;  %v7780_v62 = vld [vmem:[%s10633_s0 + $0x210] ss:$28 sps:$4 sm:$0xff]  }
 0x21e   :  { %v3124_v19 = vpop.f32.mrf.mxu1  ;;  %3589 = vmatmul.mubr.bf16.gmra.mxu1 %v7777_v12  ;;  %v3793_v44 = vmax.f32 %v2893_v55, 0.0  ;;  %v2895_v1 = vadd.f32 %v2894_v41, %v2702_v48  ;;  %v2932_v4 = vadd.f32 %v2931_v56, %v9039_v20  ;;  %3405 = vmatprep.mubr.bf16.mxu0 %v7778_v5  ;;  %v7563_v5 = vld [vmem:[%s10636_s3 + $0x304] ss:$16 sps:$4 sm:$0xff]  }
 0x21f   :  { %3598 = vmatprep.mubr.bf16.mxu1 %v10712_v30  ;;  %v2933_v3 = vpop.f32.mrf.mxu0  ;;  %4873 = vmatpush2.bf16.msra.mxu1 %v7552_v10 }
 0x220   :  { %v3126_v50 = vpop.f32.mrf.mxu1  ;;  %v9062_v31 = vpack.c.bf16 %v3793_v44, %v3789_v52  ;;  %v3794_v24 = vmax.f32 %v2895_v1, 0.0  ;;  %v9064_v9 = vadd.f32 %v3124_v19, %v2932_v4  ;;  %v2934_v33 = vadd.f32 %v2933_v3, %v9049_v15  ;;  %v7779_v19 = vld [vmem:[%s10633_s0 + $0x208] ss:$28 sps:$4 sm:$0xff]   ;;  %4874 = vmatprep.subr.bf16.mxu1 %v7563_v5 }
 0x221   :  { %v2935_v60 = vpop.f32.mrf.mxu0  ;;  %v7781_v44 = vld [vmem:[%s10633_s0 + $0x244] ss:$28 sps:$4 sm:$0xff]  }
 0x222   :  { %10742 = vst [vmem:[#allocation12_spill] sm:$0xff] %v9062_v31  ;;  %v3128_v17 = vpop.f32.mrf.mxu1  ;;  %v9067_v27 = vadd.f32 %v3126_v50, %v2934_v33  ;;  %v2936_v7 = vadd.f32 %v2935_v60, %v9039_v20  ;;  %v9073_v26 = vpack.c.bf16 %v3794_v24, %v3790_v47  ;;  %v7561_v50 = vld [vmem:[%s10636_s3 + $0x300] ss:$16 sps:$4 sm:$0xff]  }
 0x223   :  { %v2937_v53 = vpop.f32.mrf.mxu0  ;;  %4875 = vmatpush2.bf16.msra.mxu1 %v7561_v50 }
 0x224   :  { %10743 = vst [vmem:[#allocation13_spill] sm:$0xff] %v9073_v26  ;;  %v3130_v41 = vpop.f32.mrf.mxu1  ;;  %v9078_v55 = vadd.f32 %v3128_v17, %v2936_v7  ;;  %v2938_v11 = vadd.f32 %v2937_v53, %v9049_v15 }
 0x225   :  { %v2941_v48 = vpop.f32.mrf.mxu0  ;;  %3406 = vmatmul.mubr.bf16.gmra.mxu0 %v7779_v19 }
 0x226   :  { %v3134_v56 = vpop.f32.mrf.mxu1  ;;  %3599 = vmatmul.mubr.bf16.gmra.mxu1 %v7780_v62  ;;  %v9087_v12 = vadd.f32 %v3130_v41, %v2938_v11  ;;  %v2942_v52 = vadd.f32 %v2941_v48, %v9039_v20  ;;  %3415 = vmatprep.mubr.bf16.mxu0 %v7781_v44  ;;  %v7782_v48 = vld [vmem:[%s10633_s0 + $0x240] ss:$28 sps:$4 sm:$0xff]  }
 0x227   :  { %3608 = vmatprep.mubr.bf16.mxu1 %v10712_v30  ;;  %v2943_v1 = vpop.f32.mrf.mxu0 }
 0x228   :  { %v3136_v4 = vpop.f32.mrf.mxu1  ;;  %v9097_v47 = vadd.f32 %v3134_v56, %v2942_v52  ;;  %v2944_v3 = vadd.f32 %v2943_v1, %v9049_v15  ;;  %v7783_v56 = vld [vmem:[%s10633_s0 + $0x248] ss:$28 sps:$4 sm:$0xff]   ;;  %v7784_v52 = vld [vmem:[%s10633_s0 + $0x27c] ss:$28 sps:$4 sm:$0xff]  }
 0x229   :  { %v2945_v24 = vpop.f32.mrf.mxu0 }
 0x22a   :  { %v3138_v33 = vpop.f32.mrf.mxu1  ;;  %v9103_v60 = vadd.f32 %v3136_v4, %v2944_v3  ;;  %v2946_v17 = vadd.f32 %v2945_v24, %v9039_v20 }
 0x22b   :  { %v2947_v7 = vpop.f32.mrf.mxu0 }
 0x22c   :  { %v3140_v40 = vpop.f32.mrf.mxu1  ;;  %v9106_v53 = vadd.f32 %v3138_v33, %v2946_v17  ;;  %v2948_v41 = vadd.f32 %v2947_v7, %v9049_v15  ;;  %v7575_v17 = vld [vmem:[%s10636_s3 + $0x2ec] ss:$16 sps:$4 sm:$0xff]  }
 0x22d   :  { %v2951_v10 = vpop.f32.mrf.mxu0  ;;  %3416 = vmatmul.mubr.bf16.gmra.mxu0 %v7782_v48  ;;  %5230 = vmatprep.subr.bf16.mxu1 %v7575_v17 }
 0x22e   :  { %v3144_v11 = vpop.f32.mrf.mxu1  ;;  %3609 = vmatmul.mubr.bf16.gmra.mxu1 %v7783_v56  ;;  %v9115_v19 = vadd.f32 %v3140_v40, %v2948_v41  ;;  %v2952_v62 = vadd.f32 %v2951_v10, %v9039_v20  ;;  %3425 = vmatprep.mubr.bf16.mxu0 %v7784_v52  ;;  %v7785_v56 = vld [vmem:[%s10633_s0 + $0x278] ss:$28 sps:$4 sm:$0xff]  }
 0x22f   :  { %3618 = vmatprep.mubr.bf16.mxu1 %v10712_v30  ;;  %v2953_v44 = vpop.f32.mrf.mxu0 }
 0x230   :  { %v3146_v1 = vpop.f32.mrf.mxu1  ;;  %v9122_v4 = vadd.f32 %v3144_v11, %v2952_v62  ;;  %v2954_v5 = vadd.f32 %v2953_v44, %v9049_v15  ;;  %v7786_v62 = vld [vmem:[%s10633_s0 + $0x280] ss:$28 sps:$4 sm:$0xff]  }
 0x231   :  { %v2955_v3 = vpop.f32.mrf.mxu0 }
 0x232   :  { %v3148_v50 = vpop.f32.mrf.mxu1  ;;  %v9125_v24 = vadd.f32 %v3146_v1, %v2954_v5  ;;  %v2956_v33 = vadd.f32 %v2955_v3, %v9039_v20  ;;  %v7787_v1 = vld [vmem:[%s10633_s0 + $0x2b4] ss:$28 sps:$4 sm:$0xff]  }
 0x233   :  { %v2957_v7 = vpop.f32.mrf.mxu0 }
 0x234   :  { %v3150_v40 = vpop.f32.mrf.mxu1  ;;  %v9131_v41 = vadd.f32 %v3148_v50, %v2956_v33  ;;  %v2958_v10 = vadd.f32 %v2957_v7, %v9049_v15 }
 0x235   :  { %v2961_v11 = vpop.f32.mrf.mxu0  ;;  %3426 = vmatmul.mubr.bf16.gmra.mxu0 %v7785_v56 }
 0x236   :  { %v3154_v48 = vpop.f32.mrf.mxu1  ;;  %3619 = vmatmul.mubr.bf16.gmra.mxu1 %v7786_v62  ;;  %v9140_v52 = vadd.f32 %v3150_v40, %v2958_v10  ;;  %v2962_v44 = vadd.f32 %v2961_v11, %v9039_v20  ;;  %3435 = vmatprep.mubr.bf16.mxu0 %v7787_v1 }
 0x237   :  { %3628 = vmatprep.mubr.bf16.mxu1 %v10712_v30  ;;  %v2963_v5 = vpop.f32.mrf.mxu0 }
 0x238   :  { %v3156_v3 = vpop.f32.mrf.mxu1  ;;  %v9147_v50 = vadd.f32 %v3154_v48, %v2962_v44  ;;  %v2964_v33 = vadd.f32 %v2963_v5, %v9049_v15  ;;  %v7788_v48 = vld [vmem:[%s10633_s0 + $0x2b0] ss:$28 sps:$4 sm:$0xff]   ;;  %v7789_v44 = vld [vmem:[%s10633_s0 + $0x2b8] ss:$28 sps:$4 sm:$0xff]  }
 0x239   :  { %v2965_v17 = vpop.f32.mrf.mxu0 }
 0x23a   :  { %v3158_v7 = vpop.f32.mrf.mxu1  ;;  %v9150_v56 = vadd.f32 %v3156_v3, %v2964_v33  ;;  %v2966_v40 = vadd.f32 %v2965_v17, %v9039_v20  ;;  %v7790_v33 = vld [vmem:[%s10633_s0 + $0x2ec] ss:$28 sps:$4 sm:$0xff]  }
 0x23b   :  { %v2967_v10 = vpop.f32.mrf.mxu0 }
 0x23c   :  { %v3160_v11 = vpop.f32.mrf.mxu1  ;;  %v9153_v62 = vadd.f32 %v3158_v7, %v2966_v40  ;;  %v2968_v1 = vadd.f32 %v2967_v10, %v9049_v15 }
 0x23d   :  { %v2971_v57 = vpop.f32.mrf.mxu0  ;;  %3436 = vmatmul.mubr.bf16.gmra.mxu0 %v7788_v48 }
 0x23e   :  { %v3164_v21 = vpop.f32.mrf.mxu1  ;;  %3629 = vmatmul.mubr.bf16.gmra.mxu1 %v7789_v44  ;;  %v9162_v5 = vadd.f32 %v3160_v11, %v2968_v1  ;;  %v2972_v3 = vadd.f32 %v2971_v57, %v9039_v20  ;;  %3445 = vmatprep.mubr.bf16.mxu0 %v7790_v33 }
 0x23f   :  { %3638 = vmatprep.mubr.bf16.mxu1 %v10712_v30  ;;  %v2973_v17 = vpop.f32.mrf.mxu0 }
 0x240   :  { %v3166_v7 = vpop.f32.mrf.mxu1  ;;  %v9169_v40 = vadd.f32 %v3164_v21, %v2972_v3  ;;  %v2974_v10 = vadd.f32 %v2973_v17, %v9049_v15  ;;  %v7791_v21 = vld [vmem:[%s10633_s0 + $0x2e8] ss:$28 sps:$4 sm:$0xff]   ;;  %v7792_v3 = vld [vmem:[%s10633_s0 + $0x2f0] ss:$28 sps:$4 sm:$0xff]  }
 0x241   :  { %v2975_v48 = vpop.f32.mrf.mxu0 }
 0x242   :  { %v3168_v39 = vpop.f32.mrf.mxu1  ;;  %v9172_v44 = vadd.f32 %v3166_v7, %v2974_v10  ;;  %v2976_v11 = vadd.f32 %v2975_v48, %v9039_v20  ;;  %v7793_v7 = vld [vmem:[%s10633_s0 + $0x324] ss:$28 sps:$4 sm:$0xff]  }
 0x243   :  { %v9175_v57 = vpop.f32.mrf.mxu0 }
 0x244   :  { %v9177_v1 = vpop.f32.mrf.mxu1  ;;  %v9179_v31 = vadd.f32 %v3168_v39, %v2976_v11 }
 0x245   :  { %10744 = vst [vmem:[#allocation14_spill] sm:$0xff] %v9177_v1  ;;  %v2981_v33 = vpop.f32.mrf.mxu0  ;;  %3446 = vmatmul.mubr.bf16.gmra.mxu0 %v7791_v21 }
 0x246   :  { %10745 = vst [vmem:[#allocation15_spill] sm:$0xff] %v9179_v31  ;;  %v3174_v26 = vpop.f32.mrf.mxu1  ;;  %3639 = vmatmul.mubr.bf16.gmra.mxu1 %v7792_v3  ;;  %v2982_v17 = vadd.f32 %v2981_v33, %v9039_v20  ;;  %3455 = vmatprep.mubr.bf16.mxu0 %v7793_v7 }
 0x247   :  { %3648 = vmatprep.mubr.bf16.mxu1 %v10712_v30  ;;  %v2983_v39 = vpop.f32.mrf.mxu0 }
 0x248   :  { %v3176_v10 = vpop.f32.mrf.mxu1  ;;  %v9192_v48 = vadd.f32 %v3174_v26, %v2982_v17  ;;  %v2984_v11 = vadd.f32 %v2983_v39, %v9049_v15  ;;  %v7794_v26 = vld [vmem:[%s10633_s0 + $0x320] ss:$28 sps:$4 sm:$0xff]   ;;  %v7795_v17 = vld [vmem:[%s10633_s0 + $0x328] ss:$28 sps:$4 sm:$0xff]  }
 0x249   :  { %v2985_v21 = vpop.f32.mrf.mxu0 }
 0x24a   :  { %10746 = vst [vmem:[#allocation16_spill] sm:$0xff] %v9192_v48  ;;  %v3178_v32 = vpop.f32.mrf.mxu1  ;;  %v9195_v58 = vadd.f32 %v3176_v10, %v2984_v11  ;;  %v2986_v3 = vadd.f32 %v2985_v21, %v9039_v20  ;;  %v7796_v10 = vld [vmem:[%s10633_s0 + $0x35c] ss:$28 sps:$4 sm:$0xff]  }
 0x24b   :  { %v9198_v33 = vpop.f32.mrf.mxu0 }
 0x24c   :  { %10747 = vst [vmem:[#allocation17_spill] sm:$0xff] %v9195_v58  ;;  %v9200_v0 = vpop.f32.mrf.mxu1  ;;  %v9202_v31 = vadd.f32 %v3178_v32, %v2986_v3 }
 0x24d   :  { %10748 = vst [vmem:[#allocation18_spill] sm:$0xff] %v9200_v0  ;;  %v2991_v7 = vpop.f32.mrf.mxu0  ;;  %3456 = vmatmul.mubr.bf16.gmra.mxu0 %v7794_v26 }
 0x24e   :  { %10749 = vst [vmem:[#allocation19_spill] sm:$0xff] %v9202_v31  ;;  %v3184_v1 = vpop.f32.mrf.mxu1  ;;  %3649 = vmatmul.mubr.bf16.gmra.mxu1 %v7795_v17  ;;  %v2992_v39 = vadd.f32 %v2991_v7, %v9039_v20  ;;  %3465 = vmatprep.mubr.bf16.mxu0 %v7796_v10 }
 0x24f   :  { %3658 = vmatprep.mubr.bf16.mxu1 %v10712_v30  ;;  %v2993_v32 = vpop.f32.mrf.mxu0 }
 0x250   :  { %v3186_v11 = vpop.f32.mrf.mxu1  ;;  %v9215_v21 = vadd.f32 %v3184_v1, %v2992_v39  ;;  %v2994_v3 = vadd.f32 %v2993_v32, %v9049_v15  ;;  %v7797_v1 = vld [vmem:[%s10633_s0 + $0x358] ss:$28 sps:$4 sm:$0xff]   ;;  %v7798_v39 = vld [vmem:[%s10633_s0 + $0x360] ss:$28 sps:$4 sm:$0xff]  }
 0x251   :  { %v2995_v26 = vpop.f32.mrf.mxu0 }
 0x252   :  { %v3188_v31 = vpop.f32.mrf.mxu1  ;;  %v9218_v0 = vadd.f32 %v3186_v11, %v2994_v3  ;;  %v2996_v17 = vadd.f32 %v2995_v26, %v9039_v20 }
 0x253   :  { %v9221_v7 = vpop.f32.mrf.mxu0 }
 0x254   :  { %10750 = vst [vmem:[#allocation20_spill] sm:$0xff] %v9218_v0  ;;  %v9223_v58 = vpop.f32.mrf.mxu1  ;;  %v9225_v48 = vadd.f32 %v3188_v31, %v2996_v17 }
 0x255   :  { %10751 = vst [vmem:[#allocation21_spill] sm:$0xff] %v9223_v58  ;;  %v3001_v10 = vpop.f32.mrf.mxu0  ;;  %3466 = vmatmul.mubr.bf16.gmra.mxu0 %v7797_v1 }
 0x256   :  { %10752 = vst [vmem:[#allocation22_spill] sm:$0xff] %v9225_v48  ;;  %v3194_v30 = vpop.f32.mrf.mxu1  ;;  %3659 = vmatmul.mubr.bf16.gmra.mxu1 %v7798_v39  ;;  %v3002_v32 = vadd.f32 %v3001_v10, %v9039_v20  ;;  %4683 = vmatprep.mubr.bf16.mxu0 %v8593_v22  ;;  %v7555_v39 = vld [vmem:[%s10636_s3 + $0xe8] ss:$16 sps:$4 sm:$0xff]  }
 0x257   :  { %v3003_v11 = vpop.f32.mrf.mxu0 }
 0x258   :  { %v3196_v3 = vpop.f32.mrf.mxu1  ;;  %v9235_v31 = vadd.f32 %v3194_v30, %v3002_v32  ;;  %v3004_v26 = vadd.f32 %v3003_v11, %v9049_v15  ;;  %v7560_v30 = vld [vmem:[%s10636_s3 + $0xcc] ss:$16 sps:$4 sm:$0xff]  }
 0x259   :  { %v3005_v17 = vpop.f32.mrf.mxu0 }
 0x25a   :  { %10753 = vst [vmem:[#allocation23_spill] sm:$0xff] %v9235_v31  ;;  %v3198_v48 = vpop.f32.mrf.mxu1  ;;  %v9238_v58 = vadd.f32 %v3196_v3, %v3004_v26  ;;  %v3006_v1 = vadd.f32 %v3005_v17, %v9039_v20  ;;  %v7558_v26 = vld [vmem:[%s10636_s3 + $0xc8] ss:$16 sps:$4 sm:$0xff]  }
 0x25b   :  { %v9244_v0 = vpop.f32.mrf.mxu0 }
 0x25c   :  { %10754 = vst [vmem:[#allocation24_spill] sm:$0xff] %v9238_v58  ;;  %v9246_v10 = vpop.f32.mrf.mxu1  ;;  %v9251_v32 = vadd.f32 %v3198_v48, %v3006_v1  ;;  %v7566_v48 = vld [vmem:[%s10636_s3 + $0xac] ss:$16 sps:$4 sm:$0xff]  }
 0x25d   :  { %10755 = vst [vmem:[#allocation25_spill] sm:$0xff] %v9246_v10  ;;  %v3011_v11 = vpop.f32.mrf.mxu0  ;;  %4684 = vmatmul.mubr.bf16.vlgmr.msra.gmra.mxu0 %v8589_v8 }
 0x25e   :  { %10756 = vst [vmem:[#allocation26_spill] sm:$0xff] %v9251_v32  ;;  %v3204_v22 = vpop.f32.mrf.mxu1  ;;  %v3012_v3 = vadd.f32 %v3011_v11, %v9039_v20  ;;  %4693 = vmatprep.mubr.bf16.mxu0 %v8616_v43  ;;  %5038 = vmatpush1.bf16.msra.mxu0 %v7555_v39  ;;  %v7564_v43 = vld [vmem:[%s10636_s3 + $0xa8] ss:$16 sps:$4 sm:$0xff]  }
 0x25f   :  { %v3013_v17 = vpop.f32.mrf.mxu0  ;;  %5039 = vmatprep.subr.bf16.mxu0 %v7560_v30 }
 0x260   :  { %v3206_v10 = vpop.f32.mrf.mxu1  ;;  %v9262_v1 = vadd.f32 %v3204_v22, %v3012_v3  ;;  %v3014_v8 = vadd.f32 %v3013_v17, %v9049_v15  ;;  %v7569_v22 = vld [vmem:[%s10636_s3 + $0x8c] ss:$16 sps:$4 sm:$0xff]  }
 0x261   :  { %v3015_v32 = vpop.f32.mrf.mxu0 }
 0x262   :  { %v3208_v11 = vpop.f32.mrf.mxu1  ;;  %v9265_v58 = vadd.f32 %v3206_v10, %v3014_v8  ;;  %v3016_v39 = vadd.f32 %v3015_v32, %v9039_v20  ;;  %5040 = vmatpush1.bf16.msra.mxu0 %v7558_v26  ;;  %v7567_v26 = vld [vmem:[%s10636_s3 + $0x88] ss:$16 sps:$4 sm:$0xff]  }
 0x263   :  { %v9271_v30 = vpop.f32.mrf.mxu0  ;;  %5041 = vmatprep.subr.bf16.mxu0 %v7566_v48 }
 0x264   :  { %10757 = vst [vmem:[#allocation46_spill] sm:$0xff] %v9265_v58  ;;  %v9273_v31 = vpop.f32.mrf.mxu1  ;;  %v9278_v3 = vadd.f32 %v3208_v11, %v3016_v39  ;;  %v7572_v11 = vld [vmem:[%s10636_s3 + $0x6c] ss:$16 sps:$4 sm:$0xff]  }
 0x265   :  { %10758 = vst [vmem:[#allocation47_spill] sm:$0xff] %v9273_v31  ;;  %v3021_v8 = vpop.f32.mrf.mxu0  ;;  %4694 = vmatmul.mubr.bf16.gmra.mxu0 %v8609_v36 }
 0x266   :  { %10759 = vst [vmem:[#allocation48_spill] sm:$0xff] %v9278_v3  ;;  %v3214_v10 = vpop.f32.mrf.mxu1  ;;  %v3022_v32 = vadd.f32 %v3021_v8, %v9039_v20  ;;  %4703 = vmatprep.mubr.bf16.mxu0 %v8636_v34  ;;  %5042 = vmatpush1.bf16.msra.mxu0 %v7564_v43  ;;  %v7570_v34 = vld [vmem:[%s10636_s3 + $0x68] ss:$16 sps:$4 sm:$0xff]  }
 0x267   :  { %v3023_v17 = vpop.f32.mrf.mxu0  ;;  %5043 = vmatprep.subr.bf16.mxu0 %v7569_v22 }
 0x268   :  { %v3216_v48 = vpop.f32.mrf.mxu1  ;;  %v9289_v39 = vadd.f32 %v3214_v10, %v3022_v32  ;;  %v3024_v36 = vadd.f32 %v3023_v17, %v9049_v15  ;;  %v7578_v10 = vld [vmem:[%s10636_s3 + $0x4c] ss:$16 sps:$4 sm:$0xff]  }
 0x269   :  { %v3025_v3 = vpop.f32.mrf.mxu0 }
 0x26a   :  { %v3218_v8 = vpop.f32.mrf.mxu1  ;;  %v9292_v31 = vadd.f32 %v3216_v48, %v3024_v36  ;;  %v3026_v43 = vadd.f32 %v3025_v3, %v9039_v20  ;;  %5044 = vmatpush1.bf16.msra.mxu0 %v7567_v26  ;;  %v7576_v26 = vld [vmem:[%s10636_s3 + $0x48] ss:$16 sps:$4 sm:$0xff]  }
 0x26b   :  { %v9298_v22 = vpop.f32.mrf.mxu0  ;;  %5045 = vmatprep.subr.bf16.mxu0 %v7572_v11 }
 0x26c   :  { %10760 = vst [vmem:[#allocation49_spill] sm:$0xff] %v9292_v31  ;;  %v9300_v58 = vpop.f32.mrf.mxu1  ;;  %v9305_v32 = vadd.f32 %v3218_v8, %v3026_v43  ;;  %v7581_v8 = vld [vmem:[%s10636_s3 + $0x2c] ss:$16 sps:$4 sm:$0xff]  }
 0x26d   :  { %10761 = vst [vmem:[#allocation50_spill] sm:$0xff] %v9300_v58  ;;  %v3031_v36 = vpop.f32.mrf.mxu0  ;;  %4704 = vmatmul.mubr.bf16.gmra.mxu0 %v8632_v14 }
 0x26e   :  { %10762 = vst [vmem:[#allocation51_spill] sm:$0xff] %v9305_v32  ;;  %v3224_v17 = vpop.f32.mrf.mxu1  ;;  %v3032_v3 = vadd.f32 %v3031_v36, %v9039_v20  ;;  %4713 = vmatprep.mubr.bf16.mxu0 %v8656_v29  ;;  %5046 = vmatpush1.bf16.msra.mxu0 %v7570_v34  ;;  %v7579_v29 = vld [vmem:[%s10636_s3 + $0x28] ss:$16 sps:$4 sm:$0xff]  }
 0x26f   :  { %v3033_v48 = vpop.f32.mrf.mxu0  ;;  %5047 = vmatprep.subr.bf16.mxu0 %v7578_v10 }
 0x270   :  { %v3226_v11 = vpop.f32.mrf.mxu1  ;;  %v9316_v43 = vadd.f32 %v3224_v17, %v3032_v3  ;;  %v3034_v14 = vadd.f32 %v3033_v48, %v9049_v15  ;;  %v7587_v17 = vld [vmem:[%s10636_s3 + $0xc] ss:$16 sps:$4 sm:$0xff]  }
 0x271   :  { %v3035_v32 = vpop.f32.mrf.mxu0 }
 0x272   :  { %v3228_v36 = vpop.f32.mrf.mxu1  ;;  %v9319_v58 = vadd.f32 %v3226_v11, %v3034_v14  ;;  %v3036_v34 = vadd.f32 %v3035_v32, %v9039_v20  ;;  %5048 = vmatpush1.bf16.msra.mxu0 %v7576_v26  ;;  %v7585_v26 = vld [vmem:[%s10636_s3 + $0x8] ss:$16 sps:$4 sm:$0xff]  }
 0x273   :  { %v9325_v10 = vpop.f32.mrf.mxu0  ;;  %5049 = vmatprep.subr.bf16.mxu0 %v7581_v8 }
 0x274   :  { %10763 = vst [vmem:[#allocation52_spill] sm:$0xff] %v9319_v58  ;;  %v9327_v31 = vpop.f32.mrf.mxu1  ;;  %v9332_v3 = vadd.f32 %v3228_v36, %v3036_v34  ;;  %v7590_v36 = vld [vmem:[%s10636_s3 + $0x1ec] ss:$16 sps:$4 sm:$0xff]  }
 0x275   :  { %10764 = vst [vmem:[#allocation53_spill] sm:$0xff] %v9327_v31  ;;  %v3041_v14 = vpop.f32.mrf.mxu0  ;;  %4714 = vmatmul.mubr.bf16.gmra.mxu0 %v8652_v63 }
 0x276   :  { %10765 = vst [vmem:[#allocation54_spill] sm:$0xff] %v9332_v3  ;;  %v3234_v48 = vpop.f32.mrf.mxu1  ;;  %v3042_v32 = vadd.f32 %v3041_v14, %v9039_v20  ;;  %4723 = vmatprep.mubr.bf16.mxu0 %v8676_v51  ;;  %5050 = vmatpush1.bf16.msra.mxu0 %v7579_v29  ;;  %v7588_v51 = vld [vmem:[%s10636_s3 + $0x1e8] ss:$16 sps:$4 sm:$0xff]  }
 0x277   :  { %v3043_v11 = vpop.f32.mrf.mxu0  ;;  %5051 = vmatprep.subr.bf16.mxu0 %v7587_v17 }
 0x278   :  { %v3236_v8 = vpop.f32.mrf.mxu1  ;;  %v9343_v34 = vadd.f32 %v3234_v48, %v3042_v32  ;;  %v3044_v63 = vadd.f32 %v3043_v11, %v9049_v15  ;;  %v7596_v48 = vld [vmem:[%s10636_s3 + $0x1cc] ss:$16 sps:$4 sm:$0xff]  }
 0x279   :  { %v3045_v3 = vpop.f32.mrf.mxu0 }
 0x27a   :  { %v3238_v14 = vpop.f32.mrf.mxu1  ;;  %v9346_v31 = vadd.f32 %v3236_v8, %v3044_v63  ;;  %v3046_v29 = vadd.f32 %v3045_v3, %v9039_v20  ;;  %5052 = vmatpush1.bf16.msra.mxu0 %v7585_v26  ;;  %v7594_v26 = vld [vmem:[%s10636_s3 + $0x1c8] ss:$16 sps:$4 sm:$0xff]  }
 0x27b   :  { %v9352_v17 = vpop.f32.mrf.mxu0  ;;  %5053 = vmatprep.subr.bf16.mxu0 %v7590_v36 }
 0x27c   :  { %10766 = vst [vmem:[#allocation55_spill] sm:$0xff] %v9346_v31  ;;  %v9354_v58 = vpop.f32.mrf.mxu1  ;;  %v9359_v32 = vadd.f32 %v3238_v14, %v3046_v29  ;;  %v7599_v14 = vld [vmem:[%s10636_s3 + $0x1ac] ss:$16 sps:$4 sm:$0xff]  }
 0x27d   :  { %10767 = vst [vmem:[#allocation56_spill] sm:$0xff] %v9354_v58  ;;  %v3051_v63 = vpop.f32.mrf.mxu0  ;;  %4724 = vmatmul.mubr.bf16.gmra.mxu0 %v8672_v16 }
 0x27e   :  { %10768 = vst [vmem:[#allocation57_spill] sm:$0xff] %v9359_v32  ;;  %v3244_v11 = vpop.f32.mrf.mxu1  ;;  %v3052_v3 = vadd.f32 %v3051_v63, %v9039_v20  ;;  %4733 = vmatprep.mubr.bf16.mxu0 %v8696_v59  ;;  %5054 = vmatpush2.bf16.msra.mxu0 %v7588_v51  ;;  %v7597_v59 = vld [vmem:[%s10636_s3 + $0x1a8] ss:$16 sps:$4 sm:$0xff]  }
 0x27f   :  { %v3053_v8 = vpop.f32.mrf.mxu0  ;;  %5055 = vmatprep.subr.bf16.mxu0 %v7596_v48 }
 0x280   :  { %v3246_v36 = vpop.f32.mrf.mxu1  ;;  %v9370_v29 = vadd.f32 %v3244_v11, %v3052_v3  ;;  %v3054_v16 = vadd.f32 %v3053_v8, %v9049_v15  ;;  %v7605_v11 = vld [vmem:[%s10636_s3 + $0x18c] ss:$16 sps:$4 sm:$0xff]  }
 0x281   :  { %v3055_v32 = vpop.f32.mrf.mxu0 }
 0x282   :  { %v3248_v63 = vpop.f32.mrf.mxu1  ;;  %v9373_v58 = vadd.f32 %v3246_v36, %v3054_v16  ;;  %v3056_v51 = vadd.f32 %v3055_v32, %v9039_v20  ;;  %5056 = vmatpush2.bf16.msra.mxu0 %v7594_v26  ;;  %v7603_v26 = vld [vmem:[%s10636_s3 + $0x188] ss:$16 sps:$4 sm:$0xff]  }
 0x283   :  { %v9379_v48 = vpop.f32.mrf.mxu0  ;;  %5057 = vmatprep.subr.bf16.mxu0 %v7599_v14 }
 0x284   :  { %10769 = vst [vmem:[#allocation58_spill] sm:$0xff] %v9373_v58  ;;  %v9381_v31 = vpop.f32.mrf.mxu1  ;;  %v9386_v3 = vadd.f32 %v3248_v63, %v3056_v51  ;;  %v7608_v63 = vld [vmem:[%s10636_s3 + $0x16c] ss:$16 sps:$4 sm:$0xff]  }
 0x285   :  { %10770 = vst [vmem:[#allocation59_spill] sm:$0xff] %v9381_v31  ;;  %v3061_v16 = vpop.f32.mrf.mxu0  ;;  %4734 = vmatmul.mubr.bf16.gmra.mxu0 %v8692_v28 }
 0x286   :  { %10771 = vst [vmem:[#allocation60_spill] sm:$0xff] %v9386_v3  ;;  %v3254_v8 = vpop.f32.mrf.mxu1  ;;  %v3062_v32 = vadd.f32 %v3061_v16, %v9039_v20  ;;  %4743 = vmatprep.mubr.bf16.mxu0 %v8714_v6  ;;  %5058 = vmatpush2.bf16.msra.mxu0 %v7597_v59  ;;  %v7606_v6 = vld [vmem:[%s10636_s3 + $0x168] ss:$16 sps:$4 sm:$0xff]  }
 0x287   :  { %v3063_v36 = vpop.f32.mrf.mxu0  ;;  %5059 = vmatprep.subr.bf16.mxu0 %v7605_v11 }
 0x288   :  { %v3256_v14 = vpop.f32.mrf.mxu1  ;;  %v9397_v51 = vadd.f32 %v3254_v8, %v3062_v32  ;;  %v3064_v28 = vadd.f32 %v3063_v36, %v9049_v15  ;;  %v7614_v8 = vld [vmem:[%s10636_s3 + $0x14c] ss:$16 sps:$4 sm:$0xff]  }
 0x289   :  { %v3065_v3 = vpop.f32.mrf.mxu0 }
 0x28a   :  { %v3258_v16 = vpop.f32.mrf.mxu1  ;;  %v9400_v31 = vadd.f32 %v3256_v14, %v3064_v28  ;;  %v3066_v59 = vadd.f32 %v3065_v3, %v9039_v20  ;;  %5060 = vmatpush2.bf16.msra.mxu0 %v7603_v26  ;;  %v7612_v26 = vld [vmem:[%s10636_s3 + $0x148] ss:$16 sps:$4 sm:$0xff]  }
 0x28b   :  { %v9406_v11 = vpop.f32.mrf.mxu0  ;;  %5061 = vmatprep.subr.bf16.mxu0 %v7608_v63 }
 0x28c   :  { %10772 = vst [vmem:[#allocation61_spill] sm:$0xff] %v9400_v31  ;;  %v9408_v58 = vpop.f32.mrf.mxu1  ;;  %v9413_v32 = vadd.f32 %v3258_v16, %v3066_v59  ;;  %v7617_v16 = vld [vmem:[%s10636_s3 + $0x12c] ss:$16 sps:$4 sm:$0xff]  }
 0x28d   :  { %10773 = vst [vmem:[#allocation62_spill] sm:$0xff] %v9408_v58  ;;  %v3071_v28 = vpop.f32.mrf.mxu0  ;;  %4744 = vmatmul.mubr.bf16.gmra.mxu0 %v8710_v25 }
 0x28e   :  { %10774 = vst [vmem:[#allocation63_spill] sm:$0xff] %v9413_v32  ;;  %v3264_v36 = vpop.f32.mrf.mxu1  ;;  %v3072_v3 = vadd.f32 %v3071_v28, %v9039_v20  ;;  %4753 = vmatprep.mubr.bf16.mxu0 %v8756_v42  ;;  %5062 = vmatpush2.bf16.msra.mxu0 %v7606_v6  ;;  %v7615_v42 = vld [vmem:[%s10636_s3 + $0x128] ss:$16 sps:$4 sm:$0xff]  }
 0x28f   :  { %v3073_v14 = vpop.f32.mrf.mxu0  ;;  %5063 = vmatprep.subr.bf16.mxu0 %v7614_v8 }
 0x290   :  { %v3266_v63 = vpop.f32.mrf.mxu1  ;;  %v9424_v59 = vadd.f32 %v3264_v36, %v3072_v3  ;;  %v3074_v25 = vadd.f32 %v3073_v14, %v9049_v15  ;;  %v7623_v36 = vld [vmem:[%s10636_s3 + $0x10c] ss:$16 sps:$4 sm:$0xff]  }
 0x291   :  { %v3075_v32 = vpop.f32.mrf.mxu0 }
 0x292   :  { %10775 = vst [vmem:[#allocation64_spill] sm:$0xff] %v9424_v59  ;;  %v3268_v28 = vpop.f32.mrf.mxu1  ;;  %v9427_v58 = vadd.f32 %v3266_v63, %v3074_v25  ;;  %v3076_v6 = vadd.f32 %v3075_v32, %v9039_v20  ;;  %5064 = vmatpush2.bf16.msra.mxu0 %v7612_v26  ;;  %v7621_v26 = vld [vmem:[%s10636_s3 + $0x108] ss:$16 sps:$4 sm:$0xff]  }
 0x293   :  { %v9433_v8 = vpop.f32.mrf.mxu0  ;;  %5065 = vmatprep.subr.bf16.mxu0 %v7617_v16 }
 0x294   :  { %10776 = vst [vmem:[#allocation65_spill] sm:$0xff] %v9427_v58  ;;  %10777 = vst [vmem:[#allocation66_spill] sm:$0xff] %v9433_v8  ;;  %v9435_v31 = vpop.f32.mrf.mxu1  ;;  %v9440_v3 = vadd.f32 %v3268_v28, %v3076_v6 }
 0x295   :  { %10778 = vst [vmem:[#allocation67_spill] sm:$0xff] %v9435_v31  ;;  %v3081_v25 = vpop.f32.mrf.mxu0  ;;  %4754 = vmatmul.mubr.bf16.gmra.mxu0 %v8746_v61 }
 0x296   :  { %10779 = vst [vmem:[#allocation68_spill] sm:$0xff] %v9440_v3  ;;  %v3274_v14 = vpop.f32.mrf.mxu1  ;;  %v3082_v32 = vadd.f32 %v3081_v25, %v9039_v20  ;;  %4763 = vmatprep.mubr.bf16.mxu0 %v8798_v49  ;;  %5066 = vmatpush2.bf16.msra.mxu0 %v7615_v42 }
 0x297   :  { %v3083_v63 = vpop.f32.mrf.mxu0  ;;  %5067 = vmatprep.subr.bf16.mxu0 %v7623_v36 }
 0x298   :  { %v3276_v16 = vpop.f32.mrf.mxu1  ;;  %v9448_v31 = vadd.f32 %v3274_v14, %v3082_v32  ;;  %v3084_v28 = vadd.f32 %v3083_v63, %v9049_v15 }
 0x299   :  { %v3085_v6 = vpop.f32.mrf.mxu0 }
 0x29a   :  { %v3278_v3 = vpop.f32.mrf.mxu1  ;;  %v9451_v58 = vadd.f32 %v3276_v16, %v3084_v28  ;;  %v3086_v25 = vadd.f32 %v3085_v6, %v9039_v20  ;;  %5068 = vmatpush2.bf16.msra.mxu0 %v7621_v26 }
 0x29b   :  { %v9454_v49 = vpop.f32.mrf.mxu0 }
 0x29c   :  { %10780 = vst [vmem:[#allocation69_spill] sm:$0xff] %v9451_v58  ;;  %v9456_v42 = vpop.f32.mrf.mxu1  ;;  %v9458_v61 = vadd.f32 %v3278_v3, %v3086_v25 }
 0x29d   :  { %10781 = vst [vmem:[#allocation70_spill] sm:$0xff] %v9456_v42  ;;  %v3317_v59 = vpop.f32.mrf.mxu0  ;;  %4764 = vmatmul.mubr.bf16.gmra.mxu0 %v8788_v13 }
 0x29e   :  { %10782 = vst [vmem:[#allocation71_spill] sm:$0xff] %v9458_v61  ;;  %v3510_v8 = vpop.f32.mrf.mxu1  ;;  %v3318_v36 = vadd.f32 %v3317_v59, %v9064_v9  ;;  %4773 = vmatprep.mubr.bf16.mxu0 %v8840_v23 }
 0x29f   :  { %v3319_v14 = vpop.f32.mrf.mxu0 }
 0x2a0   :  { %v3512_v32 = vpop.f32.mrf.mxu1  ;;  %v3320_v63 = vadd.f32 %v3319_v14, %v9067_v27  ;;  %v3511_v16 = vadd.f32 %v3510_v8, %v3318_v36 }
 0x2a1   :  { %v3321_v20 = vpop.f32.mrf.mxu0 }
 0x2a2   :  { %v3514_v26 = vpop.f32.mrf.mxu1  ;;  %v3322_v28 = vadd.f32 %v3321_v20, %v9078_v55  ;;  %v3513_v25 = vadd.f32 %v3512_v32, %v3320_v63  ;;  %v3671_v9 = vmax.f32 %v3511_v16, 0.0 }
 0x2a3   :  { %v3323_v6 = vpop.f32.mrf.mxu0 }
 0x2a4   :  { %v3516_v3 = vpop.f32.mrf.mxu1  ;;  %v3515_v61 = vadd.f32 %v3514_v26, %v3322_v28  ;;  %v3324_v42 = vadd.f32 %v3323_v6, %v9087_v12  ;;  %v3672_v55 = vmax.f32 %v3513_v25, 0.0 }
 0x2a5   :  { %v3327_v13 = vpop.f32.mrf.mxu0  ;;  %4774 = vmatmul.mubr.bf16.gmra.mxu0 %v8830_v37 }
 0x2a6   :  { %v3520_v58 = vpop.f32.mrf.mxu1  ;;  %v3675_v59 = vmax.f32 %v3515_v61, 0.0  ;;  %v3517_v23 = vadd.f32 %v3516_v3, %v3324_v42  ;;  %v3328_v27 = vadd.f32 %v3327_v13, %v9097_v47  ;;  %4783 = vmatprep.mubr.bf16.mxu0 %v8882_v46  ;;  %v7573_v61 = vld [vmem:[%s10636_s3 + $0x2e8] ss:$16 sps:$4 sm:$0xff]   ;;  %v7584_v42 = vld [vmem:[%s10636_s3 + $0x2cc] ss:$16 sps:$4 sm:$0xff]  }
 0x2a7   :  { %v3329_v8 = vpop.f32.mrf.mxu0 }
 0x2a8   :  { %v3522_v36 = vpop.f32.mrf.mxu1  ;;  %v9469_v14 = vpack.c.bf16 %v3675_v59, %v3671_v9  ;;  %v3676_v32 = vmax.f32 %v3517_v23, 0.0  ;;  %v3330_v63 = vadd.f32 %v3329_v8, %v9103_v60  ;;  %v3521_v26 = vadd.f32 %v3520_v58, %v3328_v27 }
 0x2a9   :  { %v3331_v12 = vpop.f32.mrf.mxu0 }
 0x2aa   :  { %v3524_v20 = vpop.f32.mrf.mxu1  ;;  %v3332_v28 = vadd.f32 %v3331_v12, %v9106_v53  ;;  %v9473_v16 = vpack.c.bf16 %v3676_v32, %v3672_v55  ;;  %v3523_v23 = vadd.f32 %v3522_v36, %v3330_v63  ;;  %v3679_v3 = vmax.f32 %v3521_v26, 0.0  ;;  %v7593_v36 = vld [vmem:[%s10636_s3 + $0x2ac] ss:$16 sps:$4 sm:$0xff]  }
 0x2ab   :  { %v3333_v13 = vpop.f32.mrf.mxu0 }
 0x2ac   :  { %v3526_v47 = vpop.f32.mrf.mxu1  ;;  %v3525_v6 = vadd.f32 %v3524_v20, %v3332_v28  ;;  %v3334_v60 = vadd.f32 %v3333_v13, %v9115_v19  ;;  %4876 = vmatprep.mubr.bf16.mxu1 %v9473_v16  ;;  %v7582_v19 = vld [vmem:[%s10636_s3 + $0x2c8] ss:$16 sps:$4 sm:$0xff]   ;;  %v3680_v55 = vmax.f32 %v3523_v23, 0.0  ;;  %v7602_v23 = vld [vmem:[%s10636_s3 + $0x28c] ss:$16 sps:$4 sm:$0xff]  }
 0x2ad   :  { %v3337_v58 = vpop.f32.mrf.mxu0  ;;  %4784 = vmatmul.mubr.bf16.gmra.mxu0 %v8872_v2  ;;  %4877 = vmatmul.mubr.bf16.vlgmr.msra.gmra.mxu1 %v9469_v14  ;;  %v7591_v13 = vld [vmem:[%s10636_s3 + $0x2a8] ss:$16 sps:$4 sm:$0xff]  }
 0x2ae   :  { %v3530_v53 = vpop.f32.mrf.mxu1  ;;  %v3683_v25 = vmax.f32 %v3525_v6, 0.0  ;;  %v3527_v9 = vadd.f32 %v3526_v47, %v3334_v60  ;;  %v3338_v59 = vadd.f32 %v3337_v58, %v9122_v4  ;;  %4793 = vmatprep.mubr.bf16.mxu0 %v8924_v35  ;;  %5231 = vmatpush1.bf16.msra.mxu1 %v7573_v61 }
 0x2af   :  { %v3339_v27 = vpop.f32.mrf.mxu0  ;;  %5232 = vmatprep.subr.bf16.mxu1 %v7584_v42 }
 0x2b0   :  { %v3532_v8 = vpop.f32.mrf.mxu1  ;;  %v9493_v32 = vpack.c.bf16 %v3683_v25, %v3679_v3  ;;  %v3684_v63 = vmax.f32 %v3527_v9, 0.0  ;;  %v3340_v4 = vadd.f32 %v3339_v27, %v9125_v24  ;;  %v3531_v26 = vadd.f32 %v3530_v53, %v3338_v59  ;;  %v7611_v27 = vld [vmem:[%s10636_s3 + $0x26c] ss:$16 sps:$4 sm:$0xff]  }
 0x2b1   :  { %v3341_v12 = vpop.f32.mrf.mxu0 }
 0x2b2   :  { %v3534_v20 = vpop.f32.mrf.mxu1  ;;  %v3342_v28 = vadd.f32 %v3341_v12, %v9131_v41  ;;  %v9497_v61 = vpack.c.bf16 %v3684_v63, %v3680_v55  ;;  %5233 = vmatpush1.bf16.msra.mxu1 %v7582_v19  ;;  %v3533_v24 = vadd.f32 %v3532_v8, %v3340_v4  ;;  %v3687_v53 = vmax.f32 %v3531_v26, 0.0 }
 0x2b3   :  { %v3343_v47 = vpop.f32.mrf.mxu0  ;;  %5234 = vmatprep.subr.bf16.mxu1 %v7593_v36 }
 0x2b4   :  { %v3536_v42 = vpop.f32.mrf.mxu1  ;;  %v3535_v6 = vadd.f32 %v3534_v20, %v3342_v28  ;;  %v3344_v60 = vadd.f32 %v3343_v47, %v9140_v52  ;;  %4886 = vmatprep.mubr.bf16.mxu1 %v9497_v61  ;;  %v7600_v52 = vld [vmem:[%s10636_s3 + $0x288] ss:$16 sps:$4 sm:$0xff]   ;;  %v3688_v8 = vmax.f32 %v3533_v24, 0.0 }
 0x2b5   :  { %v3347_v41 = vpop.f32.mrf.mxu0  ;;  %4794 = vmatmul.mubr.bf16.gmra.mxu0 %v8914_v18  ;;  %4887 = vmatmul.mubr.bf16.gmra.mxu1 %v9493_v32  ;;  %v7609_v28 = vld [vmem:[%s10636_s3 + $0x268] ss:$16 sps:$4 sm:$0xff]  }
 0x2b6   :  { %v3540_v58 = vpop.f32.mrf.mxu1  ;;  %v3691_v3 = vmax.f32 %v3535_v6, 0.0  ;;  %v3537_v25 = vadd.f32 %v3536_v42, %v3344_v60  ;;  %v3348_v9 = vadd.f32 %v3347_v41, %v9147_v50  ;;  %4803 = vmatprep.mubr.bf16.mxu0 %v8963_v45  ;;  %5235 = vmatpush1.bf16.msra.mxu1 %v7591_v13  ;;  %v7620_v42 = vld [vmem:[%s10636_s3 + $0x24c] ss:$16 sps:$4 sm:$0xff]  }
 0x2b7   :  { %v3349_v59 = vpop.f32.mrf.mxu0  ;;  %5236 = vmatprep.subr.bf16.mxu1 %v7602_v23 }
 0x2b8   :  { %v3542_v19 = vpop.f32.mrf.mxu1  ;;  %v9517_v36 = vpack.c.bf16 %v3691_v3, %v3687_v53  ;;  %v3692_v55 = vmax.f32 %v3537_v25, 0.0  ;;  %v3350_v50 = vadd.f32 %v3349_v59, %v9150_v56  ;;  %v3541_v12 = vadd.f32 %v3540_v58, %v3348_v9  ;;  %v7626_v9 = vld [vmem:[%s10636_s3 + $0x22c] ss:$16 sps:$4 sm:$0xff]  }
 0x2b9   :  { %v3351_v63 = vpop.f32.mrf.mxu0 }
 0x2ba   :  { %v3544_v4 = vpop.f32.mrf.mxu1  ;;  %v3352_v20 = vadd.f32 %v3351_v63, %v9153_v62  ;;  %v9521_v26 = vpack.c.bf16 %v3692_v55, %v3688_v8  ;;  %5237 = vmatpush1.bf16.msra.mxu1 %v7600_v52  ;;  %v3543_v56 = vadd.f32 %v3542_v19, %v3350_v50  ;;  %v2978_v62 = vadd.f32 %v9175_v57, %v9049_v15  ;;  %v10783_v55 = vld [vmem:[#allocation14_spill] sm:$0xff] }
 0x2bb   :  { %v3353_v13 = vpop.f32.mrf.mxu0  ;;  %5238 = vmatprep.subr.bf16.mxu1 %v7611_v27  ;;  %v3695_v41 = vmax.f32 %v3541_v12, 0.0 }
 0x2bc   :  { %v3546_v47 = vpop.f32.mrf.mxu1  ;;  %v3545_v23 = vadd.f32 %v3544_v4, %v3352_v20  ;;  %v3354_v24 = vadd.f32 %v3353_v13, %v9162_v5  ;;  %4896 = vmatprep.mubr.bf16.mxu1 %v9521_v26  ;;  %v7618_v5 = vld [vmem:[%s10636_s3 + $0x248] ss:$16 sps:$4 sm:$0xff]   ;;  %v3696_v52 = vmax.f32 %v3543_v56, 0.0  ;;  %v3171_v50 = vadd.f32 %v10783_v55, %v2978_v62 }
 0x2bd   :  { %v3357_v6 = vpop.f32.mrf.mxu0  ;;  %4804 = vmatmul.mubr.bf16.gmra.mxu0 %v8953_v38  ;;  %4897 = vmatmul.mubr.bf16.gmra.mxu1 %v9517_v36  ;;  %v10784_v4 = vld [vmem:[#allocation15_spill] sm:$0xff] }
 0x2be   :  { %v3550_v60 = vpop.f32.mrf.mxu1  ;;  %v3699_v58 = vmax.f32 %v3545_v23, 0.0  ;;  %v3547_v53 = vadd.f32 %v3546_v47, %v3354_v24  ;;  %v3358_v3 = vadd.f32 %v3357_v6, %v9169_v40  ;;  %4813 = vmatprep.mubr.bf16.mxu0 %v8999_v54  ;;  %5239 = vmatpush1.bf16.msra.mxu1 %v7609_v28  ;;  %v7624_v28 = vld [vmem:[%s10636_s3 + $0x228] ss:$16 sps:$4 sm:$0xff]   ;;  %v2988_v24 = vadd.f32 %v9198_v33, %v9049_v15 }
 0x2bf   :  { %v3359_v25 = vpop.f32.mrf.mxu0  ;;  %5240 = vmatprep.subr.bf16.mxu1 %v7620_v42 }
 0x2c0   :  { %v3552_v57 = vpop.f32.mrf.mxu1  ;;  %v9543_v59 = vpack.c.bf16 %v3699_v58, %v3695_v41  ;;  %v3700_v19 = vmax.f32 %v3547_v53, 0.0  ;;  %v3360_v40 = vadd.f32 %v3359_v25, %v9172_v44  ;;  %v3551_v63 = vadd.f32 %v3550_v60, %v3358_v3  ;;  %v7629_v44 = vld [vmem:[%s10636_s3 + $0x20c] ss:$16 sps:$4 sm:$0xff]   ;;  %v10786_v3 = vld [vmem:[#allocation16_spill] sm:$0xff] }
 0x2c1   :  { %v3361_v27 = vpop.f32.mrf.mxu0  ;;  %v10785_v60 = vld [vmem:[#allocation9_spill] sm:$0xff]  ;;  %v10787_v25 = vld [vmem:[#allocation11_spill] sm:$0xff] }
 0x2c2   :  { %v3554_v8 = vpop.f32.mrf.mxu1  ;;  %v3362_v12 = vadd.f32 %v3361_v27, %v10784_v4  ;;  %v9548_v20 = vpack.c.bf16 %v3700_v19, %v3696_v52  ;;  %5241 = vmatpush1.bf16.msra.mxu1 %v7618_v5  ;;  %v3553_v42 = vadd.f32 %v3552_v57, %v3360_v40  ;;  %v3703_v41 = vmax.f32 %v3551_v63, 0.0  ;;  %v7627_v57 = vld [vmem:[%s10636_s3 + $0x208] ss:$16 sps:$4 sm:$0xff]   ;;  %v7632_v52 = vld [vmem:[%s10636_s3 + $0x3ec] ss:$16 sps:$4 sm:$0xff]   ;;  %v10789_v4 = vld [vmem:[#allocation18_spill] sm:$0xff] }
 0x2c3   :  { %v3363_v13 = vpop.f32.mrf.mxu0  ;;  %5242 = vmatprep.subr.bf16.mxu1 %v7626_v9 }
 0x2c4   :  { %v3556_v47 = vpop.f32.mrf.mxu1  ;;  %v3555_v56 = vadd.f32 %v3554_v8, %v3362_v12  ;;  %v3364_v23 = vadd.f32 %v3363_v13, %v3171_v50  ;;  %4906 = vmatprep.mubr.bf16.mxu1 %v9548_v20  ;;  %v3704_v19 = vmax.f32 %v3553_v42, 0.0  ;;  %v10788_v8 = vld [vmem:[#allocation17_spill] sm:$0xff]  ;;  %v3181_v12 = vadd.f32 %v10789_v4, %v2988_v24  ;;  %v10790_v13 = vld [vmem:[#allocation19_spill] sm:$0xff] }
 0x2c5   :  { %v3367_v62 = vpop.f32.mrf.mxu0  ;;  %4814 = vmatmul.mubr.bf16.gmra.mxu0 %v10785_v60  ;;  %4907 = vmatmul.mubr.bf16.gmra.mxu1 %v9543_v59 }
 0x2c6   :  { %v3560_v6 = vpop.f32.mrf.mxu1  ;;  %v3707_v58 = vmax.f32 %v3555_v56, 0.0  ;;  %v3557_v53 = vadd.f32 %v3556_v47, %v3364_v23  ;;  %v3368_v5 = vadd.f32 %v3367_v62, %v10786_v3  ;;  %4823 = vmatprep.mubr.bf16.mxu0 %v10787_v25  ;;  %5243 = vmatpush1.bf16.msra.mxu1 %v7624_v28  ;;  %v7635_v62 = vld [vmem:[%s10636_s3 + $0x3cc] ss:$16 sps:$4 sm:$0xff]  }
 0x2c7   :  { %v3369_v9 = vpop.f32.mrf.mxu0  ;;  %5244 = vmatprep.subr.bf16.mxu1 %v7629_v44  ;;  %v7630_v44 = vld [vmem:[%s10636_s3 + $0x3e8] ss:$16 sps:$4 sm:$0xff]  }
 0x2c8   :  { %v3562_v33 = vpop.f32.mrf.mxu1  ;;  %v9569_v40 = vpack.c.bf16 %v3707_v58, %v3703_v41  ;;  %v3708_v27 = vmax.f32 %v3557_v53, 0.0  ;;  %v3370_v55 = vadd.f32 %v3369_v9, %v10788_v8  ;;  %v3561_v28 = vadd.f32 %v3560_v6, %v3368_v5  ;;  %v10791_v5 = vld [vmem:[#allocation10_spill] sm:$0xff] }
 0x2c9   :  { %v3371_v50 = vpop.f32.mrf.mxu0  ;;  %v2998_v6 = vadd.f32 %v9221_v7, %v9049_v15 }
 0x2ca   :  { %v3564_v63 = vpop.f32.mrf.mxu1  ;;  %v3372_v47 = vadd.f32 %v3371_v50, %v10790_v13  ;;  %v9574_v56 = vpack.c.bf16 %v3708_v27, %v3704_v19  ;;  %5245 = vmatpush1.bf16.msra.mxu1 %v7627_v57  ;;  %v3563_v41 = vadd.f32 %v3562_v33, %v3370_v55  ;;  %v3711_v57 = vmax.f32 %v3561_v28, 0.0  ;;  %v10792_v27 = vld [vmem:[#allocation13_spill] sm:$0xff] }
 0x2cb   :  { %v3373_v42 = vpop.f32.mrf.mxu0  ;;  %5246 = vmatprep.subr.bf16.mxu1 %v7632_v52  ;;  %v7633_v33 = vld [vmem:[%s10636_s3 + $0x3c8] ss:$16 sps:$4 sm:$0xff]   ;;  %v7638_v55 = vld [vmem:[%s10636_s3 + $0x3ac] ss:$16 sps:$4 sm:$0xff]  }
 0x2cc   :  { %v3566_v23 = vpop.f32.mrf.mxu1  ;;  %v3565_v58 = vadd.f32 %v3564_v63, %v3372_v47  ;;  %v3374_v24 = vadd.f32 %v3373_v42, %v3181_v12  ;;  %4916 = vmatprep.mubr.bf16.mxu1 %v9574_v56  ;;  %v3712_v50 = vmax.f32 %v3563_v41, 0.0  ;;  %v10794_v12 = vld [vmem:[#allocation20_spill] sm:$0xff]  ;;  %v10795_v47 = vld [vmem:[#allocation21_spill] sm:$0xff] }
 0x2cd   :  { %v3377_v53 = vpop.f32.mrf.mxu0  ;;  %4824 = vmatmul.mubr.bf16.gmra.mxu0 %v10791_v5  ;;  %4917 = vmatmul.mubr.bf16.gmra.mxu1 %v9569_v40 }
 0x2ce   :  { %v3570_v3 = vpop.f32.mrf.mxu1  ;;  %v3715_v9 = vmax.f32 %v3565_v58, 0.0  ;;  %v3567_v52 = vadd.f32 %v3566_v23, %v3374_v24  ;;  %v3378_v19 = vadd.f32 %v3377_v53, %v9215_v21  ;;  %4833 = vmatprep.mubr.bf16.mxu0 %v10792_v27  ;;  %5247 = vmatpush2.bf16.msra.mxu1 %v7630_v44  ;;  %v3191_v44 = vadd.f32 %v10795_v47, %v2998_v6  ;;  %v10796_v23 = vld [vmem:[#allocation22_spill] sm:$0xff]  ;;  %v10799_v47 = vld [vmem:[#allocation28_spill] sm:$0xff] }
 0x2cf   :  { %v3379_v8 = vpop.f32.mrf.mxu0  ;;  %5248 = vmatprep.subr.bf16.mxu1 %v7635_v62  ;;  %v7636_v62 = vld [vmem:[%s10636_s3 + $0x3a8] ss:$16 sps:$4 sm:$0xff]  }
 0x2d0   :  { %v3572_v7 = vpop.f32.mrf.mxu1  ;;  %v9595_v63 = vpack.c.bf16 %v3715_v9, %v3711_v57  ;;  %v3716_v4 = vmax.f32 %v3567_v52, 0.0  ;;  %v3380_v21 = vadd.f32 %v3379_v8, %v10794_v12  ;;  %v3571_v42 = vadd.f32 %v3570_v3, %v3378_v19  ;;  %v7641_v57 = vld [vmem:[%s10636_s3 + $0x38c] ss:$16 sps:$4 sm:$0xff]   ;;  %v10797_v8 = vld [vmem:[#allocation12_spill] sm:$0xff] }
 0x2d1   :  { %v3381_v28 = vpop.f32.mrf.mxu0  ;;  %v3008_v3 = vadd.f32 %v9244_v0, %v9049_v15  ;;  %v10798_v12 = vld [vmem:[#allocation23_spill] sm:$0xff] }
 0x2d2   :  { %10793 = vst [vmem:[#allocation14_spill] sm:$0xff] %v9595_v63  ;;  %v3574_v13 = vpop.f32.mrf.mxu1  ;;  %v3382_v58 = vadd.f32 %v3381_v28, %v10796_v23  ;;  %v9600_v24 = vpack.c.bf16 %v3716_v4, %v3712_v50  ;;  %5249 = vmatpush2.bf16.msra.mxu1 %v7633_v33  ;;  %v3573_v9 = vadd.f32 %v3572_v7, %v3380_v21  ;;  %v3719_v50 = vmax.f32 %v3571_v42, 0.0  ;;  %v7639_v7 = vld [vmem:[%s10636_s3 + $0x388] ss:$16 sps:$4 sm:$0xff]  }
 0x2d3   :  { %v3383_v41 = vpop.f32.mrf.mxu0  ;;  %5250 = vmatprep.subr.bf16.mxu1 %v7638_v55 }
 0x2d4   :  { %v3576_v53 = vpop.f32.mrf.mxu1  ;;  %v3575_v52 = vadd.f32 %v3574_v13, %v3382_v58  ;;  %v3384_v6 = vadd.f32 %v3383_v41, %v3191_v44  ;;  %4926 = vmatprep.mubr.bf16.mxu1 %v9600_v24  ;;  %v7644_v13 = vld [vmem:[%s10636_s3 + $0x36c] ss:$16 sps:$4 sm:$0xff]   ;;  %v3720_v44 = vmax.f32 %v3573_v9, 0.0  ;;  %v10801_v58 = vld [vmem:[#allocation24_spill] sm:$0xff] }
 0x2d5   :  { %v3387_v19 = vpop.f32.mrf.mxu0  ;;  %4834 = vmatmul.mubr.bf16.gmra.mxu0 %v10797_v8  ;;  %4927 = vmatmul.mubr.bf16.gmra.mxu1 %v9595_v63 }
 0x2d6   :  { %v3580_v33 = vpop.f32.mrf.mxu1  ;;  %v3723_v55 = vmax.f32 %v3575_v52, 0.0  ;;  %v3577_v4 = vadd.f32 %v3576_v53, %v3384_v6  ;;  %v3388_v28 = vadd.f32 %v3387_v19, %v10798_v12  ;;  %5069 = vmatprep.mubr.bf16.mxu0 %v10799_v47  ;;  %5251 = vmatpush2.bf16.msra.mxu1 %v7636_v62  ;;  %v7654_v62 = vld [vmem:[#allocation4 + $0x78] sm:$0xff]   ;;  %v10802_v6 = vld [vmem:[#allocation25_spill] sm:$0xff]  ;;  %v10803_v47 = vld [vmem:[#allocation26_spill] sm:$0xff] }
 0x2d7   :  { %v3389_v21 = vpop.f32.mrf.mxu0  ;;  %5252 = vmatprep.subr.bf16.mxu1 %v7641_v57  ;;  %v3201_v19 = vadd.f32 %v10802_v6, %v3008_v3  ;;  %v7642_v57 = vld [vmem:[%s10636_s3 + $0x368] ss:$16 sps:$4 sm:$0xff]   ;;  %6735 = vmatprep.subr.bf16.mxu0 %v7654_v62 }
 0x2d8   :  { %v3582_v0 = vpop.f32.mrf.mxu1  ;;  %v9621_v42 = vpack.c.bf16 %v3723_v55, %v3719_v50  ;;  %v3724_v23 = vmax.f32 %v3577_v4, 0.0  ;;  %v3390_v41 = vadd.f32 %v3389_v21, %v10801_v58  ;;  %v3581_v12 = vadd.f32 %v3580_v33, %v3388_v28  ;;  %v7647_v55 = vld [vmem:[%s10636_s3 + $0x34c] ss:$16 sps:$4 sm:$0xff]  }
 0x2d9   :  { %v3391_v53 = vpop.f32.mrf.mxu0  ;;  %v7655_v4 = vld [vmem:[#allocation4 + $0x38] sm:$0xff]  }
 0x2da   :  { %10800 = vst [vmem:[#allocation15_spill] sm:$0xff] %v9621_v42  ;;  %v3584_v52 = vpop.f32.mrf.mxu1  ;;  %v3392_v63 = vadd.f32 %v3391_v53, %v10803_v47  ;;  %v9626_v8 = vpack.c.bf16 %v3724_v23, %v3720_v44  ;;  %5253 = vmatpush2.bf16.msra.mxu1 %v7639_v7  ;;  %v3583_v3 = vadd.f32 %v3582_v0, %v3390_v41  ;;  %v10805_v23 = vld [vmem:[#allocation27_spill] sm:$0xff]  ;;  %v3727_v58 = vmax.f32 %v3581_v12, 0.0  ;;  %v10806_v0 = vld [vmem:[#allocation30_spill] sm:$0xff] }
 0x2db   :  { %v3393_v9 = vpop.f32.mrf.mxu0  ;;  %5254 = vmatprep.subr.bf16.mxu1 %v7644_v13  ;;  %v3018_v7 = vadd.f32 %v9271_v30, %v9049_v15  ;;  %v7656_v13 = vld [vmem:[#allocation4 + $0x70] sm:$0xff]  }
 0x2dc   :  { %10804 = vst [vmem:[#allocation9_spill] sm:$0xff] %v9626_v8  ;;  %v3586_v50 = vpop.f32.mrf.mxu1  ;;  %v3585_v33 = vadd.f32 %v3584_v52, %v3392_v63  ;;  %v3394_v28 = vadd.f32 %v3393_v9, %v3201_v19  ;;  %4936 = vmatprep.mubr.bf16.mxu1 %v9626_v8  ;;  %v7645_v63 = vld [vmem:[%s10636_s3 + $0x348] ss:$16 sps:$4 sm:$0xff]   ;;  %v7650_v52 = vld [vmem:[%s10636_s3 + $0x32c] ss:$16 sps:$4 sm:$0xff]   ;;  %v7657_v19 = vld [vmem:[#allocation4 + $0x30] sm:$0xff]  }
 0x2dd   :  { %v3397_v21 = vpop.f32.mrf.mxu0  ;;  %4937 = vmatmul.mubr.bf16.gmra.mxu1 %v9621_v42  ;;  %5070 = vmatmul.mubr.bf16.vlgmr.msra.gmra.mxu0 %v10805_v23  ;;  %v3728_v12 = vmax.f32 %v3583_v3, 0.0  ;;  %v10807_v9 = vld [vmem:[#allocation46_spill] sm:$0xff] }
 0x2de   :  { %v3590_v44 = vpop.f32.mrf.mxu1  ;;  %v3731_v53 = vmax.f32 %v3585_v33, 0.0  ;;  %v3587_v6 = vadd.f32 %v3586_v50, %v3394_v28  ;;  %v3398_v62 = vadd.f32 %v3397_v21, %v9262_v1  ;;  %5079 = vmatprep.mubr.bf16.mxu0 %v10806_v0  ;;  %5255 = vmatpush2.bf16.msra.mxu1 %v7642_v57  ;;  %v7658_v28 = vld [vmem:[#allocation4 + $0x68] sm:$0xff]   ;;  %v10808_v21 = vld [vmem:[#allocation47_spill] sm:$0xff] }
 0x2df   :  { %v3399_v30 = vpop.f32.mrf.mxu0  ;;  %5256 = vmatprep.subr.bf16.mxu1 %v7647_v55  ;;  %6736 = vmatpush3.bf16.msra.mxu0 %v7655_v4  ;;  %v3211_v23 = vadd.f32 %v10808_v21, %v3018_v7  ;;  %v10809_v55 = vld [vmem:[#allocation48_spill] sm:$0xff]  ;;  %v7648_v4 = vld [vmem:[%s10636_s3 + $0x328] ss:$16 sps:$4 sm:$0xff]  }
 0x2e0   :  { %v3592_v41 = vpop.f32.mrf.mxu1  ;;  %v9647_v47 = vpack.c.bf16 %v3731_v53, %v3727_v58  ;;  %v3732_v1 = vmax.f32 %v3587_v6, 0.0  ;;  %v3400_v50 = vadd.f32 %v3399_v30, %v10807_v9  ;;  %6737 = vmatprep.subr.bf16.mxu0 %v7656_v13  ;;  %v3591_v0 = vadd.f32 %v3590_v44, %v3398_v62  ;;  %v7653_v13 = vld [vmem:[%s10636_s3 + $0x30c] ss:$16 sps:$4 sm:$0xff]  }
 0x2e1   :  { %v3401_v57 = vpop.f32.mrf.mxu0  ;;  %v7659_v53 = vld [vmem:[#allocation4 + $0x28] sm:$0xff]   ;;  %v3028_v62 = vadd.f32 %v9298_v22, %v9049_v15 }
 0x2e2   :  { %v3594_v33 = vpop.f32.mrf.mxu1  ;;  %v3402_v42 = vadd.f32 %v3401_v57, %v10809_v55  ;;  %v9652_v8 = vpack.c.bf16 %v3732_v1, %v3728_v12  ;;  %5257 = vmatpush2.bf16.msra.mxu1 %v7645_v63  ;;  %v3593_v7 = vadd.f32 %v3592_v41, %v3400_v50  ;;  %v7660_v12 = vld [vmem:[#allocation4 + $0x60] sm:$0xff]   ;;  %v3735_v1 = vmax.f32 %v3591_v0, 0.0  ;;  %v7651_v50 = vld [vmem:[%s10636_s3 + $0x308] ss:$16 sps:$4 sm:$0xff]  }
 0x2e3   :  { %v3403_v3 = vpop.f32.mrf.mxu0  ;;  %5258 = vmatprep.subr.bf16.mxu1 %v7650_v52  ;;  %6738 = vmatpush3.bf16.msra.mxu0 %v7657_v19  ;;  %v10810_v52 = vld [vmem:[#allocation29_spill] sm:$0xff] }
 0x2e4   :  { %v3596_v58 = vpop.f32.mrf.mxu1  ;;  %v3595_v44 = vadd.f32 %v3594_v33, %v3402_v42  ;;  %v3404_v6 = vadd.f32 %v3403_v3, %v3211_v23  ;;  %4946 = vmatprep.mubr.bf16.mxu1 %v9652_v8  ;;  %6739 = vmatprep.subr.bf16.mxu0 %v7658_v28  ;;  %v10811_v42 = vld [vmem:[#allocation32_spill] sm:$0xff]  ;;  %v3736_v28 = vmax.f32 %v3593_v7, 0.0  ;;  %v10812_v0 = vld [vmem:[#allocation49_spill] sm:$0xff]  ;;  %v7663_v7 = vld [vmem:[#allocation4 + $0x18] sm:$0xff]  }
 0x2e5   :  { %v3407_v63 = vpop.f32.mrf.mxu0  ;;  %4947 = vmatmul.mubr.bf16.gmra.mxu1 %v9647_v47  ;;  %5080 = vmatmul.mubr.bf16.gmra.mxu0 %v10810_v52  ;;  %v7661_v33 = vld [vmem:[#allocation4 + $0x20] sm:$0xff]  }
 0x2e6   :  { %v3600_v30 = vpop.f32.mrf.mxu1  ;;  %v3739_v9 = vmax.f32 %v3595_v44, 0.0  ;;  %v3597_v19 = vadd.f32 %v3596_v58, %v3404_v6  ;;  %v3408_v41 = vadd.f32 %v3407_v63, %v9289_v39  ;;  %5089 = vmatprep.mubr.bf16.mxu0 %v10811_v42  ;;  %5259 = vmatpush2.bf16.msra.mxu1 %v7648_v4  ;;  %v7662_v58 = vld [vmem:[#allocation4 + $0x58] sm:$0xff]   ;;  %v10813_v4 = vld [vmem:[#allocation50_spill] sm:$0xff] }
 0x2e7   :  { %v3409_v22 = vpop.f32.mrf.mxu0  ;;  %5260 = vmatprep.subr.bf16.mxu1 %v7653_v13  ;;  %6740 = vmatpush3.bf16.msra.mxu0 %v7659_v53  ;;  %v3221_v44 = vadd.f32 %v10813_v4, %v3028_v62  ;;  %v10814_v63 = vld [vmem:[#allocation51_spill] sm:$0xff]  ;;  %v10817_v4 = vld [vmem:[#allocation52_spill] sm:$0xff] }
 0x2e8   :  { %v3602_v57 = vpop.f32.mrf.mxu1  ;;  %v9670_v21 = vpack.c.bf16 %v3739_v9, %v3735_v1  ;;  %v3740_v23 = vmax.f32 %v3597_v19, 0.0  ;;  %v3410_v55 = vadd.f32 %v3409_v22, %v10812_v0  ;;  %6741 = vmatprep.subr.bf16.mxu0 %v7660_v12  ;;  %v3601_v6 = vadd.f32 %v3600_v30, %v3408_v41  ;;  %v10815_v41 = vld [vmem:[#allocation31_spill] sm:$0xff] }
 0x2e9   :  { %v3411_v39 = vpop.f32.mrf.mxu0  ;;  %v3038_v12 = vadd.f32 %v9325_v10, %v9049_v15 }
 0x2ea   :  { %v3604_v3 = vpop.f32.mrf.mxu1  ;;  %v3412_v52 = vadd.f32 %v3411_v39, %v10814_v63  ;;  %v9675_v42 = vpack.c.bf16 %v3740_v23, %v3736_v28  ;;  %5261 = vmatpush2.bf16.msra.mxu1 %v7651_v50  ;;  %v3603_v1 = vadd.f32 %v3602_v57, %v3410_v55  ;;  %v7664_v50 = vld [vmem:[#allocation4 + $0x50] sm:$0xff]   ;;  %v3743_v22 = vmax.f32 %v3601_v6, 0.0  ;;  %v7666_v6 = vld [vmem:[#allocation4 + $0x48] sm:$0xff]  }
 0x2eb   :  { %v3413_v13 = vpop.f32.mrf.mxu0  ;;  %6742 = vmatpush3.bf16.msra.mxu0 %v7661_v33  ;;  %v10816_v23 = vld [vmem:[#allocation34_spill] sm:$0xff] }
 0x2ec   :  { %v3606_v53 = vpop.f32.mrf.mxu1  ;;  %v3605_v9 = vadd.f32 %v3604_v3, %v3412_v52  ;;  %v3414_v19 = vadd.f32 %v3413_v13, %v3221_v44  ;;  %4956 = vmatprep.mubr.bf16.mxu1 %v9675_v42  ;;  %6743 = vmatprep.subr.bf16.mxu0 %v7662_v58  ;;  %v7665_v39 = vld [vmem:[#allocation4 + $0x10] sm:$0xff]   ;;  %v3744_v3 = vmax.f32 %v3603_v1, 0.0  ;;  %v10818_v13 = vld [vmem:[#allocation53_spill] sm:$0xff] }
 0x2ed   :  { %v3417_v62 = vpop.f32.mrf.mxu0  ;;  %4957 = vmatmul.mubr.bf16.gmra.mxu1 %v9670_v21  ;;  %5090 = vmatmul.mubr.bf16.gmra.mxu0 %v10815_v41  ;;  %v7667_v1 = vld [vmem:[#allocation4 + $0x8] sm:$0xff]  }
 0x2ee   :  { %v3610_v30 = vpop.f32.mrf.mxu1  ;;  %v3747_v28 = vmax.f32 %v3605_v9, 0.0  ;;  %v3607_v33 = vadd.f32 %v3606_v53, %v3414_v19  ;;  %v3418_v57 = vadd.f32 %v3417_v62, %v9316_v43  ;;  %5099 = vmatprep.mubr.bf16.mxu0 %v10816_v23  ;;  %v3231_v53 = vadd.f32 %v10818_v13, %v3038_v12  ;;  %v10819_v43 = vld [vmem:[#allocation54_spill] sm:$0xff]  ;;  %v10822_v13 = vld [vmem:[#allocation55_spill] sm:$0xff] }
 0x2ef   :  { %v3419_v0 = vpop.f32.mrf.mxu0  ;;  %6744 = vmatpush3.bf16.msra.mxu0 %v7663_v7 }
 0x2f0   :  { %v3612_v55 = vpop.f32.mrf.mxu1  ;;  %v9684_v10 = vpack.c.bf16 %v3747_v28, %v3743_v22  ;;  %v3748_v58 = vmax.f32 %v3607_v33, 0.0  ;;  %v3420_v44 = vadd.f32 %v3419_v0, %v10817_v4  ;;  %6745 = vmatprep.subr.bf16.mxu0 %v7664_v50  ;;  %v3611_v9 = vadd.f32 %v3610_v30, %v3418_v57  ;;  %v10820_v30 = vld [vmem:[#allocation33_spill] sm:$0xff]  ;;  %v7668_v57 = vld [vmem:[#allocation4 + $0x40] sm:$0xff]  }
 0x2f1   :  { %v3421_v63 = vpop.f32.mrf.mxu0  ;;  %v3048_v50 = vadd.f32 %v9352_v17, %v9049_v15 }
 0x2f2   :  { %v3614_v52 = vpop.f32.mrf.mxu1  ;;  %v3422_v19 = vadd.f32 %v3421_v63, %v10819_v43  ;;  %v9689_v62 = vpack.c.bf16 %v3748_v58, %v3744_v3  ;;  %v3613_v22 = vadd.f32 %v3612_v55, %v3420_v44  ;;  %v3751_v0 = vmax.f32 %v3611_v9, 0.0  ;;  %v10821_v58 = vld [vmem:[#allocation36_spill] sm:$0xff] }
 0x2f3   :  { %v3423_v41 = vpop.f32.mrf.mxu0  ;;  %6746 = vmatpush3.bf16.msra.mxu0 %v7665_v39  ;;  %v7669_v63 = vld [vmem:[#allocation4] sm:$0xff]  }
 0x2f4   :  { %v3616_v7 = vpop.f32.mrf.mxu1  ;;  %v3615_v28 = vadd.f32 %v3614_v52, %v3422_v19  ;;  %v3424_v33 = vadd.f32 %v3423_v41, %v3231_v53  ;;  %4966 = vmatprep.mubr.bf16.mxu1 %v9689_v62  ;;  %6747 = vmatprep.subr.bf16.mxu0 %v7666_v6  ;;  %v3752_v52 = vmax.f32 %v3613_v22, 0.0  ;;  %v10823_v9 = vld [vmem:[#allocation56_spill] sm:$0xff] }
 0x2f5   :  { %v3427_v23 = vpop.f32.mrf.mxu0  ;;  %4967 = vmatmul.mubr.bf16.gmra.mxu1 %v9684_v10  ;;  %5100 = vmatmul.mubr.bf16.gmra.mxu0 %v10820_v30  ;;  %v3241_v41 = vadd.f32 %v10823_v9, %v3048_v50  ;;  %v10825_v50 = vld [vmem:[#allocation35_spill] sm:$0xff] }
 0x2f6   :  { %v3620_v12 = vpop.f32.mrf.mxu1  ;;  %v3755_v3 = vmax.f32 %v3615_v28, 0.0  ;;  %v3617_v39 = vadd.f32 %v3616_v7, %v3424_v33  ;;  %v3428_v55 = vadd.f32 %v3427_v23, %v9343_v34  ;;  %5109 = vmatprep.mubr.bf16.mxu0 %v10821_v58  ;;  %v10824_v28 = vld [vmem:[#allocation57_spill] sm:$0xff] }
 0x2f7   :  { %v3429_v4 = vpop.f32.mrf.mxu0  ;;  %6748 = vmatpush3.bf16.msra.mxu0 %v7667_v1 }
 0x2f8   :  { %v3622_v44 = vpop.f32.mrf.mxu1  ;;  %v9698_v17 = vpack.c.bf16 %v3755_v3, %v3751_v0  ;;  %v3756_v6 = vmax.f32 %v3617_v39, 0.0  ;;  %v3430_v53 = vadd.f32 %v3429_v4, %v10822_v13  ;;  %6749 = vmatprep.subr.bf16.mxu0 %v7668_v57  ;;  %v3621_v7 = vadd.f32 %v3620_v12, %v3428_v55 }
 0x2f9   :  { %v3431_v43 = vpop.f32.mrf.mxu0  ;;  %v3058_v57 = vadd.f32 %v9379_v48, %v9049_v15 }
 0x2fa   :  { %v3624_v19 = vpop.f32.mrf.mxu1  ;;  %v3432_v34 = vadd.f32 %v3431_v43, %v10824_v28  ;;  %v9703_v33 = vpack.c.bf16 %v3756_v6, %v3752_v52  ;;  %v3623_v1 = vadd.f32 %v3622_v44, %v3430_v53  ;;  %v3759_v12 = vmax.f32 %v3621_v7, 0.0  ;;  %v7670_v44 = vld [vmem:[#allocation4 + $0xf8] sm:$0xff]   ;;  %v10827_v43 = vld [vmem:[#allocation58_spill] sm:$0xff] }
 0x2fb   :  { %v3433_v23 = vpop.f32.mrf.mxu0  ;;  %6750 = vmatpush3.bf16.msra.mxu0 %v7669_v63  ;;  %v10826_v63 = vld [vmem:[#allocation38_spill] sm:$0xff]  ;;  %6847 = vmatprep.subr.bf16.mxu1 %v7670_v44  ;;  %v10828_v28 = vld [vmem:[#allocation59_spill] sm:$0xff] }
 0x2fc   :  { %v3626_v30 = vpop.f32.mrf.mxu1  ;;  %v3625_v22 = vadd.f32 %v3624_v19, %v3432_v34  ;;  %v3434_v0 = vadd.f32 %v3433_v23, %v3241_v41  ;;  %4976 = vmatprep.mubr.bf16.mxu1 %v9703_v33  ;;  %v3760_v13 = vmax.f32 %v3623_v1, 0.0  ;;  %v3251_v7 = vadd.f32 %v10828_v28, %v3058_v57  ;;  %v10829_v23 = vld [vmem:[#allocation60_spill] sm:$0xff]  ;;  %v10830_v57 = vld [vmem:[#allocation37_spill] sm:$0xff] }
 0x2fd   :  { %v3437_v3 = vpop.f32.mrf.mxu0  ;;  %4977 = vmatmul.mubr.bf16.gmra.mxu1 %v9698_v17  ;;  %5110 = vmatmul.mubr.bf16.gmra.mxu0 %v10825_v50 }
 0x2fe   :  { %v3630_v39 = vpop.f32.mrf.mxu1  ;;  %v3763_v55 = vmax.f32 %v3625_v22, 0.0  ;;  %v3627_v58 = vadd.f32 %v3626_v30, %v3434_v0  ;;  %v3438_v4 = vadd.f32 %v3437_v3, %v9370_v29  ;;  %5119 = vmatprep.mubr.bf16.mxu0 %v10826_v63 }
 0x2ff   :  { %v3439_v52 = vpop.f32.mrf.mxu0 }
 0x300   :  { %v3632_v6 = vpop.f32.mrf.mxu1  ;;  %v9712_v53 = vpack.c.bf16 %v3763_v55, %v3759_v12  ;;  %v3764_v48 = vmax.f32 %v3627_v58, 0.0  ;;  %v3440_v19 = vadd.f32 %v3439_v52, %v10827_v43  ;;  %v3631_v34 = vadd.f32 %v3630_v39, %v3438_v4  ;;  %v10831_v52 = vld [vmem:[#allocation40_spill] sm:$0xff] }
 0x301   :  { %v3441_v9 = vpop.f32.mrf.mxu0  ;;  %v3068_v12 = vadd.f32 %v9406_v11, %v9049_v15  ;;  %v10833_v11 = vld [vmem:[#allocation61_spill] sm:$0xff] }
 0x302   :  { %v3634_v41 = vpop.f32.mrf.mxu1  ;;  %v3442_v30 = vadd.f32 %v3441_v9, %v10829_v23  ;;  %v9717_v29 = vpack.c.bf16 %v3764_v48, %v3760_v13  ;;  %v3633_v3 = vadd.f32 %v3632_v6, %v3440_v19  ;;  %v3767_v39 = vmax.f32 %v3631_v34, 0.0  ;;  %v10835_v34 = vld [vmem:[#allocation63_spill] sm:$0xff] }
 0x303   :  { %v3443_v22 = vpop.f32.mrf.mxu0 }
 0x304   :  { %v3636_v0 = vpop.f32.mrf.mxu1  ;;  %v3635_v50 = vadd.f32 %v3634_v41, %v3442_v30  ;;  %v3444_v1 = vadd.f32 %v3443_v22, %v3251_v7  ;;  %4986 = vmatprep.mubr.bf16.mxu1 %v9717_v29  ;;  %v3768_v48 = vmax.f32 %v3633_v3, 0.0  ;;  %v10834_v7 = vld [vmem:[#allocation62_spill] sm:$0xff] }
 0x305   :  { %v3447_v55 = vpop.f32.mrf.mxu0  ;;  %4987 = vmatmul.mubr.bf16.gmra.mxu1 %v9712_v53  ;;  %5120 = vmatmul.mubr.bf16.gmra.mxu0 %v10830_v57  ;;  %v3261_v23 = vadd.f32 %v10834_v7, %v3068_v12  ;;  %v10836_v3 = vld [vmem:[#allocation66_spill] sm:$0xff]  ;;  %v10837_v12 = vld [vmem:[#allocation39_spill] sm:$0xff]  ;;  %v10840_v7 = vld [vmem:[#allocation65_spill] sm:$0xff] }
 0x306   :  { %v3640_v58 = vpop.f32.mrf.mxu1  ;;  %v3771_v4 = vmax.f32 %v3635_v50, 0.0  ;;  %v3637_v63 = vadd.f32 %v3636_v0, %v3444_v1  ;;  %v3448_v44 = vadd.f32 %v3447_v55, %v9397_v51  ;;  %5129 = vmatprep.mubr.bf16.mxu0 %v10831_v52 }
 0x307   :  { %v3449_v6 = vpop.f32.mrf.mxu0 }
 0x308   :  { %v3642_v13 = vpop.f32.mrf.mxu1  ;;  %v9726_v43 = vpack.c.bf16 %v3771_v4, %v3767_v39  ;;  %v3772_v19 = vmax.f32 %v3637_v63, 0.0  ;;  %v3450_v9 = vadd.f32 %v3449_v6, %v10833_v11  ;;  %v3641_v30 = vadd.f32 %v3640_v58, %v3448_v44  ;;  %v10838_v6 = vld [vmem:[#allocation64_spill] sm:$0xff] }
 0x309   :  { %v3451_v41 = vpop.f32.mrf.mxu0  ;;  %v3078_v39 = vadd.f32 %v10836_v3, %v9049_v15 }
 0x30a   :  { %10832 = vst [vmem:[#allocation16_spill] sm:$0xff] %v9726_v43  ;;  %v3644_v28 = vpop.f32.mrf.mxu1  ;;  %v3452_v22 = vadd.f32 %v3451_v41, %v10835_v34  ;;  %v9731_v0 = vpack.c.bf16 %v3772_v19, %v3768_v48  ;;  %v3643_v1 = vadd.f32 %v3642_v13, %v3450_v9  ;;  %v3775_v58 = vmax.f32 %v3641_v30, 0.0  ;;  %v10839_v19 = vld [vmem:[#allocation42_spill] sm:$0xff]  ;;  %v10842_v30 = vld [vmem:[#allocation68_spill] sm:$0xff] }
 0x30b   :  { %v3453_v51 = vpop.f32.mrf.mxu0 }
 0x30c   :  { %v3646_v50 = vpop.f32.mrf.mxu1  ;;  %v3645_v55 = vadd.f32 %v3644_v28, %v3452_v22  ;;  %v3454_v57 = vadd.f32 %v3453_v51, %v3261_v23  ;;  %4996 = vmatprep.mubr.bf16.mxu1 %v9731_v0  ;;  %v3776_v9 = vmax.f32 %v3643_v1, 0.0  ;;  %v10841_v51 = vld [vmem:[#allocation67_spill] sm:$0xff]  ;;  %v3088_v1 = vadd.f32 %v9454_v49, %v9049_v15  ;;  %v10845_v49 = vld [vmem:[#allocation69_spill] sm:$0xff] }
 0x30d   :  { %v3457_v4 = vpop.f32.mrf.mxu0  ;;  %4997 = vmatmul.mubr.bf16.gmra.mxu1 %v9726_v43  ;;  %5130 = vmatmul.mubr.bf16.gmra.mxu0 %v10837_v12  ;;  %v3271_v3 = vadd.f32 %v10841_v51, %v3078_v39  ;;  %v10843_v39 = vld [vmem:[#allocation41_spill] sm:$0xff] }
 0x30e   :  { %v3650_v63 = vpop.f32.mrf.mxu1  ;;  %v3779_v44 = vmax.f32 %v3645_v55, 0.0  ;;  %v3647_v52 = vadd.f32 %v3646_v50, %v3454_v57  ;;  %v3458_v48 = vadd.f32 %v3457_v4, %v10838_v6  ;;  %5139 = vmatprep.mubr.bf16.mxu0 %v10839_v19 }
 0x30f   :  { %v3459_v13 = vpop.f32.mrf.mxu0 }
 0x310   :  { %v3652_v11 = vpop.f32.mrf.mxu1  ;;  %v9740_v41 = vpack.c.bf16 %v3779_v44, %v3775_v58  ;;  %v3780_v28 = vmax.f32 %v3647_v52, 0.0  ;;  %v3460_v23 = vadd.f32 %v3459_v13, %v10840_v7  ;;  %v3651_v12 = vadd.f32 %v3650_v63, %v3458_v48 }
 0x311   :  { %v3461_v34 = vpop.f32.mrf.mxu0 }
 0x312   :  { %v3654_v22 = vpop.f32.mrf.mxu1  ;;  %v3462_v55 = vadd.f32 %v3461_v34, %v10842_v30  ;;  %v9745_v50 = vpack.c.bf16 %v3780_v28, %v3776_v9  ;;  %v3653_v6 = vadd.f32 %v3652_v11, %v3460_v23  ;;  %v3783_v63 = vmax.f32 %v3651_v12, 0.0  ;;  %v10844_v9 = vld [vmem:[#allocation44_spill] sm:$0xff]  ;;  %v10847_v12 = vld [vmem:[#allocation71_spill] sm:$0xff] }
 0x313   :  { %v3463_v57 = vpop.f32.mrf.mxu0 }
 0x314   :  { %v3656_v4 = vpop.f32.mrf.mxu1  ;;  %v3655_v19 = vadd.f32 %v3654_v22, %v3462_v55  ;;  %v3464_v43 = vadd.f32 %v3463_v57, %v3271_v3  ;;  %5006 = vmatprep.mubr.bf16.mxu1 %v9745_v50  ;;  %v3784_v7 = vmax.f32 %v3653_v6, 0.0  ;;  %v10846_v3 = vld [vmem:[#allocation70_spill] sm:$0xff] }
 0x315   :  { %v3467_v58 = vpop.f32.mrf.mxu0  ;;  %5007 = vmatmul.mubr.bf16.gmra.mxu1 %v9740_v41  ;;  %5140 = vmatmul.mubr.bf16.gmra.mxu0 %v10843_v39  ;;  %v3281_v30 = vadd.f32 %v10846_v3, %v3088_v1 }
 0x316   :  { %v3660_v44 = vpop.f32.mrf.mxu1  ;;  %v3787_v52 = vmax.f32 %v3655_v19, 0.0  ;;  %v3657_v48 = vadd.f32 %v3656_v4, %v3464_v43  ;;  %v3468_v13 = vadd.f32 %v3467_v58, %v9448_v31  ;;  %5149 = vmatprep.mubr.bf16.mxu0 %v10844_v9 }
 0x317   :  { %v3469_v11 = vpop.f32.mrf.mxu0 }
 0x318   :  { %v3662_v28 = vpop.f32.mrf.mxu1  ;;  %v9754_v23 = vpack.c.bf16 %v3787_v52, %v3783_v63  ;;  %v3788_v34 = vmax.f32 %v3657_v48, 0.0  ;;  %v3470_v15 = vadd.f32 %v3469_v11, %v10845_v49  ;;  %v3661_v55 = vadd.f32 %v3660_v44, %v3468_v13  ;;  %v10848_v63 = vld [vmem:[#allocation43_spill] sm:$0xff]  ;;  %v10849_v48 = vld [vmem:[#allocation45_spill] sm:$0xff] }
 0x319   :  { %v3471_v22 = vpop.f32.mrf.mxu0 }
 0x31a   :  { %v3664_v51 = vpop.f32.mrf.mxu1  ;;  %v3472_v57 = vadd.f32 %v3471_v22, %v10847_v12  ;;  %v9759_v43 = vpack.c.bf16 %v3788_v34, %v3784_v7  ;;  %v3663_v4 = vadd.f32 %v3662_v28, %v3470_v15  ;;  %v3791_v52 = vmax.f32 %v3661_v55, 0.0  ;;  %v7672_v55 = vld [vmem:[#allocation4 + $0xf0] sm:$0xff]  }
 0x31b   :  { %v3473_v31 = vpop.f32.mrf.mxu0 }
 0x31c   :  { %v3665_v19 = vadd.f32 %v3664_v51, %v3472_v57  ;;  %v3474_v58 = vadd.f32 %v3473_v31, %v3281_v30  ;;  %5016 = vmatprep.mubr.bf16.mxu1 %v9759_v43  ;;  %v3666_v6 = vpop.f32.mrf.mxu1  ;;  %v3792_v9 = vmax.f32 %v3663_v4, 0.0  ;;  %v7671_v30 = vld [vmem:[#allocation4 + $0xb8] sm:$0xff]   ;;  %v7675_v4 = vld [vmem:[#allocation4 + $0xa8] sm:$0xff]  }
 0x31d   :  { %v9762_v39 = vpop.f32.mrf.mxu0  ;;  %5017 = vmatmul.mubr.bf16.gmra.mxu1 %v9754_v23  ;;  %5150 = vmatmul.mubr.bf16.gmra.mxu0 %v10848_v63 }
 0x31e   :  { %v3795_v1 = vmax.f32 %v3665_v19, 0.0  ;;  %v3667_v44 = vadd.f32 %v3666_v6, %v3474_v58  ;;  %5159 = vmatprep.mubr.bf16.mxu0 %v10849_v48  ;;  %v10850_v48 = vld [vmem:[#allocation12_spill] sm:$0xff] }
 0x31f   :  { %v9767_v13 = vpop.f32.mrf.mxu0 }
 0x320   :  { %v9769_v11 = vpack.c.bf16 %v3795_v1, %v3791_v52  ;;  %v3796_v28 = vmax.f32 %v3667_v44, 0.0 }
 0x321   :  { %v9771_v7 = vpop.f32.mrf.mxu0 }
 0x322   :  { %v9773_v34 = vpack.c.bf16 %v3796_v28, %v3792_v9 }
 0x323   :  { %v9775_v49 = vpop.f32.mrf.mxu0 }
 0x324   :  { %5026 = vmatprep.mubr.bf16.mxu1 %v9773_v34 }
 0x325   :  { %v9778_v15 = vpop.f32.mrf.mxu0  ;;  %5027 = vmatmul.mubr.bf16.gmra.mxu1 %v9769_v11  ;;  %5160 = vmatmul.mubr.bf16.gmra.mxu0 %v8830_v37 }
 0x326   :  { %5169 = vmatprep.mubr.bf16.mxu0 %v8882_v46  ;;  %5262 = vmatprep.mubr.bf16.mxu1 %v9473_v16  ;;  %v7673_v46 = vld [vmem:[#allocation4 + $0xb0] sm:$0xff]   ;;  %v7674_v16 = vld [vmem:[#allocation4 + $0xe8] sm:$0xff]  }
 0x327   :  { %v9784_v22 = vpop.f32.mrf.mxu0 }
 0x329   :  { %v9786_v51 = vpop.f32.mrf.mxu0 }
 0x32b   :  { %v9788_v3 = vpop.f32.mrf.mxu0 }
 0x32d   :  { %v9790_v12 = vpop.f32.mrf.mxu0  ;;  %5170 = vmatmul.mubr.bf16.gmra.mxu0 %v8872_v2  ;;  %5263 = vmatmul.mubr.bf16.vlgmr.msra.gmra.mxu1 %v9469_v14  ;;  %v7676_v2 = vld [vmem:[#allocation4 + $0xe0] sm:$0xff]  }
 0x32e   :  { %5179 = vmatprep.mubr.bf16.mxu0 %v8924_v35  ;;  %5272 = vmatprep.mubr.bf16.mxu1 %v9497_v61  ;;  %v7677_v14 = vld [vmem:[#allocation4 + $0xa0] sm:$0xff]  }
 0x32f   :  { %v9796_v37 = vpop.f32.mrf.mxu0  ;;  %6848 = vmatpush3.bf16.msra.mxu1 %v7671_v30  ;;  %v10854_v30 = vld [vmem:[#allocation15_spill] sm:$0xff] }
 0x330   :  { %6849 = vmatprep.subr.bf16.mxu1 %v7672_v55  ;;  %v7682_v55 = vld [vmem:[#allocation4 + $0xc8] sm:$0xff]  }
 0x331   :  { %v9798_v57 = vpop.f32.mrf.mxu0 }
 0x333   :  { %v9800_v31 = vpop.f32.mrf.mxu0  ;;  %6850 = vmatpush3.bf16.msra.mxu1 %v7673_v46  ;;  %v7683_v46 = vld [vmem:[#allocation4 + $0x88] sm:$0xff]  }
 0x334   :  { %6851 = vmatprep.subr.bf16.mxu1 %v7674_v16 }
 0x335   :  { %v9802_v19 = vpop.f32.mrf.mxu0  ;;  %5180 = vmatmul.mubr.bf16.gmra.mxu0 %v8914_v18  ;;  %5273 = vmatmul.mubr.bf16.gmra.mxu1 %v9493_v32  ;;  %v7678_v18 = vld [vmem:[#allocation4 + $0xd8] sm:$0xff]  }
 0x336   :  { %5189 = vmatprep.mubr.bf16.mxu0 %v8963_v45  ;;  %5282 = vmatprep.mubr.bf16.mxu1 %v9521_v26  ;;  %v7679_v45 = vld [vmem:[#allocation4 + $0x98] sm:$0xff]  }
 0x337   :  { %v9808_v35 = vpop.f32.mrf.mxu0  ;;  %6852 = vmatpush3.bf16.msra.mxu1 %v7675_v4 }
 0x338   :  { %6853 = vmatprep.subr.bf16.mxu1 %v7676_v2 }
 0x339   :  { %v9810_v61 = vpop.f32.mrf.mxu0 }
 0x33b   :  { %v9812_v58 = vpop.f32.mrf.mxu0  ;;  %6854 = vmatpush3.bf16.msra.mxu1 %v7677_v14 }
 0x33c   :  { %6855 = vmatprep.subr.bf16.mxu1 %v7678_v18 }
 0x33d   :  { %v9814_v6 = vpop.f32.mrf.mxu0  ;;  %5190 = vmatmul.mubr.bf16.gmra.mxu0 %v8953_v38  ;;  %5283 = vmatmul.mubr.bf16.gmra.mxu1 %v9517_v36 }
 0x33e   :  { %5199 = vmatprep.mubr.bf16.mxu0 %v8999_v54  ;;  %5292 = vmatprep.mubr.bf16.mxu1 %v9548_v20 }
 0x33f   :  { %v9820_v32 = vpop.f32.mrf.mxu0  ;;  %6856 = vmatpush3.bf16.msra.mxu1 %v7679_v45 }
 0x341   :  { %v9822_v26 = vpop.f32.mrf.mxu0 }
 0x343   :  { %v9824_v63 = vpop.f32.mrf.mxu0 }
 0x345   :  { %v9826_v52 = vpop.f32.mrf.mxu0  ;;  %5200 = vmatmul.mubr.bf16.gmra.mxu0 %v10785_v60  ;;  %5293 = vmatmul.mubr.bf16.gmra.mxu1 %v9543_v59  ;;  %v7680_v59 = vld [vmem:[#allocation4 + $0xd0] sm:$0xff]  }
 0x346   :  { %5209 = vmatprep.mubr.bf16.mxu0 %v10787_v25  ;;  %5302 = vmatprep.mubr.bf16.mxu1 %v9574_v56  ;;  %v7681_v60 = vld [vmem:[#allocation4 + $0x90] sm:$0xff]  }
 0x347   :  { %v9832_v38 = vpop.f32.mrf.mxu0  ;;  %6857 = vmatprep.subr.bf16.mxu1 %v7680_v59 }
 0x348   :  { %6858 = vmatpush3.bf16.msra.mxu1 %v7681_v60  ;;  %v10862_v60 = vld [vmem:[#allocation8_spill] sm:$0xff] }
 0x349   :  { %v9834_v54 = vpop.f32.mrf.mxu0  ;;  %6859 = vmatprep.subr.bf16.mxu1 %v7682_v55  ;;  %v7684_v55 = vld [vmem:[#allocation4 + $0xc0] sm:$0xff]  }
 0x34b   :  { %v9836_v36 = vpop.f32.mrf.mxu0 }
 0x34c   :  { %6860 = vmatpush3.bf16.msra.mxu1 %v7683_v46  ;;  %v7685_v46 = vld [vmem:[#allocation4 + $0x80] sm:$0xff]  }
 0x34d   :  { %v9838_v20 = vpop.f32.mrf.mxu0  ;;  %5210 = vmatmul.mubr.bf16.gmra.mxu0 %v10791_v5  ;;  %5303 = vmatmul.mubr.bf16.gmra.mxu1 %v9569_v40  ;;  %v10851_v5 = vld [vmem:[#allocation14_spill] sm:$0xff]  ;;  %v10852_v40 = vld [vmem:[#allocation9_spill] sm:$0xff] }
 0x34e   :  { %5219 = vmatprep.mubr.bf16.mxu0 %v10792_v27  ;;  %5312 = vmatprep.mubr.bf16.mxu1 %v9600_v24 }
 0x34f   :  { %v9844_v25 = vpop.f32.mrf.mxu0  ;;  %6861 = vmatprep.subr.bf16.mxu1 %v7684_v55 }
 0x350   :  { %6862 = vmatpush3.bf16.msra.mxu1 %v7685_v46 }
 0x351   :  { %v9846_v56 = vpop.f32.mrf.mxu0 }
 0x353   :  { %v9848_v1 = vpop.f32.mrf.mxu0 }
 0x355   :  { %v9850_v44 = vpop.f32.mrf.mxu0  ;;  %5220 = vmatmul.mubr.bf16.gmra.mxu0 %v10850_v48  ;;  %5313 = vmatmul.mubr.bf16.gmra.mxu1 %v10851_v5  ;;  %v10863_v48 = vsub.s32 1, %v10862_v60 }
 0x356   :  { %5322 = vmatprep.mubr.bf16.mxu1 %v10852_v40 }
 0x357   :  { %v9855_v27 = vpop.f32.mrf.mxu0 }
 0x359   :  { %v9857_v24 = vpop.f32.mrf.mxu0 }
 0x35b   :  { %v9859_v9 = vpop.f32.mrf.mxu0 }
 0x35d   :  { %v9861_v28 = vpop.f32.mrf.mxu0  ;;  %5323 = vmatmul.mubr.bf16.gmra.mxu1 %v10854_v30 }
 0x35e   :  { %10853 = vst [vmem:[#allocation11_spill] sm:$0xff] %v9861_v28  ;;  %5332 = vmatprep.mubr.bf16.mxu1 %v9652_v8  ;;  %v9882_v8 = vld [vmem:[%s10637_s4] sm:$0xf] }
 0x35f   :  { %v9865_v16 = vpop.f32.mrf.mxu0  ;;  %10860 = vst [vmem:[#allocation20_spill] sm:$0xff] %v9882_v8  ;;  %v9889_v5 = vrot.slane %v9882_v8, %v10863_v48 }
 0x361   :  { %v9867_v4 = vpop.f32.mrf.mxu0  ;;  %v4688_v48 = vadd.f32 %v9767_v13, %v9889_v5 }
 0x362   :  { %10855 = vst [vmem:[#allocation17_spill] sm:$0xff] %v9867_v4 }
 0x363   :  { %v9869_v2 = vpop.f32.mrf.mxu0 }
 0x364   :  { %10856 = vst [vmem:[#allocation18_spill] sm:$0xff] %v9869_v2 }
 0x365   :  { %v9871_v14 = vpop.f32.mrf.mxu0  ;;  %5333 = vmatmul.mubr.bf16.gmra.mxu1 %v9647_v47  ;;  %v10864_v47 = vsub.s32 0, %v10862_v60 }
 0x366   :  { %10857 = vst [vmem:[#allocation19_spill] sm:$0xff] %v9871_v14  ;;  %5342 = vmatprep.mubr.bf16.mxu1 %v9675_v42 }
 0x367   :  { %v9875_v18 = vpop.f32.mrf.mxu0  ;;  %v9894_v42 = vrot.slane %v9882_v8, %v10864_v47 }
 0x368   :  { %10858 = vst [vmem:[#allocation10_spill] sm:$0xff] %v9875_v18 }
 0x369   :  { %v9877_v45 = vpop.f32.mrf.mxu0  ;;  %v4690_v60 = vadd.f32 %v9771_v7, %v9894_v42  ;;  %v4686_v47 = vadd.f32 %v9762_v39, %v9894_v42 }
 0x36a   :  { %10859 = vst [vmem:[#allocation13_spill] sm:$0xff] %v9877_v45 }
 0x36b   :  { %v9884_v59 = vpop.f32.mrf.mxu0 }
 0x36c   :  { %10861 = vst [vmem:[#allocation21_spill] sm:$0xff] %v9884_v59 }
 0x36d   :  { %v9896_v40 = vpop.f32.mrf.mxu0  ;;  %v4878_v30 = vpop.f32.mrf.mxu1  ;;  %5343 = vmatmul.mubr.bf16.gmra.mxu1 %v9670_v21 }
 0x36e   :  { %10865 = vst [vmem:[#allocation22_spill] sm:$0xff] %v9896_v40  ;;  %5352 = vmatprep.mubr.bf16.mxu1 %v9689_v62  ;;  %v4692_v62 = vadd.f32 %v9775_v49, %v9889_v5  ;;  %v4879_v45 = vadd.f32 %v4878_v30, %v4686_v47  ;;  %v4696_v30 = vadd.f32 %v9778_v15, %v9894_v42 }
 0x36f   :  { %v9900_v59 = vpop.f32.mrf.mxu0  ;;  %v4880_v14 = vpop.f32.mrf.mxu1 }
 0x370   :  { %10866 = vst [vmem:[#allocation23_spill] sm:$0xff] %v9900_v59  ;;  %v4881_v40 = vadd.f32 %v4880_v14, %v4688_v48  ;;  %v5423_v46 = vmax.f32 %v4879_v45, 0.0  ;;  %v4698_v14 = vadd.f32 %v9784_v22, %v9889_v5 }
 0x371   :  { %v9908_v8 = vpop.f32.mrf.mxu0  ;;  %v4882_v21 = vpop.f32.mrf.mxu1 }
 0x372   :  { %10867 = vst [vmem:[#allocation28_spill] sm:$0xff] %v9908_v8  ;;  %v4883_v59 = vadd.f32 %v4882_v21, %v4690_v60  ;;  %v5424_v39 = vmax.f32 %v4881_v40, 0.0  ;;  %v4700_v60 = vadd.f32 %v9786_v51, %v9894_v42 }
 0x373   :  { %v9912_v18 = vpop.f32.mrf.mxu0  ;;  %v4884_v13 = vpop.f32.mrf.mxu1 }
 0x374   :  { %v4885_v2 = vadd.f32 %v4884_v13, %v4692_v62  ;;  %v5427_v28 = vmax.f32 %v4883_v59, 0.0 }
 0x375   :  { %v9914_v7 = vpop.f32.mrf.mxu0  ;;  %v4888_v55 = vpop.f32.mrf.mxu1  ;;  %5353 = vmatmul.mubr.bf16.gmra.mxu1 %v9684_v10 }
 0x376   :  { %v5428_v8 = vmax.f32 %v4885_v2, 0.0  ;;  %5362 = vmatprep.mubr.bf16.mxu1 %v9703_v33  ;;  %v5551_v48 = vpack.c.bf16 %v5427_v28, %v5423_v46  ;;  %v4702_v33 = vadd.f32 %v9788_v3, %v9889_v5  ;;  %v4889_v47 = vadd.f32 %v4888_v55, %v4696_v30 }
 0x377   :  { %v9918_v4 = vpop.f32.mrf.mxu0  ;;  %v4890_v49 = vpop.f32.mrf.mxu1  ;;  %v4708_v55 = vadd.f32 %v9796_v37, %v9889_v5 }
 0x378   :  { %v5552_v59 = vpack.c.bf16 %v5428_v8, %v5424_v39  ;;  %v4891_v45 = vadd.f32 %v4890_v49, %v4698_v14  ;;  %v5431_v3 = vmax.f32 %v4889_v47, 0.0  ;;  %v4710_v49 = vadd.f32 %v9798_v57, %v9894_v42 }
 0x379   :  { %v9926_v10 = vpop.f32.mrf.mxu0  ;;  %v4892_v2 = vpop.f32.mrf.mxu1 }
 0x37a   :  { %v4893_v40 = vadd.f32 %v4892_v2, %v4700_v60  ;;  %5910 = vmatprep.mubr.bf16.mxu0 %v5552_v59  ;;  %v5432_v28 = vmax.f32 %v4891_v45, 0.0  ;;  %v4706_v60 = vadd.f32 %v9790_v12, %v9894_v42 }
 0x37b   :  { %v9930_v21 = vpop.f32.mrf.mxu0  ;;  %v4894_v22 = vpop.f32.mrf.mxu1  ;;  %5911 = vmatmul.mubr.bf16.vlgmr.msra.gmra.mxu0 %v5551_v48 }
 0x37c   :  { %v4895_v51 = vadd.f32 %v4894_v22, %v4702_v33  ;;  %v5435_v8 = vmax.f32 %v4893_v40, 0.0 }
 0x37d   :  { %v9932_v62 = vpop.f32.mrf.mxu0  ;;  %v4898_v15 = vpop.f32.mrf.mxu1  ;;  %5363 = vmatmul.mubr.bf16.gmra.mxu1 %v9698_v17 }
 0x37e   :  { %v5436_v13 = vmax.f32 %v4895_v51, 0.0  ;;  %5372 = vmatprep.mubr.bf16.mxu1 %v9717_v29  ;;  %v5555_v59 = vpack.c.bf16 %v5435_v8, %v5431_v3  ;;  %v4712_v29 = vadd.f32 %v9800_v31, %v9889_v5  ;;  %v4899_v33 = vadd.f32 %v4898_v15, %v4706_v60 }
 0x37f   :  { %v9936_v39 = vpop.f32.mrf.mxu0  ;;  %v4900_v46 = vpop.f32.mrf.mxu1  ;;  %v4718_v15 = vadd.f32 %v9808_v35, %v9889_v5 }
 0x380   :  { %v5556_v14 = vpack.c.bf16 %v5436_v13, %v5432_v28  ;;  %v4901_v48 = vadd.f32 %v4900_v46, %v4708_v55  ;;  %v5439_v31 = vmax.f32 %v4899_v33, 0.0  ;;  %v4720_v13 = vadd.f32 %v9810_v61, %v9894_v42 }
 0x381   :  { %v9944_v17 = vpop.f32.mrf.mxu0  ;;  %v4902_v30 = vpop.f32.mrf.mxu1  ;;  %v4716_v46 = vadd.f32 %v9802_v19, %v9894_v42 }
 0x382   :  { %v4903_v2 = vadd.f32 %v4902_v30, %v4710_v49  ;;  %5918 = vmatprep.mubr.bf16.mxu0 %v5556_v14  ;;  %v5440_v22 = vmax.f32 %v4901_v48, 0.0 }
 0x383   :  { %v9948_v45 = vpop.f32.mrf.mxu0  ;;  %v4904_v37 = vpop.f32.mrf.mxu1  ;;  %5919 = vmatmul.mubr.bf16.gmra.mxu0 %v5555_v59 }
 0x384   :  { %v4905_v57 = vadd.f32 %v4904_v37, %v4712_v29  ;;  %v5443_v40 = vmax.f32 %v4903_v2, 0.0  ;;  %v10868_v2 = vld [vmem:[#allocation16_spill] sm:$0xff] }
 0x385   :  { %v9950_v47 = vpop.f32.mrf.mxu0  ;;  %v4908_v12 = vpop.f32.mrf.mxu1  ;;  %5373 = vmatmul.mubr.bf16.gmra.mxu1 %v9712_v53 }
 0x386   :  { %v5444_v51 = vmax.f32 %v4905_v57, 0.0  ;;  %5382 = vmatprep.mubr.bf16.mxu1 %v9731_v0  ;;  %v5559_v55 = vpack.c.bf16 %v5443_v40, %v5439_v31  ;;  %v4722_v0 = vadd.f32 %v9812_v58, %v9889_v5  ;;  %v4909_v59 = vadd.f32 %v4908_v12, %v4716_v46 }
 0x387   :  { %v9954_v8 = vpop.f32.mrf.mxu0  ;;  %v4910_v28 = vpop.f32.mrf.mxu1  ;;  %v4728_v12 = vadd.f32 %v9820_v32, %v9889_v5  ;;  %v4726_v31 = vadd.f32 %v9814_v6, %v9894_v42 }
 0x388   :  { %v5560_v3 = vpack.c.bf16 %v5444_v51, %v5440_v22  ;;  %v4911_v14 = vadd.f32 %v4910_v28, %v4718_v15  ;;  %v5447_v58 = vmax.f32 %v4909_v59, 0.0  ;;  %v4730_v22 = vadd.f32 %v9822_v26, %v9894_v42 }
 0x389   :  { %v9962_v53 = vpop.f32.mrf.mxu0  ;;  %v4912_v49 = vpop.f32.mrf.mxu1 }
 0x38a   :  { %v4913_v60 = vadd.f32 %v4912_v49, %v4720_v13  ;;  %5926 = vmatprep.mubr.bf16.mxu0 %v5560_v3  ;;  %v5448_v33 = vmax.f32 %v4911_v14, 0.0 }
 0x38b   :  { %v9966_v30 = vpop.f32.mrf.mxu0  ;;  %v4914_v35 = vpop.f32.mrf.mxu1  ;;  %5927 = vmatmul.mubr.bf16.gmra.mxu0 %v5559_v55 }
 0x38c   :  { %v4915_v61 = vadd.f32 %v4914_v35, %v4722_v0  ;;  %v5451_v29 = vmax.f32 %v4913_v60, 0.0 }
 0x38d   :  { %v9968_v48 = vpop.f32.mrf.mxu0  ;;  %v4918_v19 = vpop.f32.mrf.mxu1  ;;  %5383 = vmatmul.mubr.bf16.gmra.mxu1 %v10868_v2 }
 0x38e   :  { %v5452_v37 = vmax.f32 %v4915_v61, 0.0  ;;  %5392 = vmatprep.mubr.bf16.mxu1 %v9745_v50  ;;  %v5563_v28 = vpack.c.bf16 %v5451_v29, %v5447_v58  ;;  %v4732_v50 = vadd.f32 %v9824_v63, %v9889_v5  ;;  %v4919_v55 = vadd.f32 %v4918_v19, %v4726_v31 }
 0x38f   :  { %v9972_v57 = vpop.f32.mrf.mxu0  ;;  %v4920_v40 = vpop.f32.mrf.mxu1  ;;  %v4738_v29 = vadd.f32 %v9832_v38, %v9889_v5  ;;  %v4740_v19 = vadd.f32 %v9834_v54, %v9894_v42 }
 0x390   :  { %v5564_v51 = vpack.c.bf16 %v5452_v37, %v5448_v33  ;;  %v4921_v3 = vadd.f32 %v4920_v40, %v4728_v12  ;;  %v5455_v63 = vmax.f32 %v4919_v55, 0.0  ;;  %v4736_v33 = vadd.f32 %v9826_v52, %v9894_v42 }
 0x391   :  { %v9980_v15 = vpop.f32.mrf.mxu0  ;;  %v4922_v13 = vpop.f32.mrf.mxu1  ;;  %v4748_v55 = vadd.f32 %v9844_v25, %v9889_v5 }
 0x392   :  { %v4923_v46 = vadd.f32 %v4922_v13, %v4730_v22  ;;  %5934 = vmatprep.mubr.bf16.mxu0 %v5564_v51  ;;  %v5456_v60 = vmax.f32 %v4921_v3, 0.0 }
 0x393   :  { %v9984_v49 = vpop.f32.mrf.mxu0  ;;  %v4924_v32 = vpop.f32.mrf.mxu1  ;;  %5935 = vmatmul.mubr.bf16.gmra.mxu0 %v5563_v28 }
 0x394   :  { %v4925_v26 = vadd.f32 %v4924_v32, %v4732_v50  ;;  %v5459_v0 = vmax.f32 %v4923_v46, 0.0  ;;  %v4750_v32 = vadd.f32 %v9846_v56, %v9894_v42 }
 0x395   :  { %v9986_v14 = vpop.f32.mrf.mxu0  ;;  %v4928_v6 = vpop.f32.mrf.mxu1  ;;  %5393 = vmatmul.mubr.bf16.gmra.mxu1 %v9740_v41 }
 0x396   :  { %v5460_v59 = vmax.f32 %v4925_v26, 0.0  ;;  %5402 = vmatprep.mubr.bf16.mxu1 %v9759_v43  ;;  %v5567_v37 = vpack.c.bf16 %v5459_v0, %v5455_v63  ;;  %v4742_v43 = vadd.f32 %v9836_v36, %v9889_v5  ;;  %v4929_v22 = vadd.f32 %v4928_v6, %v4736_v33 }
 0x397   :  { %v9990_v35 = vpop.f32.mrf.mxu0  ;;  %v4930_v61 = vpop.f32.mrf.mxu1  ;;  %v4746_v0 = vadd.f32 %v9838_v20, %v9894_v42 }
 0x398   :  { %v5568_v2 = vpack.c.bf16 %v5460_v59, %v5456_v60  ;;  %v4931_v40 = vadd.f32 %v4930_v61, %v4738_v29  ;;  %v5463_v36 = vmax.f32 %v4929_v22, 0.0 }
 0x399   :  { %v9998_v41 = vpop.f32.mrf.mxu0  ;;  %v4932_v58 = vpop.f32.mrf.mxu1 }
 0x39a   :  { %v4933_v12 = vadd.f32 %v4932_v58, %v4740_v19  ;;  %5942 = vmatprep.mubr.bf16.mxu0 %v5568_v2  ;;  %v5464_v52 = vmax.f32 %v4931_v40, 0.0  ;;  %v4758_v40 = vadd.f32 %v9855_v27, %v9889_v5 }
 0x39b   :  { %v10002_v51 = vpop.f32.mrf.mxu0  ;;  %v4934_v38 = vpop.f32.mrf.mxu1  ;;  %5943 = vmatmul.mubr.bf16.gmra.mxu0 %v5567_v37 }
 0x39c   :  { %v4935_v54 = vadd.f32 %v4934_v38, %v4742_v43  ;;  %v5467_v31 = vmax.f32 %v4933_v12, 0.0  ;;  %v4760_v12 = vadd.f32 %v9857_v24, %v9894_v42  ;;  %v4756_v38 = vadd.f32 %v9850_v44, %v9894_v42 }
 0x39d   :  { %v4938_v28 = vpop.f32.mrf.mxu1  ;;  %v10004_v13 = vpop.f32.mrf.mxu0  ;;  %5403 = vmatmul.mubr.bf16.gmra.mxu1 %v9754_v23 }
 0x39e   :  { %v5468_v50 = vmax.f32 %v4935_v54, 0.0  ;;  %5412 = vmatprep.mubr.bf16.mxu1 %v9773_v34  ;;  %v5571_v6 = vpack.c.bf16 %v5467_v31, %v5463_v36  ;;  %v4752_v34 = vadd.f32 %v9848_v1, %v9889_v5  ;;  %v4939_v61 = vadd.f32 %v4938_v28, %v4746_v0 }
 0x39f   :  { %v4940_v3 = vpop.f32.mrf.mxu1  ;;  %v10008_v46 = vpop.f32.mrf.mxu0 }
 0x3a0   :  { %v5572_v26 = vpack.c.bf16 %v5468_v50, %v5464_v52  ;;  %v4941_v59 = vadd.f32 %v4940_v3, %v4748_v55  ;;  %v5471_v58 = vmax.f32 %v4939_v61, 0.0 }
 0x3a1   :  { %v4942_v23 = vpop.f32.mrf.mxu1  ;;  %v10016_v60 = vpop.f32.mrf.mxu0 }
 0x3a2   :  { %v4943_v63 = vadd.f32 %v4942_v23, %v4750_v32  ;;  %5950 = vmatprep.mubr.bf16.mxu0 %v5572_v26  ;;  %v5472_v20 = vmax.f32 %v4941_v59, 0.0  ;;  %v10869_v59 = vld [vmem:[#allocation17_spill] sm:$0xff] }
 0x3a3   :  { %v4944_v29 = vpop.f32.mrf.mxu1  ;;  %v10020_v25 = vpop.f32.mrf.mxu0  ;;  %5951 = vmatmul.mubr.bf16.gmra.mxu0 %v5571_v6 }
 0x3a4   :  { %v4945_v56 = vadd.f32 %v4944_v29, %v4752_v34  ;;  %v5475_v19 = vmax.f32 %v4943_v63, 0.0  ;;  %v4770_v63 = vadd.f32 %v10869_v59, %v9894_v42  ;;  %v10870_v29 = vld [vmem:[#allocation11_spill] sm:$0xff] }
 0x3a5   :  { %v4948_v2 = vpop.f32.mrf.mxu1  ;;  %v10022_v33 = vpop.f32.mrf.mxu0  ;;  %5413 = vmatmul.mubr.bf16.gmra.mxu1 %v9769_v11  ;;  %v4762_v11 = vadd.f32 %v9859_v9, %v9889_v5  ;;  %v4768_v9 = vadd.f32 %v9865_v16, %v9889_v5 }
 0x3a6   :  { %v5476_v37 = vmax.f32 %v4945_v56, 0.0  ;;  %v5575_v54 = vpack.c.bf16 %v5475_v19, %v5471_v58  ;;  %v4949_v36 = vadd.f32 %v4948_v2, %v4756_v38  ;;  %v4766_v56 = vadd.f32 %v10870_v29, %v9894_v42  ;;  %v10875_v29 = vld [vmem:[#allocation21_spill] sm:$0xff] }
 0x3a7   :  { %v4950_v43 = vpop.f32.mrf.mxu1  ;;  %v10025_v1 = vpop.f32.mrf.mxu0 }
 0x3a8   :  { %v5576_v22 = vpack.c.bf16 %v5476_v37, %v5472_v20  ;;  %v4951_v52 = vadd.f32 %v4950_v43, %v4758_v40  ;;  %v5479_v6 = vmax.f32 %v4949_v36, 0.0  ;;  %v10871_v37 = vld [vmem:[#allocation18_spill] sm:$0xff] }
 0x3a9   :  { %v4952_v31 = vpop.f32.mrf.mxu1  ;;  %v10033_v28 = vpop.f32.mrf.mxu0  ;;  %v4772_v58 = vadd.f32 %v10871_v37, %v9889_v5 }
 0x3aa   :  { %v4953_v50 = vadd.f32 %v4952_v31, %v4760_v12  ;;  %5958 = vmatprep.mubr.bf16.mxu0 %v5576_v22  ;;  %v5480_v44 = vmax.f32 %v4951_v52, 0.0 }
 0x3ab   :  { %v4954_v3 = vpop.f32.mrf.mxu1  ;;  %v10037_v27 = vpop.f32.mrf.mxu0  ;;  %5959 = vmatmul.mubr.bf16.gmra.mxu0 %v5575_v54 }
 0x3ac   :  { %v4955_v24 = vadd.f32 %v4954_v3, %v4762_v11  ;;  %v5483_v55 = vmax.f32 %v4953_v50, 0.0 }
 0x3ad   :  { %v4958_v32 = vpop.f32.mrf.mxu1  ;;  %v10039_v26 = vpop.f32.mrf.mxu0 }
 0x3ae   :  { %v5484_v0 = vmax.f32 %v4955_v24, 0.0  ;;  %v5579_v19 = vpack.c.bf16 %v5483_v55, %v5479_v6  ;;  %v4959_v12 = vadd.f32 %v4958_v32, %v4766_v56  ;;  %v10872_v55 = vld [vmem:[#allocation10_spill] sm:$0xff]  ;;  %v10873_v32 = vld [vmem:[#allocation13_spill] sm:$0xff]  ;;  %v4782_v56 = vadd.f32 %v10875_v29, %v9889_v5 }
 0x3af   :  { %v4960_v23 = vpop.f32.mrf.mxu1  ;;  %v10041_v34 = vpop.f32.mrf.mxu0  ;;  %v4792_v29 = vadd.f32 %v9912_v18, %v9889_v5  ;;  %v4798_v18 = vadd.f32 %v9918_v4, %v9889_v5 }
 0x3b0   :  { %v5580_v61 = vpack.c.bf16 %v5484_v0, %v5480_v44  ;;  %v4961_v43 = vadd.f32 %v4960_v23, %v4768_v9  ;;  %v5487_v36 = vmax.f32 %v4959_v12, 0.0  ;;  %v4778_v44 = vadd.f32 %v10872_v55, %v9889_v5  ;;  %v10874_v23 = vld [vmem:[#allocation19_spill] sm:$0xff] }
 0x3b1   :  { %v4962_v2 = vpop.f32.mrf.mxu1  ;;  %v10049_v20 = vpop.f32.mrf.mxu0  ;;  %v4780_v0 = vadd.f32 %v10873_v32, %v9894_v42  ;;  %v4776_v9 = vadd.f32 %v10874_v23, %v9894_v42 }
 0x3b2   :  { %v4963_v40 = vadd.f32 %v4962_v2, %v4770_v63  ;;  %5966 = vmatprep.mubr.bf16.mxu0 %v5580_v61  ;;  %v5488_v52 = vmax.f32 %v4961_v43, 0.0 }
 0x3b3   :  { %v4964_v22 = vpop.f32.mrf.mxu1  ;;  %v10053_v16 = vpop.f32.mrf.mxu0  ;;  %5967 = vmatmul.mubr.bf16.gmra.mxu0 %v5579_v19 }
 0x3b4   :  { %v4965_v38 = vadd.f32 %v4964_v22, %v4772_v58  ;;  %v5491_v54 = vmax.f32 %v4963_v40, 0.0 }
 0x3b5   :  { %v4968_v31 = vpop.f32.mrf.mxu1  ;;  %v10055_v11 = vpop.f32.mrf.mxu0 }
 0x3b6   :  { %v5492_v50 = vmax.f32 %v4965_v38, 0.0  ;;  %v5583_v59 = vpack.c.bf16 %v5491_v54, %v5487_v36  ;;  %v4969_v37 = vadd.f32 %v4968_v31, %v4776_v9  ;;  %v10878_v31 = vld [vmem:[#allocation28_spill] sm:$0xff] }
 0x3b7   :  { %v4970_v3 = vpop.f32.mrf.mxu1  ;;  %v10057_v24 = vpop.f32.mrf.mxu0  ;;  %v4790_v32 = vadd.f32 %v10878_v31, %v9894_v42 }
 0x3b8   :  { %v5584_v6 = vpack.c.bf16 %v5492_v50, %v5488_v52  ;;  %v4971_v19 = vadd.f32 %v4970_v3, %v4778_v44  ;;  %v5495_v50 = vmax.f32 %v4969_v37, 0.0  ;;  %v10877_v3 = vld [vmem:[#allocation23_spill] sm:$0xff] }
 0x3b9   :  { %v4972_v63 = vpop.f32.mrf.mxu1  ;;  %v10065_v61 = vpop.f32.mrf.mxu0  ;;  %v4788_v44 = vadd.f32 %v10877_v3, %v9889_v5 }
 0x3ba   :  { %v4973_v2 = vadd.f32 %v4972_v63, %v4780_v0  ;;  %5974 = vmatprep.mubr.bf16.mxu0 %v5584_v6  ;;  %v5496_v54 = vmax.f32 %v4971_v19, 0.0  ;;  %v10879_v6 = vld [vmem:[#allocation22_spill] sm:$0xff] }
 0x3bb   :  { %v4974_v58 = vpop.f32.mrf.mxu1  ;;  %v10069_v43 = vpop.f32.mrf.mxu0  ;;  %5975 = vmatmul.mubr.bf16.gmra.mxu0 %v5583_v59  ;;  %v4786_v23 = vadd.f32 %v10879_v6, %v9894_v42 }
 0x3bc   :  { %v4975_v40 = vadd.f32 %v4974_v58, %v4782_v56  ;;  %v5499_v12 = vmax.f32 %v4973_v2, 0.0 }
 0x3bd   :  { %v4978_v22 = vpop.f32.mrf.mxu1  ;;  %v10071_v38 = vpop.f32.mrf.mxu0 }
 0x3be   :  { %10876 = vst [vmem:[#allocation24_spill] sm:$0xff] %v10071_v38  ;;  %v5500_v52 = vmax.f32 %v4975_v40, 0.0  ;;  %v5587_v9 = vpack.c.bf16 %v5499_v12, %v5495_v50  ;;  %v4979_v2 = vadd.f32 %v4978_v22, %v4786_v23  ;;  %v4800_v22 = vadd.f32 %v9926_v10, %v9894_v42 }
 0x3bf   :  { %v4980_v36 = vpop.f32.mrf.mxu1  ;;  %v10073_v55 = vpop.f32.mrf.mxu0 }
 0x3c0   :  { %v5588_v0 = vpack.c.bf16 %v5500_v52, %v5496_v54  ;;  %v4981_v56 = vadd.f32 %v4980_v36, %v4788_v44  ;;  %v5503_v31 = vmax.f32 %v4979_v2, 0.0  ;;  %v4796_v44 = vadd.f32 %v9914_v7, %v9894_v42 }
 0x3c1   :  { %v4982_v59 = vpop.f32.mrf.mxu1  ;;  %v10081_v63 = vpop.f32.mrf.mxu0 }
 0x3c2   :  { %v4983_v19 = vadd.f32 %v4982_v59, %v4790_v32  ;;  %5982 = vmatprep.mubr.bf16.mxu0 %v5588_v0  ;;  %v5504_v12 = vmax.f32 %v4981_v56, 0.0 }
 0x3c3   :  { %v4984_v37 = vpop.f32.mrf.mxu1  ;;  %v10085_v58 = vpop.f32.mrf.mxu0  ;;  %5983 = vmatmul.mubr.bf16.gmra.mxu0 %v5587_v9  ;;  %v4802_v9 = vadd.f32 %v9930_v21, %v9889_v5  ;;  %v4808_v21 = vadd.f32 %v9936_v39, %v9889_v5 }
 0x3c4   :  { %v4985_v40 = vadd.f32 %v4984_v37, %v4792_v29  ;;  %v5507_v54 = vmax.f32 %v4983_v19, 0.0 }
 0x3c5   :  { %v4988_v52 = vpop.f32.mrf.mxu1  ;;  %v10087_v3 = vpop.f32.mrf.mxu0 }
 0x3c6   :  { %v5508_v50 = vmax.f32 %v4985_v40, 0.0  ;;  %v5591_v32 = vpack.c.bf16 %v5507_v54, %v5503_v31  ;;  %v4989_v56 = vadd.f32 %v4988_v52, %v4796_v44  ;;  %v4810_v52 = vadd.f32 %v9944_v17, %v9894_v42 }
 0x3c7   :  { %v4990_v6 = vpop.f32.mrf.mxu1  ;;  %v10089_v38 = vpop.f32.mrf.mxu0 }
 0x3c8   :  { %v5592_v36 = vpack.c.bf16 %v5508_v50, %v5504_v12  ;;  %v4991_v59 = vadd.f32 %v4990_v6, %v4798_v18  ;;  %v5511_v12 = vmax.f32 %v4989_v56, 0.0  ;;  %v4806_v18 = vadd.f32 %v9932_v62, %v9894_v42 }
 0x3c9   :  { %v4992_v0 = vpop.f32.mrf.mxu1  ;;  %v10097_v23 = vpop.f32.mrf.mxu0 }
 0x3ca   :  { %v4993_v29 = vadd.f32 %v4992_v0, %v4800_v22  ;;  %5990 = vmatprep.mubr.bf16.mxu0 %v5592_v36  ;;  %v5512_v7 = vmax.f32 %v4991_v59, 0.0 }
 0x3cb   :  { %v4994_v19 = vpop.f32.mrf.mxu1  ;;  %v10101_v4 = vpop.f32.mrf.mxu0  ;;  %5991 = vmatmul.mubr.bf16.gmra.mxu0 %v5591_v32  ;;  %v4812_v32 = vadd.f32 %v9948_v45, %v9889_v5  ;;  %v4818_v45 = vadd.f32 %v9954_v8, %v9889_v5 }
 0x3cc   :  { %v4995_v10 = vadd.f32 %v4994_v19, %v4802_v9  ;;  %v5515_v2 = vmax.f32 %v4993_v29, 0.0 }
 0x3cd   :  { %v4998_v37 = vpop.f32.mrf.mxu1  ;;  %v10103_v40 = vpop.f32.mrf.mxu0 }
 0x3ce   :  { %v5516_v54 = vmax.f32 %v4995_v10, 0.0  ;;  %v5595_v22 = vpack.c.bf16 %v5515_v2, %v5511_v12  ;;  %v4999_v59 = vadd.f32 %v4998_v37, %v4806_v18  ;;  %v4820_v37 = vadd.f32 %v9962_v53, %v9894_v42 }
 0x3cf   :  { %v5000_v50 = vpop.f32.mrf.mxu1  ;;  %v10105_v31 = vpop.f32.mrf.mxu0 }
 0x3d0   :  { %v5596_v6 = vpack.c.bf16 %v5516_v54, %v5512_v7  ;;  %v5001_v0 = vadd.f32 %v5000_v50, %v4808_v21  ;;  %v5519_v7 = vmax.f32 %v4999_v59, 0.0  ;;  %v4816_v21 = vadd.f32 %v9950_v47, %v9894_v42 }
 0x3d1   :  { %v5002_v36 = vpop.f32.mrf.mxu1  ;;  %v10113_v44 = vpop.f32.mrf.mxu0 }
 0x3d2   :  { %v5003_v9 = vadd.f32 %v5002_v36, %v4810_v52  ;;  %5998 = vmatprep.mubr.bf16.mxu0 %v5596_v6  ;;  %v5520_v62 = vmax.f32 %v5001_v0, 0.0 }
 0x3d3   :  { %v5004_v29 = vpop.f32.mrf.mxu1  ;;  %v10117_v39 = vpop.f32.mrf.mxu0  ;;  %5999 = vmatmul.mubr.bf16.gmra.mxu0 %v5595_v22  ;;  %v4822_v22 = vadd.f32 %v9966_v30, %v9889_v5  ;;  %v4828_v30 = vadd.f32 %v9972_v57, %v9889_v5 }
 0x3d4   :  { %v5005_v17 = vadd.f32 %v5004_v29, %v4812_v32  ;;  %v5523_v56 = vmax.f32 %v5003_v9, 0.0 }
 0x3d5   :  { %v5008_v19 = vpop.f32.mrf.mxu1  ;;  %v10119_v10 = vpop.f32.mrf.mxu0 }
 0x3d6   :  { %v5524_v2 = vmax.f32 %v5005_v17, 0.0  ;;  %v5599_v52 = vpack.c.bf16 %v5523_v56, %v5519_v7  ;;  %v5009_v0 = vadd.f32 %v5008_v19, %v4816_v21  ;;  %v4830_v19 = vadd.f32 %v9980_v15, %v9894_v42 }
 0x3d7   :  { %v5010_v54 = vpop.f32.mrf.mxu1  ;;  %v10121_v12 = vpop.f32.mrf.mxu0 }
 0x3d8   :  { %v5600_v50 = vpack.c.bf16 %v5524_v2, %v5520_v62  ;;  %v5011_v36 = vadd.f32 %v5010_v54, %v4818_v45  ;;  %v5527_v62 = vmax.f32 %v5009_v0, 0.0  ;;  %v4826_v45 = vadd.f32 %v9968_v48, %v9894_v42 }
 0x3d9   :  { %v5012_v6 = vpop.f32.mrf.mxu1  ;;  %v10129_v18 = vpop.f32.mrf.mxu0 }
 0x3da   :  { %v5013_v32 = vadd.f32 %v5012_v6, %v4820_v37  ;;  %6006 = vmatprep.mubr.bf16.mxu0 %v5600_v50  ;;  %v5528_v47 = vmax.f32 %v5011_v36, 0.0 }
 0x3db   :  { %v5014_v9 = vpop.f32.mrf.mxu1  ;;  %v10133_v8 = vpop.f32.mrf.mxu0  ;;  %6007 = vmatmul.mubr.bf16.gmra.mxu0 %v5599_v52  ;;  %v4832_v52 = vadd.f32 %v9984_v49, %v9889_v5  ;;  %v4838_v49 = vadd.f32 %v9990_v35, %v9889_v5 }
 0x3dc   :  { %v5015_v53 = vadd.f32 %v5014_v9, %v4822_v22  ;;  %v5531_v59 = vmax.f32 %v5013_v32, 0.0 }
 0x3dd   :  { %v5018_v29 = vpop.f32.mrf.mxu1  ;;  %v10135_v17 = vpop.f32.mrf.mxu0 }
 0x3de   :  { %v5532_v56 = vmax.f32 %v5015_v53, 0.0  ;;  %v5603_v37 = vpack.c.bf16 %v5531_v59, %v5527_v62  ;;  %v5019_v36 = vadd.f32 %v5018_v29, %v4826_v45  ;;  %v4840_v29 = vadd.f32 %v9998_v41, %v9894_v42  ;;  %v10880_v41 = vld [vmem:[#allocation8_spill] sm:$0xff] }
 0x3df   :  { %v5020_v2 = vpop.f32.mrf.mxu1  ;;  %v10137_v7 = vpop.f32.mrf.mxu0 }
 0x3e0   :  { %v5604_v54 = vpack.c.bf16 %v5532_v56, %v5528_v47  ;;  %v5021_v6 = vadd.f32 %v5020_v2, %v4828_v30  ;;  %v5535_v47 = vmax.f32 %v5019_v36, 0.0  ;;  %v4836_v30 = vadd.f32 %v9986_v14, %v9894_v42 }
 0x3e1   :  { %v5022_v50 = vpop.f32.mrf.mxu1  ;;  %v10145_v21 = vpop.f32.mrf.mxu0  ;;  %v10881_v36 = vsub.s32 3, %v10880_v41  ;;  %v10883_v14 = vsub.s32 2, %v10880_v41 }
 0x3e2   :  { %v5023_v22 = vadd.f32 %v5022_v50, %v4830_v19  ;;  %6014 = vmatprep.mubr.bf16.mxu0 %v5604_v54  ;;  %v5536_v48 = vmax.f32 %v5021_v6, 0.0 }
 0x3e3   :  { %v5024_v32 = vpop.f32.mrf.mxu1  ;;  %v10149_v57 = vpop.f32.mrf.mxu0  ;;  %6015 = vmatmul.mubr.bf16.gmra.mxu0 %v5603_v37  ;;  %v4842_v37 = vadd.f32 %v10002_v51, %v9889_v5 }
 0x3e4   :  { %v5025_v15 = vadd.f32 %v5024_v32, %v4832_v52  ;;  %v5539_v0 = vmax.f32 %v5023_v22, 0.0  ;;  %v10882_v32 = vld [vmem:[#allocation20_spill] sm:$0xff] }
 0x3e5   :  { %v5028_v9 = vpop.f32.mrf.mxu1  ;;  %v10151_v53 = vpop.f32.mrf.mxu0 }
 0x3e6   :  { %v5540_v59 = vmax.f32 %v5025_v15, 0.0  ;;  %v5607_v19 = vpack.c.bf16 %v5539_v0, %v5535_v47  ;;  %v5029_v6 = vadd.f32 %v5028_v9, %v4836_v30  ;;  %v10170_v15 = vrot.slane %v10882_v32, %v10881_v36 }
 0x3e7   :  { %v5030_v56 = vpop.f32.mrf.mxu1  ;;  %v10153_v62 = vpop.f32.mrf.mxu0  ;;  %v10175_v0 = vrot.slane %v10882_v32, %v10883_v14 }
 0x3e8   :  { %v5608_v2 = vpack.c.bf16 %v5540_v59, %v5536_v48  ;;  %v5031_v50 = vadd.f32 %v5030_v56, %v4838_v49  ;;  %v5543_v47 = vmax.f32 %v5029_v6, 0.0 }
 0x3e9   :  { %v5032_v54 = vpop.f32.mrf.mxu1  ;;  %v10161_v45 = vpop.f32.mrf.mxu0 }
 0x3ea   :  { %v5033_v52 = vadd.f32 %v5032_v54, %v4840_v29  ;;  %6022 = vmatprep.mubr.bf16.mxu0 %v5608_v2  ;;  %v5544_v9 = vmax.f32 %v5031_v50, 0.0  ;;  %v5074_v29 = vadd.f32 %v10008_v46, %v10170_v15  ;;  %v5076_v2 = vadd.f32 %v10016_v60, %v10175_v0 }
 0x3eb   :  { %v5034_v22 = vpop.f32.mrf.mxu1  ;;  %v10165_v35 = vpop.f32.mrf.mxu0  ;;  %6023 = vmatmul.mubr.bf16.gmra.mxu0 %v5607_v19  ;;  %v5072_v19 = vadd.f32 %v10004_v13, %v10175_v0  ;;  %v5078_v50 = vadd.f32 %v10020_v25, %v10170_v15  ;;  %v5084_v25 = vadd.f32 %v10025_v1, %v10170_v15 }
 0x3ec   :  { %v5035_v42 = vadd.f32 %v5034_v22, %v4842_v37  ;;  %v5547_v5 = vmax.f32 %v5033_v52, 0.0 }
 0x3ed   :  { %v10177_v51 = vpop.f32.mrf.mxu0  ;;  %v5264_v48 = vpop.f32.mrf.mxu1 }
 0x3ee   :  { %v5548_v59 = vmax.f32 %v5035_v42, 0.0  ;;  %v5611_v54 = vpack.c.bf16 %v5547_v5, %v5543_v47  ;;  %v5265_v41 = vadd.f32 %v5264_v48, %v5072_v19  ;;  %v5086_v48 = vadd.f32 %v10033_v28, %v10175_v0 }
 0x3ef   :  { %v10179_v56 = vpop.f32.mrf.mxu0  ;;  %v5266_v49 = vpop.f32.mrf.mxu1 }
 0x3f0   :  { %v5612_v30 = vpack.c.bf16 %v5548_v59, %v5544_v9  ;;  %v5267_v6 = vadd.f32 %v5266_v49, %v5074_v29  ;;  %v5425_v9 = vmax.f32 %v5265_v41, 0.0  ;;  %v5082_v29 = vadd.f32 %v10022_v33, %v10175_v0 }
 0x3f1   :  { %v10187_v37 = vpop.f32.mrf.mxu0  ;;  %v5268_v52 = vpop.f32.mrf.mxu1 }
 0x3f2   :  { %v5269_v22 = vadd.f32 %v5268_v52, %v5076_v2  ;;  %6030 = vmatprep.mubr.bf16.mxu0 %v5612_v30  ;;  %v5426_v14 = vmax.f32 %v5267_v6, 0.0 }
 0x3f3   :  { %v10191_v36 = vpop.f32.mrf.mxu0  ;;  %v5270_v46 = vpop.f32.mrf.mxu1  ;;  %6031 = vmatmul.mubr.bf16.gmra.mxu0 %v5611_v54  ;;  %v5088_v54 = vadd.f32 %v10037_v27, %v10170_v15  ;;  %v5094_v27 = vadd.f32 %v10041_v34, %v10170_v15 }
 0x3f4   :  { %v5271_v60 = vadd.f32 %v5270_v46, %v5078_v50  ;;  %v5429_v32 = vmax.f32 %v5269_v22, 0.0 }
 0x3f5   :  { %v10193_v42 = vpop.f32.mrf.mxu0  ;;  %v5274_v13 = vpop.f32.mrf.mxu1 }
 0x3f6   :  { %v5430_v5 = vmax.f32 %v5271_v60, 0.0  ;;  %v5553_v2 = vpack.c.bf16 %v5429_v32, %v5425_v9  ;;  %v5275_v6 = vadd.f32 %v5274_v13, %v5082_v29  ;;  %v5096_v9 = vadd.f32 %v10049_v20, %v10175_v0 }
 0x3f7   :  { %v10195_v59 = vpop.f32.mrf.mxu0  ;;  %v5276_v47 = vpop.f32.mrf.mxu1  ;;  %v5098_v29 = vadd.f32 %v10053_v16, %v10170_v15  ;;  %v5106_v16 = vadd.f32 %v10065_v61, %v10175_v0 }
 0x3f8   :  { %v5554_v49 = vpack.c.bf16 %v5430_v5, %v5426_v14  ;;  %v5277_v52 = vadd.f32 %v5276_v47, %v5084_v25  ;;  %v5433_v14 = vmax.f32 %v5275_v6, 0.0  ;;  %v5092_v47 = vadd.f32 %v10039_v26, %v10175_v0 }
 0x3f9   :  { %v10203_v30 = vpop.f32.mrf.mxu0  ;;  %v5278_v19 = vpop.f32.mrf.mxu1 }
 0x3fa   :  { %v5279_v50 = vadd.f32 %v5278_v19, %v5086_v48  ;;  %6071 = vmatprep.mubr.bf16.mxu1 %v5554_v49  ;;  %v5434_v60 = vmax.f32 %v5277_v52, 0.0 }
 0x3fb   :  { %v10207_v22 = vpop.f32.mrf.mxu0  ;;  %v5280_v1 = vpop.f32.mrf.mxu1  ;;  %6072 = vmatmul.mubr.bf16.vlgmr.msra.gmra.mxu1 %v5553_v2 }
 0x3fc   :  { %v5281_v28 = vadd.f32 %v5280_v1, %v5088_v54  ;;  %v5437_v41 = vmax.f32 %v5279_v50, 0.0 }
 0x3fd   :  { %v10209_v46 = vpop.f32.mrf.mxu0  ;;  %v5284_v33 = vpop.f32.mrf.mxu1 }
 0x3fe   :  { %v5438_v32 = vmax.f32 %v5281_v28, 0.0  ;;  %v5557_v25 = vpack.c.bf16 %v5437_v41, %v5433_v14  ;;  %v5285_v54 = vadd.f32 %v5284_v33, %v5092_v47  ;;  %v5102_v33 = vadd.f32 %v10055_v11, %v10175_v0 }
 0x3ff   :  { %v5286_v5 = vpop.f32.mrf.mxu1  ;;  %v10217_v48 = vpop.f32.mrf.mxu0 }
 0x400   :  { %v5558_v13 = vpack.c.bf16 %v5438_v32, %v5434_v60  ;;  %v5287_v2 = vadd.f32 %v5286_v5, %v5094_v27  ;;  %v5441_v28 = vmax.f32 %v5285_v54, 0.0  ;;  %v5104_v60 = vadd.f32 %v10057_v24, %v10170_v15 }
 0x401   :  { %v5288_v49 = vpop.f32.mrf.mxu1  ;;  %v10221_v50 = vpop.f32.mrf.mxu0 }
 0x402   :  { %v5289_v19 = vadd.f32 %v5288_v49, %v5096_v9  ;;  %6079 = vmatprep.mubr.bf16.mxu1 %v5558_v13  ;;  %v5442_v1 = vmax.f32 %v5287_v2, 0.0  ;;  %v5108_v9 = vadd.f32 %v10069_v43, %v10170_v15  ;;  %v5116_v43 = vadd.f32 %v10081_v63, %v10175_v0 }
 0x403   :  { %v5290_v52 = vpop.f32.mrf.mxu1  ;;  %6080 = vmatmul.mubr.bf16.gmra.mxu1 %v5557_v25  ;;  %v10229_v5 = vpop.f32.mrf.mxu0 }
 0x404   :  { %v5291_v34 = vadd.f32 %v5290_v52, %v5098_v29  ;;  %v5445_v20 = vmax.f32 %v5289_v19, 0.0 }
 0x405   :  { %v5294_v6 = vpop.f32.mrf.mxu1  ;;  %v10233_v29 = vpop.f32.mrf.mxu0 }
 0x406   :  { %v5446_v26 = vmax.f32 %v5291_v34, 0.0  ;;  %v5561_v14 = vpack.c.bf16 %v5445_v20, %v5441_v28  ;;  %v5295_v25 = vadd.f32 %v5294_v6, %v5102_v33  ;;  %v5114_v34 = vadd.f32 %v10073_v55, %v10170_v15  ;;  %v10884_v6 = vld [vmem:[#allocation24_spill] sm:$0xff] }
 0x407   :  { %v5296_v41 = vpop.f32.mrf.mxu1 }
 0x408   :  { %v5562_v32 = vpack.c.bf16 %v5446_v26, %v5442_v1  ;;  %v5297_v13 = vadd.f32 %v5296_v41, %v5104_v60  ;;  %v5449_v54 = vmax.f32 %v5295_v25, 0.0  ;;  %v5112_v1 = vadd.f32 %v10884_v6, %v10175_v0  ;;  %v10241_v26 = vpop.f32.mrf.mxu0 }
 0x409   :  { %v5298_v27 = vpop.f32.mrf.mxu1  ;;  %v5118_v60 = vadd.f32 %v10085_v58, %v10170_v15  ;;  %v5126_v58 = vadd.f32 %v10097_v23, %v10175_v0 }
 0x40a   :  { %v5299_v47 = vadd.f32 %v5298_v27, %v5106_v16  ;;  %6087 = vmatprep.mubr.bf16.mxu1 %v5562_v32  ;;  %v5450_v19 = vmax.f32 %v5297_v13, 0.0  ;;  %v10245_v27 = vpop.f32.mrf.mxu0 }
 0x40b   :  { %v5300_v49 = vpop.f32.mrf.mxu1  ;;  %6088 = vmatmul.mubr.bf16.gmra.mxu1 %v5561_v14 }
 0x40c   :  { %v5301_v24 = vadd.f32 %v5300_v49, %v5108_v9  ;;  %v5453_v61 = vmax.f32 %v5299_v47, 0.0 }
 0x40d   :  { %v5304_v2 = vpop.f32.mrf.mxu1 }
 0x40e   :  { %v5454_v11 = vmax.f32 %v5301_v24, 0.0  ;;  %v5565_v28 = vpack.c.bf16 %v5453_v61, %v5449_v54  ;;  %v5305_v33 = vadd.f32 %v5304_v2, %v5112_v1  ;;  %v5124_v24 = vadd.f32 %v10089_v38, %v10170_v15 }
 0x40f   :  { %v5306_v52 = vpop.f32.mrf.mxu1  ;;  %v5122_v2 = vadd.f32 %v10087_v3, %v10175_v0 }
 0x410   :  { %v5566_v20 = vpack.c.bf16 %v5454_v11, %v5450_v19  ;;  %v5307_v16 = vadd.f32 %v5306_v52, %v5114_v34  ;;  %v5457_v25 = vmax.f32 %v5305_v33, 0.0  ;;  %v10253_v19 = vpop.f32.mrf.mxu0  ;;  %v5128_v52 = vadd.f32 %v10101_v4, %v10170_v15 }
 0x411   :  { %v5308_v41 = vpop.f32.mrf.mxu1  ;;  %v5136_v4 = vadd.f32 %v10113_v44, %v10175_v0 }
 0x412   :  { %v5309_v32 = vadd.f32 %v5308_v41, %v5116_v43  ;;  %6095 = vmatprep.mubr.bf16.mxu1 %v5566_v20  ;;  %v5458_v13 = vmax.f32 %v5307_v16, 0.0  ;;  %v10257_v1 = vpop.f32.mrf.mxu0 }
 0x413   :  { %v5310_v14 = vpop.f32.mrf.mxu1  ;;  %6096 = vmatmul.mubr.bf16.gmra.mxu1 %v5565_v28 }
 0x414   :  { %v5311_v55 = vadd.f32 %v5310_v14, %v5118_v60  ;;  %v5461_v63 = vmax.f32 %v5309_v32, 0.0  ;;  %v5134_v32 = vadd.f32 %v10105_v31, %v10170_v15  ;;  %v5132_v14 = vadd.f32 %v10103_v40, %v10175_v0 }
 0x415   :  { %v5314_v9 = vpop.f32.mrf.mxu1 }
 0x416   :  { %v5462_v47 = vmax.f32 %v5311_v55, 0.0  ;;  %v5569_v11 = vpack.c.bf16 %v5461_v63, %v5457_v25  ;;  %v5315_v20 = vadd.f32 %v5314_v9, %v5122_v2  ;;  %v10265_v55 = vpop.f32.mrf.mxu0 }
 0x417   :  { %v5316_v49 = vpop.f32.mrf.mxu1 }
 0x418   :  { %v5570_v61 = vpack.c.bf16 %v5462_v47, %v5458_v13  ;;  %v5317_v34 = vadd.f32 %v5316_v49, %v5124_v24  ;;  %v5465_v60 = vmax.f32 %v5315_v20, 0.0  ;;  %v5138_v13 = vadd.f32 %v10117_v39, %v10170_v15 }
 0x419   :  { %v5318_v54 = vpop.f32.mrf.mxu1  ;;  %v5146_v39 = vadd.f32 %v10129_v18, %v10175_v0 }
 0x41a   :  { %v5319_v43 = vadd.f32 %v5318_v54, %v5126_v58  ;;  %6103 = vmatprep.mubr.bf16.mxu1 %v5570_v61  ;;  %v5466_v41 = vmax.f32 %v5317_v34, 0.0  ;;  %v10269_v58 = vpop.f32.mrf.mxu0 }
 0x41b   :  { %v5320_v6 = vpop.f32.mrf.mxu1  ;;  %6104 = vmatmul.mubr.bf16.gmra.mxu1 %v5569_v11 }
 0x41c   :  { %v5321_v38 = vadd.f32 %v5320_v6, %v5128_v52  ;;  %v5469_v23 = vmax.f32 %v5319_v43, 0.0  ;;  %v5144_v52 = vadd.f32 %v10121_v12, %v10170_v15  ;;  %v5142_v43 = vadd.f32 %v10119_v10, %v10175_v0  ;;  %v10277_v20 = vpop.f32.mrf.mxu0 }
 0x41d   :  { %v5324_v28 = vpop.f32.mrf.mxu1 }
 0x41e   :  { %v5470_v3 = vmax.f32 %v5321_v38, 0.0  ;;  %v5573_v63 = vpack.c.bf16 %v5469_v23, %v5465_v60  ;;  %v5325_v49 = vadd.f32 %v5324_v28, %v5132_v14  ;;  %v5148_v23 = vadd.f32 %v10133_v8, %v10170_v15 }
 0x41f   :  { %v5326_v16 = vpop.f32.mrf.mxu1  ;;  %v5156_v8 = vadd.f32 %v10145_v21, %v10175_v0 }
 0x420   :  { %v5574_v33 = vpack.c.bf16 %v5470_v3, %v5466_v41  ;;  %v5327_v47 = vadd.f32 %v5326_v16, %v5134_v32  ;;  %v5473_v11 = vmax.f32 %v5325_v49, 0.0  ;;  %v10281_v16 = vpop.f32.mrf.mxu0 }
 0x421   :  { %v5328_v9 = vpop.f32.mrf.mxu1 }
 0x422   :  { %v5329_v25 = vadd.f32 %v5328_v9, %v5136_v4  ;;  %6111 = vmatprep.mubr.bf16.mxu1 %v5574_v33  ;;  %v5474_v2 = vmax.f32 %v5327_v47, 0.0  ;;  %v10289_v47 = vpop.f32.mrf.mxu0 }
 0x423   :  { %v5330_v24 = vpop.f32.mrf.mxu1  ;;  %6112 = vmatmul.mubr.bf16.gmra.mxu1 %v5573_v63  ;;  %v5154_v63 = vadd.f32 %v10137_v7, %v10170_v15 }
 0x424   :  { %v5331_v31 = vadd.f32 %v5330_v24, %v5138_v13  ;;  %v5477_v44 = vmax.f32 %v5329_v25, 0.0  ;;  %v5152_v13 = vadd.f32 %v10135_v17, %v10175_v0  ;;  %v5158_v24 = vadd.f32 %v10149_v57, %v10170_v15 }
 0x425   :  { %v5334_v61 = vpop.f32.mrf.mxu1  ;;  %v5166_v57 = vadd.f32 %v10161_v45, %v10175_v0 }
 0x426   :  { %v5478_v40 = vmax.f32 %v5331_v31, 0.0  ;;  %v5577_v6 = vpack.c.bf16 %v5477_v44, %v5473_v11  ;;  %v5335_v3 = vadd.f32 %v5334_v61, %v5142_v43 }
 0x427   :  { %v5336_v54 = vpop.f32.mrf.mxu1 }
 0x428   :  { %v5578_v34 = vpack.c.bf16 %v5478_v40, %v5474_v2  ;;  %v5337_v28 = vadd.f32 %v5336_v54, %v5144_v52  ;;  %v5481_v33 = vmax.f32 %v5335_v3, 0.0  ;;  %v10293_v40 = vpop.f32.mrf.mxu0 }
 0x429   :  { %v5338_v38 = vpop.f32.mrf.mxu1 }
 0x42a   :  { %v5339_v41 = vadd.f32 %v5338_v38, %v5146_v39  ;;  %6119 = vmatprep.mubr.bf16.mxu1 %v5578_v34  ;;  %v5482_v4 = vmax.f32 %v5337_v28, 0.0  ;;  %v5164_v34 = vadd.f32 %v10153_v62, %v10170_v15  ;;  %v10301_v38 = vpop.f32.mrf.mxu0 }
 0x42b   :  { %v5340_v60 = vpop.f32.mrf.mxu1  ;;  %6120 = vmatmul.mubr.bf16.gmra.mxu1 %v5577_v6  ;;  %v5162_v6 = vadd.f32 %v10151_v53, %v10175_v0 }
 0x42c   :  { %v5341_v12 = vadd.f32 %v5340_v60, %v5148_v23  ;;  %v5485_v18 = vmax.f32 %v5339_v41, 0.0  ;;  %v5168_v41 = vadd.f32 %v10165_v35, %v10170_v15  ;;  %v5174_v35 = vadd.f32 %v10179_v56, %v10170_v15 }
 0x42d   :  { %v5344_v32 = vpop.f32.mrf.mxu1 }
 0x42e   :  { %v5486_v10 = vmax.f32 %v5341_v12, 0.0  ;;  %v5581_v25 = vpack.c.bf16 %v5485_v18, %v5481_v33  ;;  %v5345_v61 = vadd.f32 %v5344_v32, %v5152_v13 }
 0x42f   :  { %v5346_v14 = vpop.f32.mrf.mxu1 }
 0x430   :  { %v5582_v9 = vpack.c.bf16 %v5486_v10, %v5482_v4  ;;  %v5347_v31 = vadd.f32 %v5346_v14, %v5154_v63  ;;  %v5489_v52 = vmax.f32 %v5345_v61, 0.0 }
 0x431   :  { %v5348_v49 = vpop.f32.mrf.mxu1 }
 0x432   :  { %v5349_v44 = vadd.f32 %v5348_v49, %v5156_v8  ;;  %6127 = vmatprep.mubr.bf16.mxu1 %v5582_v9  ;;  %v5490_v54 = vmax.f32 %v5347_v31, 0.0  ;;  %v5176_v9 = vadd.f32 %v10187_v37, %v10175_v0  ;;  %v5178_v31 = vadd.f32 %v10191_v36, %v10170_v15 }
 0x433   :  { %v5350_v2 = vpop.f32.mrf.mxu1  ;;  %6128 = vmatmul.mubr.bf16.gmra.mxu1 %v5581_v25  ;;  %v5172_v25 = vadd.f32 %v10177_v51, %v10175_v0  ;;  %v5184_v36 = vadd.f32 %v10195_v59, %v10170_v15 }
 0x434   :  { %v5351_v7 = vadd.f32 %v5350_v2, %v5158_v24  ;;  %v5493_v21 = vmax.f32 %v5349_v44, 0.0 }
 0x435   :  { %v5354_v11 = vpop.f32.mrf.mxu1 }
 0x436   :  { %v5494_v17 = vmax.f32 %v5351_v7, 0.0  ;;  %v5585_v23 = vpack.c.bf16 %v5493_v21, %v5489_v52  ;;  %v5355_v12 = vadd.f32 %v5354_v11, %v5162_v6 }
 0x437   :  { %v5356_v39 = vpop.f32.mrf.mxu1 }
 0x438   :  { %v5586_v43 = vpack.c.bf16 %v5494_v17, %v5490_v54  ;;  %v5357_v3 = vadd.f32 %v5356_v39, %v5164_v34  ;;  %v5497_v14 = vmax.f32 %v5355_v12, 0.0  ;;  %v5186_v34 = vadd.f32 %v10203_v30, %v10175_v0 }
 0x439   :  { %v5358_v28 = vpop.f32.mrf.mxu1 }
 0x43a   :  { %v5359_v60 = vadd.f32 %v5358_v28, %v5166_v57  ;;  %6135 = vmatprep.mubr.bf16.mxu1 %v5586_v43  ;;  %v5498_v53 = vmax.f32 %v5357_v3, 0.0  ;;  %v5182_v43 = vadd.f32 %v10193_v42, %v10175_v0  ;;  %v5188_v28 = vadd.f32 %v10207_v22, %v10170_v15 }
 0x43b   :  { %v5360_v18 = vpop.f32.mrf.mxu1  ;;  %v10305_v62 = vpop.f32.mrf.mxu0  ;;  %6136 = vmatmul.mubr.bf16.gmra.mxu1 %v5585_v23  ;;  %v5194_v22 = vadd.f32 %v10217_v48, %v10170_v15 }
 0x43c   :  { %v5361_v45 = vadd.f32 %v5360_v18, %v5168_v41  ;;  %v5501_v32 = vmax.f32 %v5359_v60, 0.0 }
 0x43d   :  { %v5364_v4 = vpop.f32.mrf.mxu1  ;;  %v10307_v10 = vpop.f32.mrf.mxu0 }
 0x43e   :  { %v5502_v33 = vmax.f32 %v5361_v45, 0.0  ;;  %v5589_v49 = vpack.c.bf16 %v5501_v32, %v5497_v14  ;;  %v5365_v2 = vadd.f32 %v5364_v4, %v5172_v25  ;;  %v5196_v14 = vadd.f32 %v10221_v50, %v10175_v0 }
 0x43f   :  { %v5366_v63 = vpop.f32.mrf.mxu1  ;;  %v10309_v8 = vpop.f32.mrf.mxu0  ;;  %v5198_v25 = vadd.f32 %v10229_v5, %v10170_v15  ;;  %v5204_v5 = vadd.f32 %v10241_v26, %v10170_v15 }
 0x440   :  { %v5590_v13 = vpack.c.bf16 %v5502_v33, %v5498_v53  ;;  %v5367_v44 = vadd.f32 %v5366_v63, %v5174_v35  ;;  %v5505_v52 = vmax.f32 %v5365_v2, 0.0  ;;  %v5192_v35 = vadd.f32 %v10209_v46, %v10175_v0 }
 0x441   :  { %v5368_v24 = vpop.f32.mrf.mxu1  ;;  %v10319_v7 = vpop.f32.mrf.mxu0 }
 0x442   :  { %v5369_v61 = vadd.f32 %v5368_v24, %v5176_v9  ;;  %6143 = vmatprep.mubr.bf16.mxu1 %v5590_v13  ;;  %v5506_v54 = vmax.f32 %v5367_v44, 0.0 }
 0x443   :  { %v5370_v21 = vpop.f32.mrf.mxu1  ;;  %6144 = vmatmul.mubr.bf16.gmra.mxu1 %v5589_v49  ;;  %v10321_v51 = vpop.f32.mrf.mxu0 }
 0x444   :  { %v5371_v56 = vadd.f32 %v5370_v21, %v5178_v31  ;;  %v5509_v11 = vmax.f32 %v5369_v61, 0.0 }
 0x445   :  { %v5374_v37 = vpop.f32.mrf.mxu1  ;;  %v10331_v12 = vpop.f32.mrf.mxu0 }
 0x446   :  { %v5510_v17 = vmax.f32 %v5371_v56, 0.0  ;;  %v5593_v6 = vpack.c.bf16 %v5509_v11, %v5505_v52  ;;  %v5375_v60 = vadd.f32 %v5374_v37, %v5182_v43  ;;  %v5202_v52 = vadd.f32 %v10233_v29, %v10175_v0 }
 0x447   :  { %v5376_v39 = vpop.f32.mrf.mxu1  ;;  %v10333_v42 = vpop.f32.mrf.mxu0 }
 0x448   :  { %v5594_v57 = vpack.c.bf16 %v5510_v17, %v5506_v54  ;;  %v5377_v41 = vadd.f32 %v5376_v39, %v5184_v36  ;;  %v5513_v53 = vmax.f32 %v5375_v60, 0.0  ;;  %v5206_v54 = vadd.f32 %v10245_v27, %v10175_v0 }
 0x449   :  { %v5378_v23 = vpop.f32.mrf.mxu1  ;;  %v10343_v31 = vpop.f32.mrf.mxu0 }
 0x44a   :  { %v5379_v3 = vadd.f32 %v5378_v23, %v5186_v34  ;;  %6151 = vmatprep.mubr.bf16.mxu1 %v5594_v57  ;;  %v5514_v32 = vmax.f32 %v5377_v41, 0.0  ;;  %v5208_v34 = vadd.f32 %v10253_v19, %v10170_v15  ;;  %v5214_v19 = vadd.f32 %v10265_v55, %v10170_v15 }
 0x44b   :  { %v5380_v18 = vpop.f32.mrf.mxu1  ;;  %6152 = vmatmul.mubr.bf16.gmra.mxu1 %v5593_v6  ;;  %v10345_v11 = vpop.f32.mrf.mxu0 }
 0x44c   :  { %v5381_v59 = vadd.f32 %v5380_v18, %v5188_v28  ;;  %v5517_v45 = vmax.f32 %v5379_v3, 0.0 }
 0x44d   :  { %v5384_v30 = vpop.f32.mrf.mxu1  ;;  %v10355_v6 = vpop.f32.mrf.mxu0 }
 0x44e   :  { %v5518_v4 = vmax.f32 %v5381_v59, 0.0  ;;  %v5597_v9 = vpack.c.bf16 %v5517_v45, %v5513_v53  ;;  %v5385_v44 = vadd.f32 %v5384_v30, %v5192_v35  ;;  %v5216_v45 = vadd.f32 %v10269_v58, %v10175_v0 }
 0x44f   :  { %v5386_v33 = vpop.f32.mrf.mxu1  ;;  %v10357_v18 = vpop.f32.mrf.mxu0 }
 0x450   :  { %v5598_v63 = vpack.c.bf16 %v5518_v4, %v5514_v32  ;;  %v5387_v49 = vadd.f32 %v5386_v33, %v5194_v22  ;;  %v5521_v46 = vmax.f32 %v5385_v44, 0.0  ;;  %v5212_v32 = vadd.f32 %v10257_v1, %v10175_v0 }
 0x451   :  { %v5388_v13 = vpop.f32.mrf.mxu1  ;;  %v5218_v33 = vadd.f32 %v10277_v20, %v10170_v15  ;;  %v5224_v20 = vadd.f32 %v10289_v47, %v10170_v15 }
 0x452   :  { %v5389_v24 = vadd.f32 %v5388_v13, %v5196_v14  ;;  %6159 = vmatprep.mubr.bf16.mxu1 %v5598_v63  ;;  %v5522_v21 = vmax.f32 %v5387_v49, 0.0  ;;  %v10367_v63 = vpop.f32.mrf.mxu0 }
 0x453   :  { %v5390_v61 = vpop.f32.mrf.mxu1  ;;  %6160 = vmatmul.mubr.bf16.gmra.mxu1 %v5597_v9 }
 0x454   :  { %v5391_v48 = vadd.f32 %v5390_v61, %v5198_v25  ;;  %v5525_v2 = vmax.f32 %v5389_v24, 0.0  ;;  %v10369_v24 = vpop.f32.mrf.mxu0  ;;  %v5226_v61 = vadd.f32 %v10293_v40, %v10175_v0 }
 0x455   :  { %v5394_v50 = vpop.f32.mrf.mxu1 }
 0x456   :  { %v5526_v56 = vmax.f32 %v5391_v48, 0.0  ;;  %v5601_v39 = vpack.c.bf16 %v5525_v2, %v5521_v46  ;;  %v5395_v23 = vadd.f32 %v5394_v50, %v5202_v52  ;;  %v5222_v2 = vadd.f32 %v10281_v16, %v10175_v0 }
 0x457   :  { %v5396_v37 = vpop.f32.mrf.mxu1 }
 0x458   :  { %v5602_v17 = vpack.c.bf16 %v5526_v56, %v5522_v21  ;;  %v5397_v57 = vadd.f32 %v5396_v37, %v5204_v5  ;;  %v5529_v29 = vmax.f32 %v5395_v23, 0.0  ;;  %v5228_v56 = vadd.f32 %v10301_v38, %v10170_v15  ;;  %v10379_v5 = vpop.f32.mrf.mxu0 }
 0x459   :  { %v5398_v36 = vpop.f32.mrf.mxu1 }
 0x45a   :  { %v5399_v43 = vadd.f32 %v5398_v36, %v5206_v54  ;;  %6167 = vmatprep.mubr.bf16.mxu1 %v5602_v17  ;;  %v5530_v3 = vmax.f32 %v5397_v57, 0.0  ;;  %v10381_v36 = vpop.f32.mrf.mxu0 }
 0x45b   :  { %v5400_v28 = vpop.f32.mrf.mxu1  ;;  %6168 = vmatmul.mubr.bf16.gmra.mxu1 %v5601_v39 }
 0x45c   :  { %v5401_v26 = vadd.f32 %v5400_v28, %v5208_v34  ;;  %v5533_v41 = vmax.f32 %v5399_v43, 0.0  ;;  %v10383_v57 = vpop.f32.mrf.mxu0 }
 0x45d   :  { %v5404_v27 = vpop.f32.mrf.mxu1 }
 0x45e   :  { %v5534_v60 = vmax.f32 %v5401_v26, 0.0  ;;  %v5605_v4 = vpack.c.bf16 %v5533_v41, %v5529_v29  ;;  %v5405_v35 = vadd.f32 %v5404_v27, %v5212_v32  ;;  %v10385_v15 = vpop.f32.mrf.mxu0 }
 0x45f   :  { %v5406_v59 = vpop.f32.mrf.mxu1 }
 0x460   :  { %v5606_v30 = vpack.c.bf16 %v5534_v60, %v5530_v3  ;;  %v5407_v22 = vadd.f32 %v5406_v59, %v5214_v19  ;;  %v5537_v1 = vmax.f32 %v5405_v35, 0.0  ;;  %v10387_v38 = vpop.f32.mrf.mxu0 }
 0x461   :  { %v5408_v53 = vpop.f32.mrf.mxu1 }
 0x462   :  { %v5409_v14 = vadd.f32 %v5408_v53, %v5216_v45  ;;  %6175 = vmatprep.mubr.bf16.mxu1 %v5606_v30  ;;  %v5538_v25 = vmax.f32 %v5407_v22, 0.0  ;;  %v10389_v43 = vpop.f32.mrf.mxu0  ;;  %v6753_v53 = vadd.f32 %v10307_v10, %v10305_v62 }
 0x463   :  { %v5410_v9 = vpop.f32.mrf.mxu1  ;;  %6176 = vmatmul.mubr.bf16.gmra.mxu1 %v5605_v4 }
 0x464   :  { %v5411_v55 = vadd.f32 %v5410_v9, %v5218_v33  ;;  %v5541_v13 = vmax.f32 %v5409_v14, 0.0  ;;  %v10391_v23 = vpop.f32.mrf.mxu0  ;;  %v10424_v33 = vld [vmem:[%s10639_s6] ss:$0 sm:$0xff] }
 0x465   :  { %v5414_v58 = vpop.f32.mrf.mxu1  ;;  %v5913_v9 = vadd.f32 %v6753_v53, %v10424_v33  ;;  %v6771_v53 = vadd.f32 %v10379_v5, %v10369_v24 }
 0x466   :  { %v5542_v49 = vmax.f32 %v5411_v55, 0.0  ;;  %v5609_v50 = vpack.c.bf16 %v5541_v13, %v5537_v1  ;;  %v5415_v54 = vadd.f32 %v5414_v58, %v5222_v2  ;;  %v10393_v28 = vpop.f32.mrf.mxu0  ;;  %v6756_v55 = vadd.f32 %v10319_v7, %v10309_v8 }
 0x467   :  { %v5416_v44 = vpop.f32.mrf.mxu1  ;;  %v6759_v1 = vadd.f32 %v10331_v12, %v10321_v51  ;;  %v6762_v2 = vadd.f32 %v10343_v31, %v10333_v42 }
 0x468   :  { %v5610_v48 = vpack.c.bf16 %v5542_v49, %v5538_v25  ;;  %v5417_v46 = vadd.f32 %v5416_v44, %v5224_v20  ;;  %v5545_v0 = vmax.f32 %v5415_v54, 0.0  ;;  %v10395_v26 = vpop.f32.mrf.mxu0  ;;  %v5916_v10 = vadd.f32 %v6756_v55, %v10424_v33 }
 0x469   :  { %v5418_v21 = vpop.f32.mrf.mxu1  ;;  %v5937_v55 = vadd.f32 %v6771_v53, %v10424_v33 }
 0x46a   :  { %v5419_v37 = vadd.f32 %v5418_v21, %v5226_v61  ;;  %6183 = vmatprep.mubr.bf16.mxu1 %v5610_v48  ;;  %v5546_v40 = vmax.f32 %v5417_v46, 0.0  ;;  %v10397_v41 = vpop.f32.mrf.mxu0  ;;  %v5921_v48 = vadd.f32 %v6759_v1, %v10424_v33  ;;  %v5924_v46 = vadd.f32 %v6762_v2, %v10424_v33 }
 0x46b   :  { %v5420_v17 = vpop.f32.mrf.mxu1  ;;  %6184 = vmatmul.mubr.bf16.gmra.mxu1 %v5609_v50  ;;  %v6777_v1 = vadd.f32 %v10387_v38, %v10385_v15 }
 0x46c   :  { %v5421_v47 = vadd.f32 %v5420_v17, %v5228_v56  ;;  %v5549_v52 = vmax.f32 %v5419_v37, 0.0  ;;  %v10399_v27 = vpop.f32.mrf.mxu0  ;;  %v6765_v37 = vadd.f32 %v10355_v6, %v10345_v11 }
 0x46e   :  { %v5550_v39 = vmax.f32 %v5421_v47, 0.0  ;;  %v5613_v34 = vpack.c.bf16 %v5549_v52, %v5545_v0  ;;  %v10401_v3 = vpop.f32.mrf.mxu0  ;;  %v5929_v52 = vadd.f32 %v6765_v37, %v10424_v33 }
 0x470   :  { %v5614_v16 = vpack.c.bf16 %v5550_v39, %v5546_v40  ;;  %v10403_v60 = vpop.f32.mrf.mxu0  ;;  %v6768_v40 = vadd.f32 %v10367_v63, %v10357_v18 }
 0x472   :  { %6191 = vmatprep.mubr.bf16.mxu1 %v5614_v16  ;;  %v10405_v29 = vpop.f32.mrf.mxu0 }
 0x473   :  { %6192 = vmatmul.mubr.bf16.gmra.mxu1 %v5613_v34  ;;  %v5932_v34 = vadd.f32 %v6768_v40, %v10424_v33 }
 0x474   :  { %v10407_v59 = vpop.f32.mrf.mxu0 }
 0x476   :  { %v10409_v19 = vpop.f32.mrf.mxu0 }
 0x478   :  { %v10411_v45 = vpop.f32.mrf.mxu0 }
 0x47a   :  { %v10413_v30 = vpop.f32.mrf.mxu0 }
 0x47c   :  { %v10415_v32 = vpop.f32.mrf.mxu0 }
 0x47e   :  { %v10417_v4 = vpop.f32.mrf.mxu0 }
 0x480   :  { %v10426_v22 = vpop.f32.mrf.mxu0 }
 0x482   :  { %v10431_v58 = vpop.f32.mrf.mxu0 }
 0x484   :  { %v10439_v20 = vpop.f32.mrf.mxu0 }
 0x486   :  { %v10447_v12 = vpop.f32.mrf.mxu0 }
 0x488   :  { %v10455_v31 = vpop.f32.mrf.mxu0 }
 0x48a   :  { %v10463_v6 = vpop.f32.mrf.mxu0 }
 0x48c   :  { %v10471_v63 = vpop.f32.mrf.mxu0 }
 0x48e   :  { %v10479_v5 = vpop.f32.mrf.mxu0 }
 0x4bb   :  { %v6863_v14 = vpop.f32.mrf.mxu1 }
 0x4bd   :  { %v6864_v35 = vpop.f32.mrf.mxu1 }
 0x4be   :  { %v6865_v13 = vadd.f32 %v6864_v35, %v6863_v14 }
 0x4bf   :  { %v6866_v25 = vpop.f32.mrf.mxu1 }
 0x4c0   :  { %v6074_v49 = vadd.f32 %v6865_v13, %v5913_v9  ;;  %v6774_v13 = vadd.f32 %v10383_v57, %v10381_v36  ;;  %v10487_v57 = vpop.f32.mrf.mxu0 }
 0x4c1   :  { %v6867_v62 = vpop.f32.mrf.mxu1 }
 0x4c2   :  { %6200 = vst [vmem:[%s10640_s7] sm:$0xff] %v6074_v49  ;;  %v6868_v44 = vadd.f32 %v6867_v62, %v6866_v25  ;;  %v10495_v38 = vpop.f32.mrf.mxu0 }
 0x4c3   :  { %v6869_v61 = vpop.f32.mrf.mxu1 }
 0x4c4   :  { %v6077_v8 = vadd.f32 %v6868_v44, %v5916_v10  ;;  %v5940_v10 = vadd.f32 %v6774_v13, %v10424_v33  ;;  %v6795_v13 = vadd.f32 %v10411_v45, %v10409_v19 }
 0x4c5   :  { %v6870_v7 = vpop.f32.mrf.mxu1 }
 0x4c6   :  { %6201 = vst [vmem:[%s10640_s7 + $0x8] sm:$0xff] %v6077_v8  ;;  %v6871_v51 = vadd.f32 %v6870_v7, %v6869_v61  ;;  %v5945_v7 = vadd.f32 %v6777_v1, %v10424_v33 }
 0x4c7   :  { %v6872_v50 = vpop.f32.mrf.mxu1 }
 0x4c8   :  { %v6082_v21 = vadd.f32 %v6871_v51, %v5921_v48  ;;  %v6780_v48 = vadd.f32 %v10391_v23, %v10389_v43  ;;  %v10503_v23 = vpop.f32.mrf.mxu0 }
 0x4c9   :  { %v6873_v56 = vpop.f32.mrf.mxu1 }
 0x4ca   :  { %6202 = vst [vmem:[%s10640_s7 + $0x10] sm:$0xff] %v6082_v21  ;;  %v6874_v42 = vadd.f32 %v6873_v56, %v6872_v50  ;;  %v5948_v21 = vadd.f32 %v6780_v48, %v10424_v33  ;;  %v6783_v56 = vadd.f32 %v10395_v26, %v10393_v28  ;;  %v10511_v26 = vpop.f32.mrf.mxu0 }
 0x4cb   :  { %v6875_v54 = vpop.f32.mrf.mxu1 }
 0x4cc   :  { %v6085_v17 = vadd.f32 %v6874_v42, %v5924_v46 }
 0x4cd   :  { %v6876_v47 = vpop.f32.mrf.mxu1 }
 0x4ce   :  { %6203 = vst [vmem:[%s10640_s7 + $0x18] sm:$0xff] %v6085_v17  ;;  %v6877_v11 = vadd.f32 %v6876_v47, %v6875_v54  ;;  %v5953_v54 = vadd.f32 %v6783_v56, %v10424_v33  ;;  %v6786_v17 = vadd.f32 %v10399_v27, %v10397_v41  ;;  %v10519_v27 = vpop.f32.mrf.mxu0 }
 0x4cf   :  { %v6878_v39 = vpop.f32.mrf.mxu1 }
 0x4d0   :  { %v6090_v0 = vadd.f32 %v6877_v11, %v5929_v52  ;;  %v5956_v11 = vadd.f32 %v6786_v17, %v10424_v33 }
 0x4d1   :  { %v6879_v16 = vpop.f32.mrf.mxu1 }
 0x4d2   :  { %6204 = vst [vmem:[%s10640_s7 + $0x20] sm:$0xff] %v6090_v0  ;;  %v6880_v18 = vadd.f32 %v6879_v16, %v6878_v39  ;;  %v6789_v39 = vadd.f32 %v10403_v60, %v10401_v3  ;;  %v10527_v60 = vpop.f32.mrf.mxu0 }
 0x4d3   :  { %v6881_v14 = vpop.f32.mrf.mxu1 }
 0x4d4   :  { %v6093_v35 = vadd.f32 %v6880_v18, %v5932_v34  ;;  %v5961_v53 = vadd.f32 %v6789_v39, %v10424_v33  ;;  %v6792_v18 = vadd.f32 %v10407_v59, %v10405_v29  ;;  %v10535_v59 = vpop.f32.mrf.mxu0  ;;  %v6813_v39 = vadd.f32 %v10487_v57, %v10479_v5 }
 0x4d5   :  { %v6882_v9 = vpop.f32.mrf.mxu1 }
 0x4d6   :  { %6205 = vst [vmem:[%s10640_s7 + $0x28] sm:$0xff] %v6093_v35  ;;  %v6883_v24 = vadd.f32 %v6882_v9, %v6881_v14  ;;  %v10543_v45 = vpop.f32.mrf.mxu0 }
 0x4d7   :  { %v6884_v25 = vpop.f32.mrf.mxu1 }
 0x4d8   :  { %v6098_v49 = vadd.f32 %v6883_v24, %v5937_v55  ;;  %v5964_v55 = vadd.f32 %v6792_v18, %v10424_v33 }
 0x4d9   :  { %v6885_v62 = vpop.f32.mrf.mxu1 }
 0x4da   :  { %6206 = vst [vmem:[%s10640_s7 + $0x30] sm:$0xff] %v6098_v49  ;;  %v6886_v36 = vadd.f32 %v6885_v62, %v6884_v25  ;;  %v5969_v62 = vadd.f32 %v6795_v13, %v10424_v33 }
 0x4db   :  { %v6887_v44 = vpop.f32.mrf.mxu1 }
 0x4dc   :  { %v6101_v61 = vadd.f32 %v6886_v36, %v5940_v10  ;;  %v6798_v10 = vadd.f32 %v10415_v32, %v10413_v30  ;;  %v6824_v32 = vpop.f32.mrf.mxu0 }
 0x4dd   :  { %v6888_v8 = vpop.f32.mrf.mxu1 }
 0x4de   :  { %6207 = vst [vmem:[%s10640_s7 + $0x38] sm:$0xff] %v6101_v61  ;;  %v6889_v15 = vadd.f32 %v6888_v8, %v6887_v44  ;;  %v5972_v61 = vadd.f32 %v6798_v10, %v10424_v33  ;;  %v6801_v8 = vadd.f32 %v10426_v22, %v10417_v4  ;;  %v6826_v4 = vpop.f32.mrf.mxu0 }
 0x4df   :  { %v6890_v2 = vpop.f32.mrf.mxu1 }
 0x4e0   :  { %v6106_v51 = vadd.f32 %v6889_v15, %v5945_v7 }
 0x4e1   :  { %v6891_v50 = vpop.f32.mrf.mxu1 }
 0x4e2   :  { %6208 = vst [vmem:[%s10640_s7 + $0x40] sm:$0xff] %v6106_v51  ;;  %v6892_v43 = vadd.f32 %v6891_v50, %v6890_v2  ;;  %v5977_v2 = vadd.f32 %v6801_v8, %v10424_v33  ;;  %v6804_v51 = vadd.f32 %v10439_v20, %v10431_v58  ;;  %v6827_v58 = vpop.f32.mrf.mxu0 }
 0x4e3   :  { %v6893_v46 = vpop.f32.mrf.mxu1 }
 0x4e4   :  { %v6109_v37 = vadd.f32 %v6892_v43, %v5948_v21  ;;  %v5980_v43 = vadd.f32 %v6804_v51, %v10424_v33 }
 0x4e5   :  { %v6894_v42 = vpop.f32.mrf.mxu1 }
 0x4e6   :  { %6209 = vst [vmem:[%s10640_s7 + $0x48] sm:$0xff] %v6109_v37  ;;  %v6895_v28 = vadd.f32 %v6894_v42, %v6893_v46  ;;  %v6807_v46 = vadd.f32 %v10455_v31, %v10447_v12  ;;  %v6829_v12 = vpop.f32.mrf.mxu0 }
 0x4e7   :  { %v6896_v47 = vpop.f32.mrf.mxu1 }
 0x4e8   :  { %v6114_v52 = vadd.f32 %v6895_v28, %v5953_v54  ;;  %v5985_v17 = vadd.f32 %v6807_v46, %v10424_v33  ;;  %v6810_v28 = vadd.f32 %v10471_v63, %v10463_v6  ;;  %v6830_v6 = vpop.f32.mrf.mxu0 }
 0x4e9   :  { %v6897_v40 = vpop.f32.mrf.mxu1  ;;  %v6831_v51 = vadd.f32 %v6830_v6, %v6829_v12 }
 0x4ea   :  { %6210 = vst [vmem:[%s10640_s7 + $0x50] sm:$0xff] %v6114_v52  ;;  %v6898_v41 = vadd.f32 %v6897_v40, %v6896_v47  ;;  %v6832_v5 = vpop.f32.mrf.mxu0 }
 0x4eb   :  { %v6899_v0 = vpop.f32.mrf.mxu1 }
 0x4ec   :  { %v6117_v16 = vadd.f32 %v6898_v41, %v5956_v11  ;;  %v5988_v11 = vadd.f32 %v6810_v28, %v10424_v33 }
 0x4ed   :  { %v6900_v34 = vpop.f32.mrf.mxu1 }
 0x4ee   :  { %6211 = vst [vmem:[%s10640_s7 + $0x58] sm:$0xff] %v6117_v16  ;;  %v6901_v3 = vadd.f32 %v6900_v34, %v6899_v0  ;;  %v5993_v34 = vadd.f32 %v6813_v39, %v10424_v33 }
 0x4ef   :  { %v6902_v14 = vpop.f32.mrf.mxu1 }
 0x4f0   :  { %v6122_v35 = vadd.f32 %v6901_v3, %v5961_v53  ;;  %v6816_v53 = vadd.f32 %v10503_v23, %v10495_v38  ;;  %v6833_v38 = vpop.f32.mrf.mxu0 }
 0x4f1   :  { %v6903_v9 = vpop.f32.mrf.mxu1  ;;  %v6834_v46 = vadd.f32 %v6833_v38, %v6832_v5 }
 0x4f2   :  { %6212 = vst [vmem:[%s10640_s7 + $0x60] sm:$0xff] %v6122_v35  ;;  %v6904_v29 = vadd.f32 %v6903_v9, %v6902_v14  ;;  %v5996_v35 = vadd.f32 %v6816_v53, %v10424_v33  ;;  %v6819_v9 = vadd.f32 %v10519_v27, %v10511_v26  ;;  %v6835_v26 = vpop.f32.mrf.mxu0 }
 0x4f3   :  { %v6905_v24 = vpop.f32.mrf.mxu1 }
 0x4f4   :  { %v6125_v25 = vadd.f32 %v6904_v29, %v5964_v55 }
 0x4f5   :  { %v6906_v49 = vpop.f32.mrf.mxu1 }
 0x4f6   :  { %6213 = vst [vmem:[%s10640_s7 + $0x68] sm:$0xff] %v6125_v25  ;;  %v6907_v19 = vadd.f32 %v6906_v49, %v6905_v24  ;;  %v6001_v24 = vadd.f32 %v6819_v9, %v10424_v33  ;;  %v6822_v25 = vadd.f32 %v10535_v59, %v10527_v60 }
 0x4f7   :  { %v6908_v1 = vpop.f32.mrf.mxu1 }
 0x4f8   :  { %v6130_v36 = vadd.f32 %v6907_v19, %v5969_v62  ;;  %v6004_v19 = vadd.f32 %v6822_v25, %v10424_v33 }
 0x4f9   :  { %v6909_v44 = vpop.f32.mrf.mxu1 }
 0x4fa   :  { %6214 = vst [vmem:[%s10640_s7 + $0x70] sm:$0xff] %v6130_v36  ;;  %v6910_v30 = vadd.f32 %v6909_v44, %v6908_v1  ;;  %v6825_v1 = vadd.f32 %v6824_v32, %v10543_v45  ;;  %v6836_v44 = vpop.f32.mrf.mxu0 }
 0x4fb   :  { %v6911_v7 = vpop.f32.mrf.mxu1  ;;  %v6837_v28 = vadd.f32 %v6836_v44, %v6835_v26 }
 0x4fc   :  { %v6133_v48 = vadd.f32 %v6910_v30, %v5972_v61  ;;  %v6009_v8 = vadd.f32 %v6825_v1, %v10424_v33  ;;  %v6828_v30 = vadd.f32 %v6827_v58, %v6826_v4 }
 0x4fd   :  { %v6912_v15 = vpop.f32.mrf.mxu1 }
 0x4fe   :  { %6215 = vst [vmem:[%s10640_s7 + $0x78] sm:$0xff] %v6133_v48  ;;  %v6913_v50 = vadd.f32 %v6912_v15, %v6911_v7  ;;  %v6838_v48 = vpop.f32.mrf.mxu0 }
 0x4ff   :  { %v6914_v22 = vpop.f32.mrf.mxu1 }
 0x500   :  { %v6138_v21 = vadd.f32 %v6913_v50, %v5977_v2  ;;  %v6012_v2 = vadd.f32 %v6828_v30, %v10424_v33 }
 0x501   :  { %v6915_v56 = vpop.f32.mrf.mxu1 }
 0x502   :  { %6216 = vst [vmem:[%s10640_s7 + $0x80] sm:$0xff] %v6138_v21  ;;  %v6916_v37 = vadd.f32 %v6915_v56, %v6914_v22  ;;  %v6839_v22 = vpop.f32.mrf.mxu0 }
 0x503   :  { %v6917_v20 = vpop.f32.mrf.mxu1  ;;  %v6840_v39 = vadd.f32 %v6839_v22, %v6838_v48 }
 0x504   :  { %v6141_v42 = vadd.f32 %v6916_v37, %v5980_v43  ;;  %v6017_v43 = vadd.f32 %v6831_v51, %v10424_v33  ;;  %v6841_v58 = vpop.f32.mrf.mxu0 }
 0x505   :  { %v6918_v54 = vpop.f32.mrf.mxu1 }
 0x506   :  { %6217 = vst [vmem:[%s10640_s7 + $0x88] sm:$0xff] %v6141_v42  ;;  %v6919_v47 = vadd.f32 %v6918_v54, %v6917_v20  ;;  %v6842_v12 = vpop.f32.mrf.mxu0 }
 0x507   :  { %v6920_v31 = vpop.f32.mrf.mxu1  ;;  %v6843_v53 = vadd.f32 %v6842_v12, %v6841_v58 }
 0x508   :  { %v6146_v52 = vadd.f32 %v6919_v47, %v5985_v17  ;;  %v6020_v17 = vadd.f32 %v6834_v46, %v10424_v33  ;;  %v6844_v6 = vpop.f32.mrf.mxu0 }
 0x509   :  { %v6921_v40 = vpop.f32.mrf.mxu1 }
 0x50a   :  { %6218 = vst [vmem:[%s10640_s7 + $0x90] sm:$0xff] %v6146_v52  ;;  %v6922_v41 = vadd.f32 %v6921_v40, %v6920_v31  ;;  %v6845_v5 = vpop.f32.mrf.mxu0 }
 0x50b   :  { %v6923_v63 = vpop.f32.mrf.mxu1  ;;  %v6846_v9 = vadd.f32 %v6845_v5, %v6844_v6 }
 0x50c   :  { %v6149_v0 = vadd.f32 %v6922_v41, %v5988_v11  ;;  %v6025_v11 = vadd.f32 %v6837_v28, %v10424_v33 }
 0x50d   :  { %v6924_v16 = vpop.f32.mrf.mxu1 }
 0x50e   :  { %6219 = vst [vmem:[%s10640_s7 + $0x98] sm:$0xff] %v6149_v0  ;;  %v6925_v18 = vadd.f32 %v6924_v16, %v6923_v63 }
 0x50f   :  { %v6926_v57 = vpop.f32.mrf.mxu1 }
 0x510   :  { %v6154_v3 = vadd.f32 %v6925_v18, %v5993_v34  ;;  %v6028_v34 = vadd.f32 %v6840_v39, %v10424_v33 }
 0x511   :  { %v6927_v14 = vpop.f32.mrf.mxu1 }
 0x512   :  { %6220 = vst [vmem:[%s10640_s7 + $0xa0] sm:$0xff] %v6154_v3  ;;  %v6928_v55 = vadd.f32 %v6927_v14, %v6926_v57 }
 0x513   :  { %v6929_v23 = vpop.f32.mrf.mxu1 }
 0x514   :  { %v6157_v13 = vadd.f32 %v6928_v55, %v5996_v35  ;;  %v6033_v35 = vadd.f32 %v6843_v53, %v10424_v33 }
 0x515   :  { %v6930_v29 = vpop.f32.mrf.mxu1 }
 0x516   :  { %6221 = vst [vmem:[%s10640_s7 + $0xa8] sm:$0xff] %v6157_v13  ;;  %v6931_v49 = vadd.f32 %v6930_v29, %v6929_v23  ;;  %v6036_v29 = vadd.f32 %v6846_v9, %v10424_v33 }
 0x517   :  { %v6932_v27 = vpop.f32.mrf.mxu1 }
 0x518   :  { %v6162_v62 = vadd.f32 %v6931_v49, %v6001_v24 }
 0x519   :  { %v6933_v10 = vpop.f32.mrf.mxu1 }
 0x51a   :  { %6222 = vst [vmem:[%s10640_s7 + $0xb0] sm:$0xff] %v6162_v62  ;;  %v6934_v36 = vadd.f32 %v6933_v10, %v6932_v27 }
 0x51b   :  { %v6935_v60 = vpop.f32.mrf.mxu1 }
 0x51c   :  { %v6165_v59 = vadd.f32 %v6934_v36, %v6004_v19 }
 0x51d   :  { %v6936_v61 = vpop.f32.mrf.mxu1 }
 0x51e   :  { %6223 = vst [vmem:[%s10640_s7 + $0xb8] sm:$0xff] %v6165_v59  ;;  %v6937_v7 = vadd.f32 %v6936_v61, %v6935_v60 }
 0x51f   :  { %v6938_v15 = vpop.f32.mrf.mxu1 }
 0x520   :  { %v6170_v45 = vadd.f32 %v6937_v7, %v6009_v8 }
 0x521   :  { %v6939_v32 = vpop.f32.mrf.mxu1 }
 0x522   :  { %6224 = vst [vmem:[%s10640_s7 + $0xc0] sm:$0xff] %v6170_v45  ;;  %v6940_v50 = vadd.f32 %v6939_v32, %v6938_v15 }
 0x523   :  { %v6941_v21 = vpop.f32.mrf.mxu1 }
 0x524   :  { %v6173_v4 = vadd.f32 %v6940_v50, %v6012_v2 }
 0x525   :  { %v6942_v56 = vpop.f32.mrf.mxu1 }
 0x526   :  { %6225 = vst [vmem:[%s10640_s7 + $0xc8] sm:$0xff] %v6173_v4  ;;  %v6943_v37 = vadd.f32 %v6942_v56, %v6941_v21 }
 0x527   :  { %v6944_v20 = vpop.f32.mrf.mxu1 }
 0x528   :  { %v6178_v42 = vadd.f32 %v6943_v37, %v6017_v43 }
 0x529   :  { %v6945_v54 = vpop.f32.mrf.mxu1 }
 0x52a   :  { %6226 = vst [vmem:[%s10640_s7 + $0xd0] sm:$0xff] %v6178_v42  ;;  %v6946_v47 = vadd.f32 %v6945_v54, %v6944_v20 }
 0x52b   :  { %v6947_v31 = vpop.f32.mrf.mxu1 }
 0x52c   :  { %v6181_v52 = vadd.f32 %v6946_v47, %v6020_v17 }
 0x52d   :  { %v6948_v40 = vpop.f32.mrf.mxu1 }
 0x52e   :  { %6227 = vst [vmem:[%s10640_s7 + $0xd8] sm:$0xff] %v6181_v52  ;;  %v6949_v41 = vadd.f32 %v6948_v40, %v6947_v31 }
 0x52f   :  { %v6950_v63 = vpop.f32.mrf.mxu1 }
 0x530   :  { %v6186_v0 = vadd.f32 %v6949_v41, %v6025_v11 }
 0x531   :  { %v6951_v16 = vpop.f32.mrf.mxu1 }
 0x532   :  { %6228 = vst [vmem:[%s10640_s7 + $0xe0] sm:$0xff] %v6186_v0  ;;  %v6952_v18 = vadd.f32 %v6951_v16, %v6950_v63 }
 0x533   :  { %v6953_v57 = vpop.f32.mrf.mxu1 }
 0x534   :  { %v6189_v3 = vadd.f32 %v6952_v18, %v6028_v34 }
 0x535   :  { %v6954_v14 = vpop.f32.mrf.mxu1 }
 0x536   :  { %6229 = vst [vmem:[%s10640_s7 + $0xe8] sm:$0xff] %v6189_v3  ;;  %v6955_v55 = vadd.f32 %v6954_v14, %v6953_v57 }
 0x537   :  { %v6956_v38 = vpop.f32.mrf.mxu1 }
 0x538   :  { %v6194_v23 = vadd.f32 %v6955_v55, %v6033_v35 }
 0x539   :  { %v6957_v13 = vpop.f32.mrf.mxu1 }
 0x53a   :  { %6230 = vst [vmem:[%s10640_s7 + $0xf0] sm:$0xff] %v6194_v23  ;;  %v6958_v24 = vadd.f32 %v6957_v13, %v6956_v38 }
 0x53c   :  { %v6197_v25 = vadd.f32 %v6958_v24, %v6036_v29 }
 0x53e   :  { %6231 = vst [vmem:[%s10640_s7 + $0xf8] sm:$0xff] %v6197_v25 }
 0x53f   :  { %6236 = vsyncpa [#allocation3], 1 }
 0x540   :  { %6237 = vsyncpa [#allocation5], 1 }

</bundles_post_ra>
